<compile_context>
chip_gen: v6e
topology: v6e:2x2x1
jax: 0.10.0
libtpu: 0.0.40
codegen_flags: <defaults>
</compile_context>

<pallas_src>
import math
import functools

import jax
import jax.numpy as jnp
from jax.experimental import pallas as pl
from jax.experimental.pallas import tpu as pltpu


def _layernorm(x, w, b, eps):
    mu = jnp.mean(x, axis=-1, keepdims=True)
    var = jnp.mean((x - mu) ** 2, axis=-1, keepdims=True)
    return (x - mu) * jax.lax.rsqrt(var + eps) * w + b


def _gelu(x):
    # TODO(synk): torch nn.GELU() defaults to the exact erf form; tanh approximation used here.
    return 0.5 * x * (1.0 + jnp.tanh(0.7978845608028654 * (x + 0.044715 * x * x * x)))


# --------------------------------------------------------------------------- #
# Kernel
# --------------------------------------------------------------------------- #
def transformer_block_kernel(x_ref, ln1w, ln1b, wq, wk, wv, bq, bk, bv,
                             cpw, cpb, ln2w, ln2b, fcw, fcb, fpw, fpb,
                             lnfw, lnfb,
                             xo_ref, attn_ref,
                             k_sc, v_sc, m_sc, l_sc, ctx_sc,
                             *, num_heads, eps, tq, nq, apply_final_ln):
    D = x_ref.shape[2]
    H = num_heads
    hd = D // H
    scale = 1.0 / math.sqrt(hd)
    bf16 = jnp.bfloat16
    qt = pl.program_id(1)
    q0 = pl.multiple_of(qt * tq, tq)

    # ---- LN1 + QKV projection for the current query tile only (incremental K/V) ----
    x_tile = x_ref[0, pl.ds(q0, tq), :]                                    # (tq, D) f32
    xn = _layernorm(x_tile, ln1w[...], ln1b[...], eps).astype(bf16)
    xb = jnp.broadcast_to(xn, (H, tq, D))        # hoisted once, feeds 3 batched matmuls

    def hproj(w_ref, b_ref):                     # (H,tq,D) x (H,D,hd) -> (H,tq,hd)
        o = jnp.einsum('htd,hde->hte', xb, w_ref[...],
                       preferred_element_type=jnp.float32) + b_ref[...]
        return o.astype(bf16)

    q = hproj(wq, bq)                            # (H, tq, hd) bf16
    k_sc[qt] = hproj(wk, bk)                     # append this tile's K/V to scratch
    v_sc[qt] = hproj(wv, bv)

    # ---- causal, key-tiled two-pass softmax over keys [0, (qt+1)*tq) ----
    attn_ref[...] = jnp.zeros_like(attn_ref)     # covers the causally-skipped tail tiles
    m_sc[...] = jnp.full_like(m_sc, -jnp.inf)
    l_sc[...] = jnp.zeros_like(l_sc)
    ctx_sc[...] = jnp.zeros_like(ctx_sc)

    row = q0 + jax.lax.broadcasted_iota(jnp.int32, (1, tq, tq), 1)

    def scores(j):
        s = jnp.einsum('hqd,hkd->hqk', q, k_sc[j],
                       preferred_element_type=jnp.float32) * scale         # (H, tq, tq)
        col = j * tq + jax.lax.broadcasted_iota(jnp.int32, (1, tq, tq), 2)
        # NOTE: -1e30 mask constant is valid only while scores stay in f32.
        return jnp.where(row >= col, s, -1e30)

    for j in range(nq):                          # pass 1: row max (visible tiles only)
        @pl.when(j <= qt)
        def _(j=j):
            m_sc[...] = jnp.maximum(m_sc[...],
                                    jnp.max(scores(j), axis=-1, keepdims=True))

    for j in range(nq):                          # pass 2: exp, sum, PV accum, store e
        @pl.when(j <= qt)
        def _(j=j):
            e = jnp.exp(scores(j) - m_sc[...])
            l_sc[...] += jnp.sum(e, axis=-1, keepdims=True)
            ctx_sc[...] += jnp.einsum('hqk,hkd->hqd', e.astype(bf16), v_sc[j],
                                      preferred_element_type=jnp.float32)
            attn_ref[0, :, :, j * tq:(j + 1) * tq] = e.astype(attn_ref.dtype)

    inv_l = 1.0 / l_sc[...]                      # exact reciprocal for exported probs

    for j in range(nq):                          # pass 3: normalize stored prob tiles
        @pl.when(j <= qt)
        def _(j=j):
            p = attn_ref[0, :, :, j * tq:(j + 1) * tq].astype(jnp.float32) * inv_l
            attn_ref[0, :, :, j * tq:(j + 1) * tq] = p.astype(attn_ref.dtype)

    ctx = (ctx_sc[...] * inv_l).astype(bf16)                               # (H, tq, hd)

    # ---- output projection: head concat folded into a batched matmul + head-sum ----
    y = jnp.sum(jnp.einsum('hqd,hde->hqe', ctx, cpw[...],
                           preferred_element_type=jnp.float32), axis=0) + cpb[...]
    x1 = x_tile + y                                                        # residual

    # ---- MLP ----
    xn2 = _layernorm(x1, ln2w[...], ln2b[...], eps).astype(bf16)
    hmid = jnp.dot(xn2, fcw[...], preferred_element_type=jnp.float32) + fcb[...]
    hmid = _gelu(hmid).astype(bf16)
    mo = jnp.dot(hmid, fpw[...], preferred_element_type=jnp.float32) + fpb[...]
    out = x1 + mo

    if apply_final_ln:                           # fused ln_f on the last layer
        out = _layernorm(out, lnfw[...], lnfb[...], eps)
    xo_ref[0] = out


# --------------------------------------------------------------------------- #
# Hardware-aware sizing helpers
# --------------------------------------------------------------------------- #
def _hw_config():
    try:
        vmem_cap = int(pltpu.get_tpu_info().vmem_capacity_bytes)
    except Exception:
        vmem_cap = 64 << 20                      # conservative (v7x-sized) fallback
    kind = ""
    try:
        kind = jax.devices()[0].device_kind.lower()
    except Exception:
        pass
    # v5e: 4x128^2 MXU -> tq>128 buys nothing; v7x: 64 MiB VMEM -> tq<=128;
    # v6e: 128 MiB VMEM + 256-wide MXU -> tq=256.
    pref = 256 if ("v6" in kind and vmem_cap >= (96 << 20)) else 128
    return vmem_cap, pref


def _pick_tile(T, pref):
    if T >= pref:
        tq = pref
    else:
        tq = max(8, ((T + 7) // 8) * 8)          # small T: single, 8-aligned tile
    T_pad = ((T + tq - 1) // tq) * tq
    return tq, T_pad


def _vmem_limit_bytes(T_pad, D, H, tq, vmem_cap):
    f32, bf16 = 4, 2
    hd = D // H
    weights = 12 * D * D * bf16                  # single-buffered bf16 matmul weights
    small = 32 * D * f32                         # LN params + biases (generous)
    x_in = 2 * T_pad * D * f32                   # double-buffered input block
    xo = 2 * tq * D * f32
    attn_o = 2 * H * tq * T_pad * bf16           # double-buffered bf16 prob block
    kv = 2 * H * T_pad * hd * bf16               # K/V scratch
    live = (3 * H * tq * tq * f32                # score/exp tiles (key-tiled)
            + H * tq * D * (bf16 + f32)          # broadcast xn + per-head proj out
            + 8 * tq * D * f32                   # MLP hidden
            + 8 * tq * D * f32)                  # misc activations
    est = int((weights + small + x_in + xo + attn_o + kv + live) * 1.5) + (4 << 20)
    return max(16 << 20, min(est, int(vmem_cap * 0.85)))


@functools.lru_cache(maxsize=None)
def _single_buffer_ok():
    """Probe whether pipeline_mode=pl.Buffered(1) is supported on this install."""
    def _probe(x_ref, o_ref):
        o_ref[...] = x_ref[...]
    try:
        spec = pl.BlockSpec((8, 128), lambda i: (0, 0),
                            pipeline_mode=pl.Buffered(buffer_count=1))
        out = pl.pallas_call(
            _probe, grid=(1,), in_specs=[spec],
            out_specs=pl.BlockSpec((8, 128), lambda i: (0, 0)),
            out_shape=jax.ShapeDtypeStruct((8, 128), jnp.float32),
        )(jnp.zeros((8, 128), jnp.float32))
        jax.block_until_ready(out)
        return True
    except Exception:
        return False


# --------------------------------------------------------------------------- #
# pallas_call wrapper for one transformer block
# --------------------------------------------------------------------------- #
def run_block(x, blk, lnf_w, lnf_b, *, num_heads, eps, apply_final_ln, tq, vmem_cap):
    B, T_pad, D = x.shape
    H = num_heads
    assert D % H == 0
    hd = D // H
    nq = T_pad // tq

    weights = (blk['ln1_w'], blk['ln1_b'],
               blk['wq'], blk['wk'], blk['wv'], blk['bq'], blk['bk'], blk['bv'],
               blk['cpw'], blk['cpb'], blk['ln2_w'], blk['ln2_b'],
               blk['fc_w'], blk['fc_b'], blk['fc_proj_w'], blk['fc_proj_b'],
               lnf_w, lnf_b)

    single_buf = _single_buffer_ok()

    def const_spec(shape):
        idx = lambda b, q, _n=len(shape): (0,) * _n   # constant -> VMEM-resident
        if single_buf:
            return pl.BlockSpec(shape, idx, pipeline_mode=pl.Buffered(buffer_count=1))
        return pl.BlockSpec(shape, idx)

    in_specs = [pl.BlockSpec((1, T_pad, D), lambda b, q: (b, 0, 0))]
    in_specs += [const_spec(w.shape) for w in weights]

    out_specs = (
        pl.BlockSpec((1, tq, D), lambda b, q: (b, q, 0)),
        pl.BlockSpec((1, H, tq, T_pad), lambda b, q: (b, 0, q, 0)),
    )
    out_shape = (
        jax.ShapeDtypeStruct((B, T_pad, D), jnp.float32),
        jax.ShapeDtypeStruct((B, H, T_pad, T_pad), jnp.bfloat16),   # bf16 probs
    )

    kern = functools.partial(transformer_block_kernel, num_heads=H, eps=eps,
                             tq=tq, nq=nq, apply_final_ln=apply_final_ln)
    return pl.pallas_call(
        kern,
        grid=(B, nq),
        in_specs=in_specs,
        out_specs=out_specs,
        out_shape=out_shape,
        scratch_shapes=[
            pltpu.VMEM((nq, H, tq, hd), jnp.bfloat16),   # K cache (this batch elem)
            pltpu.VMEM((nq, H, tq, hd), jnp.bfloat16),   # V cache
            pltpu.VMEM((H, tq, 1), jnp.float32),         # running max
            pltpu.VMEM((H, tq, 1), jnp.float32),         # running sum
            pltpu.VMEM((H, tq, hd), jnp.float32),        # ctx accumulator
        ],
        compiler_params=pltpu.CompilerParams(
            dimension_semantics=("parallel", "arbitrary"),
            vmem_limit_bytes=_vmem_limit_bytes(T_pad, D, H, tq, vmem_cap),
        ),
    )(x, *weights)


# --------------------------------------------------------------------------- #
# Parameters
# --------------------------------------------------------------------------- #
def init_params(key, vocab_size, max_seq_len, D, num_layers):
    std = 0.02
    proj_std = std / math.sqrt(2 * num_layers)   # matches initialize_parameters()
    keys = jax.random.split(key, 2 + num_layers)
    wte = jax.random.normal(keys[0], (vocab_size, D), jnp.float32) * std
    wpe = jax.random.normal(keys[1], (max_seq_len, D), jnp.float32) * std
    blocks = []
    for l in range(num_layers):
        bk = jax.random.split(keys[2 + l], 4)
        blocks.append(dict(
            ln1_w=jnp.ones((1, D), jnp.float32), ln1_b=jnp.zeros((1, D), jnp.float32),
            c_attn_w=jax.random.normal(bk[0], (D, 3 * D), jnp.float32) * std,
            c_attn_b=jnp.zeros((1, 3 * D), jnp.float32),
            c_proj_w=jax.random.normal(bk[1], (D, D), jnp.float32) * proj_std,
            c_proj_b=jnp.zeros((1, D), jnp.float32),
            ln2_w=jnp.ones((1, D), jnp.float32), ln2_b=jnp.zeros((1, D), jnp.float32),
            fc_w=jax.random.normal(bk[2], (D, 4 * D), jnp.float32) * std,
            fc_b=jnp.zeros((1, 4 * D), jnp.float32),
            fc_proj_w=jax.random.normal(bk[3], (4 * D, D), jnp.float32) * proj_std,
            fc_proj_b=jnp.zeros((1, D), jnp.float32),
        ))
    ln_f = dict(w=jnp.ones((1, D), jnp.float32), b=jnp.zeros((1, D), jnp.float32))
    return wte, wpe, blocks, ln_f


def prepare_params(wte, wpe, blocks, ln_f, num_heads):
    """One-time host-side prep: bf16 MXU weights in head-major kernel layouts."""
    D = wte.shape[1]
    H = num_heads
    hd = D // H
    bf16 = jnp.bfloat16

    def head_major(w):                           # (D, D) -> (H, D, hd)
        return jnp.transpose(w.reshape(D, H, hd), (1, 0, 2)).astype(bf16)

    prepped = []
    for blk in blocks:
        caw = blk['c_attn_w']                    # (D, 3D)
        cab = blk['c_attn_b'].reshape(3 * D)
        prepped.append(dict(
            ln1_w=blk['ln1_w'], ln1_b=blk['ln1_b'],
            wq=head_major(caw[:, :D]),
            wk=head_major(caw[:, D:2 * D]),
            wv=head_major(caw[:, 2 * D:]),
            bq=cab[:D].reshape(H, 1, hd),
            bk=cab[D:2 * D].reshape(H, 1, hd),
            bv=cab[2 * D:].reshape(H, 1, hd),
            cpw=blk['c_proj_w'].reshape(H, hd, D).astype(bf16),
            cpb=blk['c_proj_b'],
            ln2_w=blk['ln2_w'], ln2_b=blk['ln2_b'],
            fc_w=blk['fc_w'].astype(bf16), fc_b=blk['fc_b'],
            fc_proj_w=blk['fc_proj_w'].astype(bf16), fc_proj_b=blk['fc_proj_b'],
        ))
    return wte, wpe, prepped, ln_f


# --------------------------------------------------------------------------- #
# Forward pass
# --------------------------------------------------------------------------- #
@functools.partial(jax.jit, static_argnames=("num_heads", "eps"))
def transformer_forward(input_ids, wte, wpe, blocks, ln_f, *, num_heads, eps):
    """is_causal=True path: attention_mask is ignored (set to None)."""
    B, T = input_ids.shape
    tok = jnp.take(wte, input_ids, axis=0)        # glue: embedding gather (XLA)
    pos = wpe[:T][None]                           # (1, T, D)
    x = (tok + pos).astype(jnp.float32)           # dropout p -> identity (eval)

    vmem_cap, pref = _hw_config()
    tq, T_pad = _pick_tile(T, pref)
    if T_pad != T:
        x = jnp.pad(x, ((0, 0), (0, T_pad - T), (0, 0)))

    attn_all = []
    n_layers = len(blocks)
    for i, blk in enumerate(blocks):
        x, attn = run_block(x, blk, ln_f['w'], ln_f['b'],
                            num_heads=num_heads, eps=eps,
                            apply_final_ln=(i == n_layers - 1),
                            tq=tq, vmem_cap=vmem_cap)
        attn_all.append(attn)

    attn = jnp.stack(attn_all)[:, :, :, :T, :T]   # (L, B, H, T, T) bf16 probabilities
    return {'embeddings': x[:, :T, :],
            'attention_probabilities': attn}


if __name__ == "__main__":
    vocab_size, max_seq_len = 64, 16
    embedding_dim, num_layers, num_heads = 32, 2, 4
    layer_norm_eps = 1e-5
    B, T = 2, 8

    key = jax.random.PRNGKey(0)
    kparams, kids = jax.random.split(key)
    wte, wpe, blocks, ln_f = init_params(kparams, vocab_size, max_seq_len,
                                         embedding_dim, num_layers)
    wte, wpe, pblocks, ln_f = prepare_params(wte, wpe, blocks, ln_f, num_heads)
    input_ids = jax.random.randint(kids, (B, T), 0, vocab_size, dtype=jnp.int32)

    out = transformer_forward(input_ids, wte, wpe, pblocks, ln_f,
                              num_heads=num_heads, eps=layer_norm_eps)
    jax.block_until_ready(out)

    emb = out['embeddings']
    probs = out['attention_probabilities']
    assert emb.shape == (B, T, embedding_dim)
    assert probs.shape == (num_layers, B, num_heads, T, T)
    assert bool(jnp.all(jnp.isfinite(emb)))
    # softmax rows sum to ~1 (bf16 storage tolerance) and respect causality
    row_sums = jnp.sum(probs.astype(jnp.float32), axis=-1)
    assert bool(jnp.all(jnp.abs(row_sums - 1.0) < 3e-2))
    upper = jnp.triu(jnp.ones((T, T), bool), k=1)
    assert bool(jnp.all(jnp.where(upper, probs.astype(jnp.float32), 0.0) == 0.0))
    print("KERNEL_OK")
</pallas_src>

<mosaic_0001>
module attributes {stable_mosaic.version = 11 : i64} {
  func.func @transformer_block_kernel(%arg0: i32, %arg1: i32, %arg2: memref<1x8x32xf32, #tpu.memory_space<vmem>>, %arg3: memref<1x32xf32, #tpu.memory_space<vmem>>, %arg4: memref<1x32xf32, #tpu.memory_space<vmem>>, %arg5: memref<4x32x8xbf16, #tpu.memory_space<vmem>>, %arg6: memref<4x32x8xbf16, #tpu.memory_space<vmem>>, %arg7: memref<4x32x8xbf16, #tpu.memory_space<vmem>>, %arg8: memref<4x1x8xf32, #tpu.memory_space<vmem>>, %arg9: memref<4x1x8xf32, #tpu.memory_space<vmem>>, %arg10: memref<4x1x8xf32, #tpu.memory_space<vmem>>, %arg11: memref<4x8x32xbf16, #tpu.memory_space<vmem>>, %arg12: memref<1x32xf32, #tpu.memory_space<vmem>>, %arg13: memref<1x32xf32, #tpu.memory_space<vmem>>, %arg14: memref<1x32xf32, #tpu.memory_space<vmem>>, %arg15: memref<32x128xbf16, #tpu.memory_space<vmem>>, %arg16: memref<1x128xf32, #tpu.memory_space<vmem>>, %arg17: memref<128x32xbf16, #tpu.memory_space<vmem>>, %arg18: memref<1x32xf32, #tpu.memory_space<vmem>>, %arg19: memref<1x32xf32, #tpu.memory_space<vmem>>, %arg20: memref<1x32xf32, #tpu.memory_space<vmem>>, %arg21: memref<1x8x32xf32, #tpu.memory_space<vmem>>, %arg22: memref<1x4x8x8xbf16, #tpu.memory_space<vmem>>, %arg23: memref<1x4x8x8xbf16, #tpu.memory_space<vmem>>, %arg24: memref<1x4x8x8xbf16, #tpu.memory_space<vmem>>, %arg25: memref<4x8x1xf32, #tpu.memory_space<vmem>>, %arg26: memref<4x8x1xf32, #tpu.memory_space<vmem>>, %arg27: memref<4x8x8xf32, #tpu.memory_space<vmem>>) attributes {dimension_semantics = [#tpu.dimension_semantics<parallel>, #tpu.dimension_semantics<arbitrary>], iteration_bounds = array<i64: 2, 1>, scalar_prefetch = 0 : i64, scratch_operands = 5 : i64, tpu.core_type = #tpu.core_type<tc>, window_params = [{transform_indices = @transform_0, window_bounds = array<i64: 1, 8, 32>}, {pipeline_mode = #tpu.pipeline_mode<synchronous>, transform_indices = @transform_1, window_bounds = array<i64: 1, 32>}, {pipeline_mode = #tpu.pipeline_mode<synchronous>, transform_indices = @transform_2, window_bounds = array<i64: 1, 32>}, {pipeline_mode = #tpu.pipeline_mode<synchronous>, transform_indices = @transform_3, window_bounds = array<i64: 4, 32, 8>}, {pipeline_mode = #tpu.pipeline_mode<synchronous>, transform_indices = @transform_4, window_bounds = array<i64: 4, 32, 8>}, {pipeline_mode = #tpu.pipeline_mode<synchronous>, transform_indices = @transform_5, window_bounds = array<i64: 4, 32, 8>}, {pipeline_mode = #tpu.pipeline_mode<synchronous>, transform_indices = @transform_6, window_bounds = array<i64: 4, 1, 8>}, {pipeline_mode = #tpu.pipeline_mode<synchronous>, transform_indices = @transform_7, window_bounds = array<i64: 4, 1, 8>}, {pipeline_mode = #tpu.pipeline_mode<synchronous>, transform_indices = @transform_8, window_bounds = array<i64: 4, 1, 8>}, {pipeline_mode = #tpu.pipeline_mode<synchronous>, transform_indices = @transform_9, window_bounds = array<i64: 4, 8, 32>}, {pipeline_mode = #tpu.pipeline_mode<synchronous>, transform_indices = @transform_10, window_bounds = array<i64: 1, 32>}, {pipeline_mode = #tpu.pipeline_mode<synchronous>, transform_indices = @transform_11, window_bounds = array<i64: 1, 32>}, {pipeline_mode = #tpu.pipeline_mode<synchronous>, transform_indices = @transform_12, window_bounds = array<i64: 1, 32>}, {pipeline_mode = #tpu.pipeline_mode<synchronous>, transform_indices = @transform_13, window_bounds = array<i64: 32, 128>}, {pipeline_mode = #tpu.pipeline_mode<synchronous>, transform_indices = @transform_14, window_bounds = array<i64: 1, 128>}, {pipeline_mode = #tpu.pipeline_mode<synchronous>, transform_indices = @transform_15, window_bounds = array<i64: 128, 32>}, {pipeline_mode = #tpu.pipeline_mode<synchronous>, transform_indices = @transform_16, window_bounds = array<i64: 1, 32>}, {pipeline_mode = #tpu.pipeline_mode<synchronous>, transform_indices = @transform_17, window_bounds = array<i64: 1, 32>}, {pipeline_mode = #tpu.pipeline_mode<synchronous>, transform_indices = @transform_18, window_bounds = array<i64: 1, 32>}, {transform_indices = @transform_19, window_bounds = array<i64: 1, 8, 32>}, {transform_indices = @transform_20, window_bounds = array<i64: 1, 4, 8, 8>}]} {
    %c8_i32 = arith.constant 8 : i32
    %0 = arith.muli %arg1, %c8_i32 : i32
    %1 = tpu.assume_multiple %0, 8 : i32
    %c0 = arith.constant 0 : index
    %2 = arith.index_cast %1 : i32 to index
    %c0_0 = arith.constant 0 : index
    %3 = vector.load %arg2[%c0, %2, %c0_0] : memref<1x8x32xf32, #tpu.memory_space<vmem>>, vector<1x8x32xf32>
    %4 = vector.shape_cast %3 : vector<1x8x32xf32> to vector<8x32xf32>
    %c0_1 = arith.constant 0 : index
    %c0_2 = arith.constant 0 : index
    %5 = vector.load %arg3[%c0_1, %c0_2] : memref<1x32xf32, #tpu.memory_space<vmem>>, vector<1x32xf32>
    %c0_3 = arith.constant 0 : index
    %c0_4 = arith.constant 0 : index
    %6 = vector.load %arg4[%c0_3, %c0_4] : memref<1x32xf32, #tpu.memory_space<vmem>>, vector<1x32xf32>
    %cst = arith.constant dense<0.000000e+00> : vector<8xf32>
    %7 = vector.multi_reduction <add>, %4, %cst [1] : vector<8x32xf32> to vector<8xf32>
    %8 = vector.shape_cast %7 : vector<8xf32> to vector<8x1xf32>
    %cst_5 = arith.constant 3.200000e+01 : f32
    %9 = vector.broadcast %cst_5 : f32 to vector<8x1xf32>
    %10 = arith.divf %8, %9 : vector<8x1xf32>
    %11 = vector.broadcast %10 : vector<8x1xf32> to vector<8x32xf32>
    %12 = arith.subf %4, %11 : vector<8x32xf32>
    %13 = arith.mulf %12, %12 : vector<8x32xf32>
    %cst_6 = arith.constant dense<0.000000e+00> : vector<8xf32>
    %14 = vector.multi_reduction <add>, %13, %cst_6 [1] : vector<8x32xf32> to vector<8xf32>
    %15 = vector.shape_cast %14 : vector<8xf32> to vector<8x1xf32>
    %cst_7 = arith.constant 3.200000e+01 : f32
    %16 = vector.broadcast %cst_7 : f32 to vector<8x1xf32>
    %17 = arith.divf %15, %16 : vector<8x1xf32>
    %18 = vector.broadcast %10 : vector<8x1xf32> to vector<8x32xf32>
    %19 = arith.subf %4, %18 : vector<8x32xf32>
    %cst_8 = arith.constant 9.99999974E-6 : f32
    %20 = vector.broadcast %cst_8 : f32 to vector<8x1xf32>
    %21 = arith.addf %17, %20 : vector<8x1xf32>
    %22 = math.rsqrt %21 : vector<8x1xf32>
    %23 = vector.broadcast %22 : vector<8x1xf32> to vector<8x32xf32>
    %24 = arith.mulf %19, %23 : vector<8x32xf32>
    %25 = vector.broadcast %5 : vector<1x32xf32> to vector<8x32xf32>
    %26 = arith.mulf %24, %25 : vector<8x32xf32>
    %27 = vector.broadcast %6 : vector<1x32xf32> to vector<8x32xf32>
    %28 = arith.addf %26, %27 : vector<8x32xf32>
    %29 = arith.truncf %28 : vector<8x32xf32> to vector<8x32xbf16>
    %30 = vector.shape_cast %29 : vector<8x32xbf16> to vector<1x8x32xbf16>
    %31 = vector.broadcast %30 : vector<1x8x32xbf16> to vector<4x8x32xbf16>
    %c0_9 = arith.constant 0 : index
    %c0_10 = arith.constant 0 : index
    %c0_11 = arith.constant 0 : index
    %32 = vector.load %arg5[%c0_9, %c0_10, %c0_11] : memref<4x32x8xbf16, #tpu.memory_space<vmem>>, vector<4x32x8xbf16>
    "tpu.trace_start"() <{level = 10 : i32, message = "htd,hde->hte"}> : () -> ()
    %cst_12 = arith.constant dense<0.000000e+00> : vector<4x8x8xf32>
    %33 = tpu.matmul %31, %32, %cst_12 {dimension_numbers = #tpu.dot_dimension_numbers<[2], [1], [1], [2], [0, 0, 0, 1, 1, 2], [0], [0]>} : vector<4x8x32xbf16>, vector<4x32x8xbf16>, vector<4x8x8xf32> -> vector<4x8x8xf32>
    "tpu.trace_stop"() : () -> ()
    %c0_13 = arith.constant 0 : index
    %c0_14 = arith.constant 0 : index
    %c0_15 = arith.constant 0 : index
    %34 = vector.load %arg8[%c0_13, %c0_14, %c0_15] : memref<4x1x8xf32, #tpu.memory_space<vmem>>, vector<4x1x8xf32>
    %35 = vector.broadcast %34 : vector<4x1x8xf32> to vector<4x8x8xf32>
    %36 = arith.addf %33, %35 : vector<4x8x8xf32>
    %37 = arith.truncf %36 : vector<4x8x8xf32> to vector<4x8x8xbf16>
    %c0_16 = arith.constant 0 : index
    %c0_17 = arith.constant 0 : index
    %c0_18 = arith.constant 0 : index
    %38 = vector.load %arg6[%c0_16, %c0_17, %c0_18] : memref<4x32x8xbf16, #tpu.memory_space<vmem>>, vector<4x32x8xbf16>
    "tpu.trace_start"() <{level = 10 : i32, message = "htd,hde->hte"}> : () -> ()
    %cst_19 = arith.constant dense<0.000000e+00> : vector<4x8x8xf32>
    %39 = tpu.matmul %31, %38, %cst_19 {dimension_numbers = #tpu.dot_dimension_numbers<[2], [1], [1], [2], [0, 0, 0, 1, 1, 2], [0], [0]>} : vector<4x8x32xbf16>, vector<4x32x8xbf16>, vector<4x8x8xf32> -> vector<4x8x8xf32>
    "tpu.trace_stop"() : () -> ()
    %c0_20 = arith.constant 0 : index
    %c0_21 = arith.constant 0 : index
    %c0_22 = arith.constant 0 : index
    %40 = vector.load %arg9[%c0_20, %c0_21, %c0_22] : memref<4x1x8xf32, #tpu.memory_space<vmem>>, vector<4x1x8xf32>
    %41 = vector.broadcast %40 : vector<4x1x8xf32> to vector<4x8x8xf32>
    %42 = arith.addf %39, %41 : vector<4x8x8xf32>
    %43 = arith.truncf %42 : vector<4x8x8xf32> to vector<4x8x8xbf16>
    %44 = arith.index_cast %arg1 : i32 to index
    %c0_23 = arith.constant 0 : index
    %c0_24 = arith.constant 0 : index
    %c0_25 = arith.constant 0 : index
    %45 = vector.load %arg23[%44, %c0_23, %c0_24, %c0_25] : memref<1x4x8x8xbf16, #tpu.memory_space<vmem>>, vector<1x4x8x8xbf16>
    %46 = vector.shape_cast %45 : vector<1x4x8x8xbf16> to vector<4x8x8xbf16>
    %47 = vector.shape_cast %43 : vector<4x8x8xbf16> to vector<1x4x8x8xbf16>
    tpu.vector_store %arg23[%44, %c0_23, %c0_24, %c0_25], %47 {strides = array<i32>} : memref<1x4x8x8xbf16, #tpu.memory_space<vmem>>, vector<1x4x8x8xbf16>,
    %c0_26 = arith.constant 0 : index
    %c0_27 = arith.constant 0 : index
    %c0_28 = arith.constant 0 : index
    %48 = vector.load %arg7[%c0_26, %c0_27, %c0_28] : memref<4x32x8xbf16, #tpu.memory_space<vmem>>, vector<4x32x8xbf16>
    "tpu.trace_start"() <{level = 10 : i32, message = "htd,hde->hte"}> : () -> ()
    %cst_29 = arith.constant dense<0.000000e+00> : vector<4x8x8xf32>
    %49 = tpu.matmul %31, %48, %cst_29 {dimension_numbers = #tpu.dot_dimension_numbers<[2], [1], [1], [2], [0, 0, 0, 1, 1, 2], [0], [0]>} : vector<4x8x32xbf16>, vector<4x32x8xbf16>, vector<4x8x8xf32> -> vector<4x8x8xf32>
    "tpu.trace_stop"() : () -> ()
    %c0_30 = arith.constant 0 : index
    %c0_31 = arith.constant 0 : index
    %c0_32 = arith.constant 0 : index
    %50 = vector.load %arg10[%c0_30, %c0_31, %c0_32] : memref<4x1x8xf32, #tpu.memory_space<vmem>>, vector<4x1x8xf32>
    %51 = vector.broadcast %50 : vector<4x1x8xf32> to vector<4x8x8xf32>
    %52 = arith.addf %49, %51 : vector<4x8x8xf32>
    %53 = arith.truncf %52 : vector<4x8x8xf32> to vector<4x8x8xbf16>
    %54 = arith.index_cast %arg1 : i32 to index
    %c0_33 = arith.constant 0 : index
    %c0_34 = arith.constant 0 : index
    %c0_35 = arith.constant 0 : index
    %55 = vector.load %arg24[%54, %c0_33, %c0_34, %c0_35] : memref<1x4x8x8xbf16, #tpu.memory_space<vmem>>, vector<1x4x8x8xbf16>
    %56 = vector.shape_cast %55 : vector<1x4x8x8xbf16> to vector<4x8x8xbf16>
    %57 = vector.shape_cast %53 : vector<4x8x8xbf16> to vector<1x4x8x8xbf16>
    tpu.vector_store %arg24[%54, %c0_33, %c0_34, %c0_35], %57 {strides = array<i32>} : memref<1x4x8x8xbf16, #tpu.memory_space<vmem>>, vector<1x4x8x8xbf16>,
    %cst_36 = arith.constant 0.000000e+00 : bf16
    %58 = vector.broadcast %cst_36 : bf16 to vector<1x4x8x8xbf16>
    %c0_37 = arith.constant 0 : index
    %c0_38 = arith.constant 0 : index
    %c0_39 = arith.constant 0 : index
    %c0_40 = arith.constant 0 : index
    %59 = vector.load %arg22[%c0_37, %c0_38, %c0_39, %c0_40] : memref<1x4x8x8xbf16, #tpu.memory_space<vmem>>, vector<1x4x8x8xbf16>
    tpu.vector_store %arg22[%c0_37, %c0_38, %c0_39, %c0_40], %58 {strides = array<i32>} : memref<1x4x8x8xbf16, #tpu.memory_space<vmem>>, vector<1x4x8x8xbf16>,
    %cst_41 = arith.constant 0xFF800000 : f32
    %60 = vector.broadcast %cst_41 : f32 to vector<4x8x1xf32>
    %c0_42 = arith.constant 0 : index
    %c0_43 = arith.constant 0 : index
    %c0_44 = arith.constant 0 : index
    %61 = vector.load %arg25[%c0_42, %c0_43, %c0_44] : memref<4x8x1xf32, #tpu.memory_space<vmem>>, vector<4x8x1xf32>
    tpu.vector_store %arg25[%c0_42, %c0_43, %c0_44], %60 {strides = array<i32>} : memref<4x8x1xf32, #tpu.memory_space<vmem>>, vector<4x8x1xf32>,
    %cst_45 = arith.constant 0.000000e+00 : f32
    %62 = vector.broadcast %cst_45 : f32 to vector<4x8x1xf32>
    %c0_46 = arith.constant 0 : index
    %c0_47 = arith.constant 0 : index
    %c0_48 = arith.constant 0 : index
    %63 = vector.load %arg26[%c0_46, %c0_47, %c0_48] : memref<4x8x1xf32, #tpu.memory_space<vmem>>, vector<4x8x1xf32>
    tpu.vector_store %arg26[%c0_46, %c0_47, %c0_48], %62 {strides = array<i32>} : memref<4x8x1xf32, #tpu.memory_space<vmem>>, vector<4x8x1xf32>,
    %cst_49 = arith.constant 0.000000e+00 : f32
    %64 = vector.broadcast %cst_49 : f32 to vector<4x8x8xf32>
    %c0_50 = arith.constant 0 : index
    %c0_51 = arith.constant 0 : index
    %c0_52 = arith.constant 0 : index
    %65 = vector.load %arg27[%c0_50, %c0_51, %c0_52] : memref<4x8x8xf32, #tpu.memory_space<vmem>>, vector<4x8x8xf32>
    tpu.vector_store %arg27[%c0_50, %c0_51, %c0_52], %64 {strides = array<i32>} : memref<4x8x8xf32, #tpu.memory_space<vmem>>, vector<4x8x8xf32>,
    %66 = tpu.iota {dimensions = array<i32: 1>} : vector<1x8x8xi32>
    %67 = vector.broadcast %1 : i32 to vector<1x8x8xi32>
    %68 = arith.addi %67, %66 : vector<1x8x8xi32>
    %c0_i32 = arith.constant 0 : i32
    %69 = arith.cmpi sge, %arg1, %c0_i32 : i32
    %70 = arith.extui %69 : i1 to i32
    %c0_i32_53 = arith.constant 0 : i32
    %71 = arith.cmpi ne, %70, %c0_i32_53 : i32
    scf.if %71 {
      %c0_98 = arith.constant 0 : index
      %c0_99 = arith.constant 0 : index
      %c0_100 = arith.constant 0 : index
      %145 = vector.load %arg25[%c0_98, %c0_99, %c0_100] : memref<4x8x1xf32, #tpu.memory_space<vmem>>, vector<4x8x1xf32>
      %c0_101 = arith.constant 0 : index
      %c0_102 = arith.constant 0 : index
      %c0_103 = arith.constant 0 : index
      %c0_104 = arith.constant 0 : index
      %146 = vector.load %arg23[%c0_101, %c0_102, %c0_103, %c0_104] : memref<1x4x8x8xbf16, #tpu.memory_space<vmem>>, vector<1x4x8x8xbf16>
      %147 = vector.shape_cast %146 : vector<1x4x8x8xbf16> to vector<4x8x8xbf16>
      "tpu.trace_start"() <{level = 10 : i32, message = "hqd,hkd->hqk"}> : () -> ()
      %cst_105 = arith.constant dense<0.000000e+00> : vector<4x8x8xf32>
      %148 = tpu.matmul %37, %147, %cst_105 {dimension_numbers = #tpu.dot_dimension_numbers<[2], [2], [1], [1], [0, 0, 0, 1, 1, 1], [0], [0]>} : vector<4x8x8xbf16>, vector<4x8x8xbf16>, vector<4x8x8xf32> -> vector<4x8x8xf32>
      "tpu.trace_stop"() : () -> ()
      %cst_106 = arith.constant 0.353553385 : f32
      %149 = vector.broadcast %cst_106 : f32 to vector<4x8x8xf32>
      %150 = arith.mulf %148, %149 : vector<4x8x8xf32>
      %151 = tpu.iota {dimensions = array<i32: 2>} : vector<1x8x8xi32>
      %c0_i32_107 = arith.constant 0 : i32
      %152 = vector.broadcast %c0_i32_107 : i32 to vector<1x8x8xi32>
      %153 = arith.addi %152, %151 : vector<1x8x8xi32>
      %154 = arith.cmpi sge, %68, %153 : vector<1x8x8xi32>
      %cst_108 = arith.constant -1.000000e+30 : f32
      %155 = vector.shape_cast %154 : vector<1x8x8xi1> to vector<1x8x8xi1>
      %156 = vector.broadcast %155 : vector<1x8x8xi1> to vector<4x8x8xi1>
      %157 = vector.broadcast %cst_108 : f32 to vector<4x8x8xf32>
      %158 = arith.select %156, %150, %157 : vector<4x8x8xi1>, vector<4x8x8xf32>
      %cst_109 = arith.constant dense<0xFF800000> : vector<4x8xf32>
      %159 = vector.multi_reduction <maximumf>, %158, %cst_109 [2] : vector<4x8x8xf32> to vector<4x8xf32>
      %160 = vector.shape_cast %159 : vector<4x8xf32> to vector<4x8x1xf32>
      %161 = arith.maximumf %145, %160 : vector<4x8x1xf32>
      %c0_110 = arith.constant 0 : index
      %c0_111 = arith.constant 0 : index
      %c0_112 = arith.constant 0 : index
      %162 = vector.load %arg25[%c0_110, %c0_111, %c0_112] : memref<4x8x1xf32, #tpu.memory_space<vmem>>, vector<4x8x1xf32>
      tpu.vector_store %arg25[%c0_110, %c0_111, %c0_112], %161 {strides = array<i32>} : memref<4x8x1xf32, #tpu.memory_space<vmem>>, vector<4x8x1xf32>,
    } else {
    }
    %c0_i32_54 = arith.constant 0 : i32
    %72 = arith.cmpi sge, %arg1, %c0_i32_54 : i32
    %73 = arith.extui %72 : i1 to i32
    %c0_i32_55 = arith.constant 0 : i32
    %74 = arith.cmpi ne, %73, %c0_i32_55 : i32
    scf.if %74 {
      %c0_98 = arith.constant 0 : index
      %c0_99 = arith.constant 0 : index
      %c0_100 = arith.constant 0 : index
      %c0_101 = arith.constant 0 : index
      %145 = vector.load %arg23[%c0_98, %c0_99, %c0_100, %c0_101] : memref<1x4x8x8xbf16, #tpu.memory_space<vmem>>, vector<1x4x8x8xbf16>
      %146 = vector.shape_cast %145 : vector<1x4x8x8xbf16> to vector<4x8x8xbf16>
      "tpu.trace_start"() <{level = 10 : i32, message = "hqd,hkd->hqk"}> : () -> ()
      %cst_102 = arith.constant dense<0.000000e+00> : vector<4x8x8xf32>
      %147 = tpu.matmul %37, %146, %cst_102 {dimension_numbers = #tpu.dot_dimension_numbers<[2], [2], [1], [1], [0, 0, 0, 1, 1, 1], [0], [0]>} : vector<4x8x8xbf16>, vector<4x8x8xbf16>, vector<4x8x8xf32> -> vector<4x8x8xf32>
      "tpu.trace_stop"() : () -> ()
      %cst_103 = arith.constant 0.353553385 : f32
      %148 = vector.broadcast %cst_103 : f32 to vector<4x8x8xf32>
      %149 = arith.mulf %147, %148 : vector<4x8x8xf32>
      %150 = tpu.iota {dimensions = array<i32: 2>} : vector<1x8x8xi32>
      %c0_i32_104 = arith.constant 0 : i32
      %151 = vector.broadcast %c0_i32_104 : i32 to vector<1x8x8xi32>
      %152 = arith.addi %151, %150 : vector<1x8x8xi32>
      %153 = arith.cmpi sge, %68, %152 : vector<1x8x8xi32>
      %cst_105 = arith.constant -1.000000e+30 : f32
      %154 = vector.shape_cast %153 : vector<1x8x8xi1> to vector<1x8x8xi1>
      %155 = vector.broadcast %154 : vector<1x8x8xi1> to vector<4x8x8xi1>
      %156 = vector.broadcast %cst_105 : f32 to vector<4x8x8xf32>
      %157 = arith.select %155, %149, %156 : vector<4x8x8xi1>, vector<4x8x8xf32>
      %c0_106 = arith.constant 0 : index
      %c0_107 = arith.constant 0 : index
      %c0_108 = arith.constant 0 : index
      %158 = vector.load %arg25[%c0_106, %c0_107, %c0_108] : memref<4x8x1xf32, #tpu.memory_space<vmem>>, vector<4x8x1xf32>
      %159 = vector.broadcast %158 : vector<4x8x1xf32> to vector<4x8x8xf32>
      %160 = arith.subf %157, %159 : vector<4x8x8xf32>
      %161 = math.exp %160 : vector<4x8x8xf32>
      %c0_109 = arith.constant 0 : index
      %c0_110 = arith.constant 0 : index
      %c0_111 = arith.constant 0 : index
      %162 = vector.load %arg26[%c0_109, %c0_110, %c0_111] : memref<4x8x1xf32, #tpu.memory_space<vmem>>, vector<4x8x1xf32>
      %cst_112 = arith.constant dense<0.000000e+00> : vector<4x8xf32>
      %163 = vector.multi_reduction <add>, %161, %cst_112 [2] : vector<4x8x8xf32> to vector<4x8xf32>
      %164 = vector.shape_cast %163 : vector<4x8xf32> to vector<4x8x1xf32>
      %165 = arith.addf %162, %164 : vector<4x8x1xf32>
      %c0_113 = arith.constant 0 : index
      %c0_114 = arith.constant 0 : index
      %c0_115 = arith.constant 0 : index
      %166 = vector.load %arg26[%c0_113, %c0_114, %c0_115] : memref<4x8x1xf32, #tpu.memory_space<vmem>>, vector<4x8x1xf32>
      tpu.vector_store %arg26[%c0_113, %c0_114, %c0_115], %165 {strides = array<i32>} : memref<4x8x1xf32, #tpu.memory_space<vmem>>, vector<4x8x1xf32>,
      %c0_116 = arith.constant 0 : index
      %c0_117 = arith.constant 0 : index
      %c0_118 = arith.constant 0 : index
      %167 = vector.load %arg27[%c0_116, %c0_117, %c0_118] : memref<4x8x8xf32, #tpu.memory_space<vmem>>, vector<4x8x8xf32>
      %168 = arith.truncf %161 : vector<4x8x8xf32> to vector<4x8x8xbf16>
      %c0_119 = arith.constant 0 : index
      %c0_120 = arith.constant 0 : index
      %c0_121 = arith.constant 0 : index
      %c0_122 = arith.constant 0 : index
      %169 = vector.load %arg24[%c0_119, %c0_120, %c0_121, %c0_122] : memref<1x4x8x8xbf16, #tpu.memory_space<vmem>>, vector<1x4x8x8xbf16>
      %170 = vector.shape_cast %169 : vector<1x4x8x8xbf16> to vector<4x8x8xbf16>
      "tpu.trace_start"() <{level = 10 : i32, message = "hqk,hkd->hqd"}> : () -> ()
      %cst_123 = arith.constant dense<0.000000e+00> : vector<4x8x8xf32>
      %171 = tpu.matmul %168, %170, %cst_123 {dimension_numbers = #tpu.dot_dimension_numbers<[2], [1], [1], [2], [0, 0, 0, 1, 1, 2], [0], [0]>} : vector<4x8x8xbf16>, vector<4x8x8xbf16>, vector<4x8x8xf32> -> vector<4x8x8xf32>
      "tpu.trace_stop"() : () -> ()
      %172 = arith.addf %167, %171 : vector<4x8x8xf32>
      %c0_124 = arith.constant 0 : index
      %c0_125 = arith.constant 0 : index
      %c0_126 = arith.constant 0 : index
      %173 = vector.load %arg27[%c0_124, %c0_125, %c0_126] : memref<4x8x8xf32, #tpu.memory_space<vmem>>, vector<4x8x8xf32>
      tpu.vector_store %arg27[%c0_124, %c0_125, %c0_126], %172 {strides = array<i32>} : memref<4x8x8xf32, #tpu.memory_space<vmem>>, vector<4x8x8xf32>,
      %174 = arith.truncf %161 : vector<4x8x8xf32> to vector<4x8x8xbf16>
      %c0_127 = arith.constant 0 : index
      %c0_128 = arith.constant 0 : index
      %c0_129 = arith.constant 0 : index
      %c0_130 = arith.constant 0 : index
      %175 = vector.load %arg22[%c0_127, %c0_128, %c0_129, %c0_130] : memref<1x4x8x8xbf16, #tpu.memory_space<vmem>>, vector<1x4x8x8xbf16>
      %176 = vector.shape_cast %175 : vector<1x4x8x8xbf16> to vector<4x8x8xbf16>
      %177 = vector.shape_cast %174 : vector<4x8x8xbf16> to vector<1x4x8x8xbf16>
      tpu.vector_store %arg22[%c0_127, %c0_128, %c0_129, %c0_130], %177 {strides = array<i32>} : memref<1x4x8x8xbf16, #tpu.memory_space<vmem>>, vector<1x4x8x8xbf16>,
    } else {
    }
    %c0_56 = arith.constant 0 : index
    %c0_57 = arith.constant 0 : index
    %c0_58 = arith.constant 0 : index
    %75 = vector.load %arg26[%c0_56, %c0_57, %c0_58] : memref<4x8x1xf32, #tpu.memory_space<vmem>>, vector<4x8x1xf32>
    %cst_59 = arith.constant 1.000000e+00 : f32
    %76 = vector.broadcast %cst_59 : f32 to vector<4x8x1xf32>
    %77 = arith.divf %76, %75 : vector<4x8x1xf32>
    %c0_i32_60 = arith.constant 0 : i32
    %78 = arith.cmpi sge, %arg1, %c0_i32_60 : i32
    %79 = arith.extui %78 : i1 to i32
    %c0_i32_61 = arith.constant 0 : i32
    %80 = arith.cmpi ne, %79, %c0_i32_61 : i32
    scf.if %80 {
      %c0_98 = arith.constant 0 : index
      %c0_99 = arith.constant 0 : index
      %c0_100 = arith.constant 0 : index
      %c0_101 = arith.constant 0 : index
      %145 = vector.load %arg22[%c0_98, %c0_99, %c0_100, %c0_101] : memref<1x4x8x8xbf16, #tpu.memory_space<vmem>>, vector<1x4x8x8xbf16>
      %146 = vector.shape_cast %145 : vector<1x4x8x8xbf16> to vector<4x8x8xbf16>
      %147 = arith.extf %146 : vector<4x8x8xbf16> to vector<4x8x8xf32>
      %148 = vector.broadcast %77 : vector<4x8x1xf32> to vector<4x8x8xf32>
      %149 = arith.mulf %147, %148 : vector<4x8x8xf32>
      %150 = arith.truncf %149 : vector<4x8x8xf32> to vector<4x8x8xbf16>
      %c0_102 = arith.constant 0 : index
      %c0_103 = arith.constant 0 : index
      %c0_104 = arith.constant 0 : index
      %c0_105 = arith.constant 0 : index
      %151 = vector.load %arg22[%c0_102, %c0_103, %c0_104, %c0_105] : memref<1x4x8x8xbf16, #tpu.memory_space<vmem>>, vector<1x4x8x8xbf16>
      %152 = vector.shape_cast %151 : vector<1x4x8x8xbf16> to vector<4x8x8xbf16>
      %153 = vector.shape_cast %150 : vector<4x8x8xbf16> to vector<1x4x8x8xbf16>
      tpu.vector_store %arg22[%c0_102, %c0_103, %c0_104, %c0_105], %153 {strides = array<i32>} : memref<1x4x8x8xbf16, #tpu.memory_space<vmem>>, vector<1x4x8x8xbf16>,
    } else {
    }
    %c0_62 = arith.constant 0 : index
    %c0_63 = arith.constant 0 : index
    %c0_64 = arith.constant 0 : index
    %81 = vector.load %arg27[%c0_62, %c0_63, %c0_64] : memref<4x8x8xf32, #tpu.memory_space<vmem>>, vector<4x8x8xf32>
    %82 = vector.broadcast %77 : vector<4x8x1xf32> to vector<4x8x8xf32>
    %83 = arith.mulf %81, %82 : vector<4x8x8xf32>
    %84 = arith.truncf %83 : vector<4x8x8xf32> to vector<4x8x8xbf16>
    %c0_65 = arith.constant 0 : index
    %c0_66 = arith.constant 0 : index
    %c0_67 = arith.constant 0 : index
    %85 = vector.load %arg11[%c0_65, %c0_66, %c0_67] : memref<4x8x32xbf16, #tpu.memory_space<vmem>>, vector<4x8x32xbf16>
    "tpu.trace_start"() <{level = 10 : i32, message = "hqd,hde->hqe"}> : () -> ()
    %cst_68 = arith.constant dense<0.000000e+00> : vector<4x8x32xf32>
    %86 = tpu.matmul %84, %85, %cst_68 {dimension_numbers = #tpu.dot_dimension_numbers<[2], [1], [1], [2], [0, 0, 0, 1, 1, 2], [0], [0]>} : vector<4x8x8xbf16>, vector<4x8x32xbf16>, vector<4x8x32xf32> -> vector<4x8x32xf32>
    "tpu.trace_stop"() : () -> ()
    %cst_69 = arith.constant dense<0.000000e+00> : vector<8x32xf32>
    %87 = vector.multi_reduction <add>, %86, %cst_69 [0] : vector<4x8x32xf32> to vector<8x32xf32>
    %c0_70 = arith.constant 0 : index
    %c0_71 = arith.constant 0 : index
    %88 = vector.load %arg12[%c0_70, %c0_71] : memref<1x32xf32, #tpu.memory_space<vmem>>, vector<1x32xf32>
    %89 = vector.broadcast %88 : vector<1x32xf32> to vector<8x32xf32>
    %90 = arith.addf %87, %89 : vector<8x32xf32>
    %91 = arith.addf %4, %90 : vector<8x32xf32>
    %c0_72 = arith.constant 0 : index
    %c0_73 = arith.constant 0 : index
    %92 = vector.load %arg13[%c0_72, %c0_73] : memref<1x32xf32, #tpu.memory_space<vmem>>, vector<1x32xf32>
    %c0_74 = arith.constant 0 : index
    %c0_75 = arith.constant 0 : index
    %93 = vector.load %arg14[%c0_74, %c0_75] : memref<1x32xf32, #tpu.memory_space<vmem>>, vector<1x32xf32>
    %cst_76 = arith.constant dense<0.000000e+00> : vector<8xf32>
    %94 = vector.multi_reduction <add>, %91, %cst_76 [1] : vector<8x32xf32> to vector<8xf32>
    %95 = vector.shape_cast %94 : vector<8xf32> to vector<8x1xf32>
    %cst_77 = arith.constant 3.200000e+01 : f32
    %96 = vector.broadcast %cst_77 : f32 to vector<8x1xf32>
    %97 = arith.divf %95, %96 : vector<8x1xf32>
    %98 = vector.broadcast %97 : vector<8x1xf32> to vector<8x32xf32>
    %99 = arith.subf %91, %98 : vector<8x32xf32>
    %100 = arith.mulf %99, %99 : vector<8x32xf32>
    %cst_78 = arith.constant dense<0.000000e+00> : vector<8xf32>
    %101 = vector.multi_reduction <add>, %100, %cst_78 [1] : vector<8x32xf32> to vector<8xf32>
    %102 = vector.shape_cast %101 : vector<8xf32> to vector<8x1xf32>
    %cst_79 = arith.constant 3.200000e+01 : f32
    %103 = vector.broadcast %cst_79 : f32 to vector<8x1xf32>
    %104 = arith.divf %102, %103 : vector<8x1xf32>
    %105 = vector.broadcast %97 : vector<8x1xf32> to vector<8x32xf32>
    %106 = arith.subf %91, %105 : vector<8x32xf32>
    %cst_80 = arith.constant 9.99999974E-6 : f32
    %107 = vector.broadcast %cst_80 : f32 to vector<8x1xf32>
    %108 = arith.addf %104, %107 : vector<8x1xf32>
    %109 = math.rsqrt %108 : vector<8x1xf32>
    %110 = vector.broadcast %109 : vector<8x1xf32> to vector<8x32xf32>
    %111 = arith.mulf %106, %110 : vector<8x32xf32>
    %112 = vector.broadcast %92 : vector<1x32xf32> to vector<8x32xf32>
    %113 = arith.mulf %111, %112 : vector<8x32xf32>
    %114 = vector.broadcast %93 : vector<1x32xf32> to vector<8x32xf32>
    %115 = arith.addf %113, %114 : vector<8x32xf32>
    %116 = arith.truncf %115 : vector<8x32xf32> to vector<8x32xbf16>
    %c0_81 = arith.constant 0 : index
    %c0_82 = arith.constant 0 : index
    %117 = vector.load %arg15[%c0_81, %c0_82] : memref<32x128xbf16, #tpu.memory_space<vmem>>, vector<32x128xbf16>
    %cst_83 = arith.constant dense<0.000000e+00> : vector<8x128xf32>
    %118 = tpu.matmul %116, %117, %cst_83 {dimension_numbers = #tpu.dot_dimension_numbers<[1], [0], [0], [1], [0, 0, 1, 1], [], []>} : vector<8x32xbf16>, vector<32x128xbf16>, vector<8x128xf32> -> vector<8x128xf32>
    %c0_84 = arith.constant 0 : index
    %c0_85 = arith.constant 0 : index
    %119 = vector.load %arg16[%c0_84, %c0_85] : memref<1x128xf32, #tpu.memory_space<vmem>>, vector<1x128xf32>
    %120 = vector.broadcast %119 : vector<1x128xf32> to vector<8x128xf32>
    %121 = arith.addf %118, %120 : vector<8x128xf32>
    %cst_86 = arith.constant 5.000000e-01 : f32
    %122 = vector.broadcast %cst_86 : f32 to vector<8x128xf32>
    %123 = arith.mulf %122, %121 : vector<8x128xf32>
    %cst_87 = arith.constant 4.471500e-02 : f32
    %124 = vector.broadcast %cst_87 : f32 to vector<8x128xf32>
    %125 = arith.mulf %124, %121 : vector<8x128xf32>
    %126 = arith.mulf %125, %121 : vector<8x128xf32>
    %127 = arith.mulf %126, %121 : vector<8x128xf32>
    %128 = arith.addf %121, %127 : vector<8x128xf32>
    %cst_88 = arith.constant 0.797884583 : f32
    %129 = vector.broadcast %cst_88 : f32 to vector<8x128xf32>
    %130 = arith.mulf %129, %128 : vector<8x128xf32>
    %131 = math.tanh %130 : vector<8x128xf32>
    %cst_89 = arith.constant 1.000000e+00 : f32
    %132 = vector.broadcast %cst_89 : f32 to vector<8x128xf32>
    %133 = arith.addf %132, %131 : vector<8x128xf32>
    %134 = arith.mulf %123, %133 : vector<8x128xf32>
    %135 = arith.truncf %134 : vector<8x128xf32> to vector<8x128xbf16>
    %c0_90 = arith.constant 0 : index
    %c0_91 = arith.constant 0 : index
    %136 = vector.load %arg17[%c0_90, %c0_91] : memref<128x32xbf16, #tpu.memory_space<vmem>>, vector<128x32xbf16>
    %cst_92 = arith.constant dense<0.000000e+00> : vector<8x32xf32>
    %137 = tpu.matmul %135, %136, %cst_92 {dimension_numbers = #tpu.dot_dimension_numbers<[1], [0], [0], [1], [0, 0, 1, 1], [], []>} : vector<8x128xbf16>, vector<128x32xbf16>, vector<8x32xf32> -> vector<8x32xf32>
    %c0_93 = arith.constant 0 : index
    %c0_94 = arith.constant 0 : index
    %138 = vector.load %arg18[%c0_93, %c0_94] : memref<1x32xf32, #tpu.memory_space<vmem>>, vector<1x32xf32>
    %139 = vector.broadcast %138 : vector<1x32xf32> to vector<8x32xf32>
    %140 = arith.addf %137, %139 : vector<8x32xf32>
    %141 = arith.addf %91, %140 : vector<8x32xf32>
    %c0_95 = arith.constant 0 : index
    %c0_96 = arith.constant 0 : index
    %c0_97 = arith.constant 0 : index
    %142 = vector.load %arg21[%c0_95, %c0_96, %c0_97] : memref<1x8x32xf32, #tpu.memory_space<vmem>>, vector<1x8x32xf32>
    %143 = vector.shape_cast %142 : vector<1x8x32xf32> to vector<8x32xf32>
    %144 = vector.shape_cast %141 : vector<8x32xf32> to vector<1x8x32xf32>
    tpu.vector_store %arg21[%c0_95, %c0_96, %c0_97], %144 {strides = array<i32>} : memref<1x8x32xf32, #tpu.memory_space<vmem>>, vector<1x8x32xf32>,
    return
  }
  func.func @transform_0(%arg0: i32, %arg1: i32) -> (i32, i32, i32) {
    %c0_i32 = arith.constant 0 : i32
    %c0_i32_0 = arith.constant 0 : i32
    %c0_i32_1 = arith.constant 0 : i32
    return %arg0, %c0_i32, %c0_i32_0 : i32, i32, i32
  }
  func.func @transform_1(%arg0: i32, %arg1: i32) -> (i32, i32) {
    %c0_i32 = arith.constant 0 : i32
    %c0_i32_0 = arith.constant 0 : i32
    %c0_i32_1 = arith.constant 0 : i32
    return %c0_i32, %c0_i32_0 : i32, i32
  }
  func.func @transform_2(%arg0: i32, %arg1: i32) -> (i32, i32) {
    %c0_i32 = arith.constant 0 : i32
    %c0_i32_0 = arith.constant 0 : i32
    %c0_i32_1 = arith.constant 0 : i32
    return %c0_i32, %c0_i32_0 : i32, i32
  }
  func.func @transform_3(%arg0: i32, %arg1: i32) -> (i32, i32, i32) {
    %c0_i32 = arith.constant 0 : i32
    %c0_i32_0 = arith.constant 0 : i32
    %c0_i32_1 = arith.constant 0 : i32
    %c0_i32_2 = arith.constant 0 : i32
    return %c0_i32, %c0_i32_0, %c0_i32_1 : i32, i32, i32
  }
  func.func @transform_4(%arg0: i32, %arg1: i32) -> (i32, i32, i32) {
    %c0_i32 = arith.constant 0 : i32
    %c0_i32_0 = arith.constant 0 : i32
    %c0_i32_1 = arith.constant 0 : i32
    %c0_i32_2 = arith.constant 0 : i32
    return %c0_i32, %c0_i32_0, %c0_i32_1 : i32, i32, i32
  }
  func.func @transform_5(%arg0: i32, %arg1: i32) -> (i32, i32, i32) {
    %c0_i32 = arith.constant 0 : i32
    %c0_i32_0 = arith.constant 0 : i32
    %c0_i32_1 = arith.constant 0 : i32
    %c0_i32_2 = arith.constant 0 : i32
    return %c0_i32, %c0_i32_0, %c0_i32_1 : i32, i32, i32
  }
  func.func @transform_6(%arg0: i32, %arg1: i32) -> (i32, i32, i32) {
    %c0_i32 = arith.constant 0 : i32
    %c0_i32_0 = arith.constant 0 : i32
    %c0_i32_1 = arith.constant 0 : i32
    %c0_i32_2 = arith.constant 0 : i32
    return %c0_i32, %c0_i32_0, %c0_i32_1 : i32, i32, i32
  }
  func.func @transform_7(%arg0: i32, %arg1: i32) -> (i32, i32, i32) {
    %c0_i32 = arith.constant 0 : i32
    %c0_i32_0 = arith.constant 0 : i32
    %c0_i32_1 = arith.constant 0 : i32
    %c0_i32_2 = arith.constant 0 : i32
    return %c0_i32, %c0_i32_0, %c0_i32_1 : i32, i32, i32
  }
  func.func @transform_8(%arg0: i32, %arg1: i32) -> (i32, i32, i32) {
    %c0_i32 = arith.constant 0 : i32
    %c0_i32_0 = arith.constant 0 : i32
    %c0_i32_1 = arith.constant 0 : i32
    %c0_i32_2 = arith.constant 0 : i32
    return %c0_i32, %c0_i32_0, %c0_i32_1 : i32, i32, i32
  }
  func.func @transform_9(%arg0: i32, %arg1: i32) -> (i32, i32, i32) {
    %c0_i32 = arith.constant 0 : i32
    %c0_i32_0 = arith.constant 0 : i32
    %c0_i32_1 = arith.constant 0 : i32
    %c0_i32_2 = arith.constant 0 : i32
    return %c0_i32, %c0_i32_0, %c0_i32_1 : i32, i32, i32
  }
  func.func @transform_10(%arg0: i32, %arg1: i32) -> (i32, i32) {
    %c0_i32 = arith.constant 0 : i32
    %c0_i32_0 = arith.constant 0 : i32
    %c0_i32_1 = arith.constant 0 : i32
    return %c0_i32, %c0_i32_0 : i32, i32
  }
  func.func @transform_11(%arg0: i32, %arg1: i32) -> (i32, i32) {
    %c0_i32 = arith.constant 0 : i32
    %c0_i32_0 = arith.constant 0 : i32
    %c0_i32_1 = arith.constant 0 : i32
    return %c0_i32, %c0_i32_0 : i32, i32
  }
  func.func @transform_12(%arg0: i32, %arg1: i32) -> (i32, i32) {
    %c0_i32 = arith.constant 0 : i32
    %c0_i32_0 = arith.constant 0 : i32
    %c0_i32_1 = arith.constant 0 : i32
    return %c0_i32, %c0_i32_0 : i32, i32
  }
  func.func @transform_13(%arg0: i32, %arg1: i32) -> (i32, i32) {
    %c0_i32 = arith.constant 0 : i32
    %c0_i32_0 = arith.constant 0 : i32
    %c0_i32_1 = arith.constant 0 : i32
    return %c0_i32, %c0_i32_0 : i32, i32
  }
  func.func @transform_14(%arg0: i32, %arg1: i32) -> (i32, i32) {
    %c0_i32 = arith.constant 0 : i32
    %c0_i32_0 = arith.constant 0 : i32
    %c0_i32_1 = arith.constant 0 : i32
    return %c0_i32, %c0_i32_0 : i32, i32
  }
  func.func @transform_15(%arg0: i32, %arg1: i32) -> (i32, i32) {
    %c0_i32 = arith.constant 0 : i32
    %c0_i32_0 = arith.constant 0 : i32
    %c0_i32_1 = arith.constant 0 : i32
    return %c0_i32, %c0_i32_0 : i32, i32
  }
  func.func @transform_16(%arg0: i32, %arg1: i32) -> (i32, i32) {
    %c0_i32 = arith.constant 0 : i32
    %c0_i32_0 = arith.constant 0 : i32
    %c0_i32_1 = arith.constant 0 : i32
    return %c0_i32, %c0_i32_0 : i32, i32
  }
  func.func @transform_17(%arg0: i32, %arg1: i32) -> (i32, i32) {
    %c0_i32 = arith.constant 0 : i32
    %c0_i32_0 = arith.constant 0 : i32
    %c0_i32_1 = arith.constant 0 : i32
    return %c0_i32, %c0_i32_0 : i32, i32
  }
  func.func @transform_18(%arg0: i32, %arg1: i32) -> (i32, i32) {
    %c0_i32 = arith.constant 0 : i32
    %c0_i32_0 = arith.constant 0 : i32
    %c0_i32_1 = arith.constant 0 : i32
    return %c0_i32, %c0_i32_0 : i32, i32
  }
  func.func @transform_19(%arg0: i32, %arg1: i32) -> (i32, i32, i32) {
    %c0_i32 = arith.constant 0 : i32
    %c0_i32_0 = arith.constant 0 : i32
    return %arg0, %arg1, %c0_i32 : i32, i32, i32
  }
  func.func @transform_20(%arg0: i32, %arg1: i32) -> (i32, i32, i32, i32) {
    %c0_i32 = arith.constant 0 : i32
    %c0_i32_0 = arith.constant 0 : i32
    %c0_i32_1 = arith.constant 0 : i32
    return %arg0, %c0_i32, %arg1, %c0_i32_0 : i32, i32, i32, i32
  }
}

module attributes {stable_mosaic.version = 11 : i64} {
  func.func @transformer_block_kernel(%arg0: i32, %arg1: i32, %arg2: memref<1x8x32xf32, #tpu.memory_space<vmem>>, %arg3: memref<1x32xf32, #tpu.memory_space<vmem>>, %arg4: memref<1x32xf32, #tpu.memory_space<vmem>>, %arg5: memref<4x32x8xbf16, #tpu.memory_space<vmem>>, %arg6: memref<4x32x8xbf16, #tpu.memory_space<vmem>>, %arg7: memref<4x32x8xbf16, #tpu.memory_space<vmem>>, %arg8: memref<4x1x8xf32, #tpu.memory_space<vmem>>, %arg9: memref<4x1x8xf32, #tpu.memory_space<vmem>>, %arg10: memref<4x1x8xf32, #tpu.memory_space<vmem>>, %arg11: memref<4x8x32xbf16, #tpu.memory_space<vmem>>, %arg12: memref<1x32xf32, #tpu.memory_space<vmem>>, %arg13: memref<1x32xf32, #tpu.memory_space<vmem>>, %arg14: memref<1x32xf32, #tpu.memory_space<vmem>>, %arg15: memref<32x128xbf16, #tpu.memory_space<vmem>>, %arg16: memref<1x128xf32, #tpu.memory_space<vmem>>, %arg17: memref<128x32xbf16, #tpu.memory_space<vmem>>, %arg18: memref<1x32xf32, #tpu.memory_space<vmem>>, %arg19: memref<1x32xf32, #tpu.memory_space<vmem>>, %arg20: memref<1x32xf32, #tpu.memory_space<vmem>>, %arg21: memref<1x8x32xf32, #tpu.memory_space<vmem>>, %arg22: memref<1x4x8x8xbf16, #tpu.memory_space<vmem>>, %arg23: memref<1x4x8x8xbf16, #tpu.memory_space<vmem>>, %arg24: memref<1x4x8x8xbf16, #tpu.memory_space<vmem>>, %arg25: memref<4x8x1xf32, #tpu.memory_space<vmem>>, %arg26: memref<4x8x1xf32, #tpu.memory_space<vmem>>, %arg27: memref<4x8x8xf32, #tpu.memory_space<vmem>>) attributes {dimension_semantics = [#tpu.dimension_semantics<parallel>, #tpu.dimension_semantics<arbitrary>], iteration_bounds = array<i64: 2, 1>, scalar_prefetch = 0 : i64, scratch_operands = 5 : i64, tpu.core_type = #tpu.core_type<tc>, window_params = [{transform_indices = @transform_0, window_bounds = array<i64: 1, 8, 32>}, {pipeline_mode = #tpu.pipeline_mode<synchronous>, transform_indices = @transform_1, window_bounds = array<i64: 1, 32>}, {pipeline_mode = #tpu.pipeline_mode<synchronous>, transform_indices = @transform_2, window_bounds = array<i64: 1, 32>}, {pipeline_mode = #tpu.pipeline_mode<synchronous>, transform_indices = @transform_3, window_bounds = array<i64: 4, 32, 8>}, {pipeline_mode = #tpu.pipeline_mode<synchronous>, transform_indices = @transform_4, window_bounds = array<i64: 4, 32, 8>}, {pipeline_mode = #tpu.pipeline_mode<synchronous>, transform_indices = @transform_5, window_bounds = array<i64: 4, 32, 8>}, {pipeline_mode = #tpu.pipeline_mode<synchronous>, transform_indices = @transform_6, window_bounds = array<i64: 4, 1, 8>}, {pipeline_mode = #tpu.pipeline_mode<synchronous>, transform_indices = @transform_7, window_bounds = array<i64: 4, 1, 8>}, {pipeline_mode = #tpu.pipeline_mode<synchronous>, transform_indices = @transform_8, window_bounds = array<i64: 4, 1, 8>}, {pipeline_mode = #tpu.pipeline_mode<synchronous>, transform_indices = @transform_9, window_bounds = array<i64: 4, 8, 32>}, {pipeline_mode = #tpu.pipeline_mode<synchronous>, transform_indices = @transform_10, window_bounds = array<i64: 1, 32>}, {pipeline_mode = #tpu.pipeline_mode<synchronous>, transform_indices = @transform_11, window_bounds = array<i64: 1, 32>}, {pipeline_mode = #tpu.pipeline_mode<synchronous>, transform_indices = @transform_12, window_bounds = array<i64: 1, 32>}, {pipeline_mode = #tpu.pipeline_mode<synchronous>, transform_indices = @transform_13, window_bounds = array<i64: 32, 128>}, {pipeline_mode = #tpu.pipeline_mode<synchronous>, transform_indices = @transform_14, window_bounds = array<i64: 1, 128>}, {pipeline_mode = #tpu.pipeline_mode<synchronous>, transform_indices = @transform_15, window_bounds = array<i64: 128, 32>}, {pipeline_mode = #tpu.pipeline_mode<synchronous>, transform_indices = @transform_16, window_bounds = array<i64: 1, 32>}, {pipeline_mode = #tpu.pipeline_mode<synchronous>, transform_indices = @transform_17, window_bounds = array<i64: 1, 32>}, {pipeline_mode = #tpu.pipeline_mode<synchronous>, transform_indices = @transform_18, window_bounds = array<i64: 1, 32>}, {transform_indices = @transform_19, window_bounds = array<i64: 1, 8, 32>}, {transform_indices = @transform_20, window_bounds = array<i64: 1, 4, 8, 8>}]} {
    %c8_i32 = arith.constant 8 : i32
    %0 = arith.muli %arg1, %c8_i32 : i32
    %1 = tpu.assume_multiple %0, 8 : i32
    %c0 = arith.constant 0 : index
    %2 = arith.index_cast %1 : i32 to index
    %c0_0 = arith.constant 0 : index
    %3 = vector.load %arg2[%c0, %2, %c0_0] : memref<1x8x32xf32, #tpu.memory_space<vmem>>, vector<1x8x32xf32>
    %4 = vector.shape_cast %3 : vector<1x8x32xf32> to vector<8x32xf32>
    %c0_1 = arith.constant 0 : index
    %c0_2 = arith.constant 0 : index
    %5 = vector.load %arg3[%c0_1, %c0_2] : memref<1x32xf32, #tpu.memory_space<vmem>>, vector<1x32xf32>
    %c0_3 = arith.constant 0 : index
    %c0_4 = arith.constant 0 : index
    %6 = vector.load %arg4[%c0_3, %c0_4] : memref<1x32xf32, #tpu.memory_space<vmem>>, vector<1x32xf32>
    %cst = arith.constant dense<0.000000e+00> : vector<8xf32>
    %7 = vector.multi_reduction <add>, %4, %cst [1] : vector<8x32xf32> to vector<8xf32>
    %8 = vector.shape_cast %7 : vector<8xf32> to vector<8x1xf32>
    %cst_5 = arith.constant 3.200000e+01 : f32
    %9 = vector.broadcast %cst_5 : f32 to vector<8x1xf32>
    %10 = arith.divf %8, %9 : vector<8x1xf32>
    %11 = vector.broadcast %10 : vector<8x1xf32> to vector<8x32xf32>
    %12 = arith.subf %4, %11 : vector<8x32xf32>
    %13 = arith.mulf %12, %12 : vector<8x32xf32>
    %cst_6 = arith.constant dense<0.000000e+00> : vector<8xf32>
    %14 = vector.multi_reduction <add>, %13, %cst_6 [1] : vector<8x32xf32> to vector<8xf32>
    %15 = vector.shape_cast %14 : vector<8xf32> to vector<8x1xf32>
    %cst_7 = arith.constant 3.200000e+01 : f32
    %16 = vector.broadcast %cst_7 : f32 to vector<8x1xf32>
    %17 = arith.divf %15, %16 : vector<8x1xf32>
    %18 = vector.broadcast %10 : vector<8x1xf32> to vector<8x32xf32>
    %19 = arith.subf %4, %18 : vector<8x32xf32>
    %cst_8 = arith.constant 9.99999974E-6 : f32
    %20 = vector.broadcast %cst_8 : f32 to vector<8x1xf32>
    %21 = arith.addf %17, %20 : vector<8x1xf32>
    %22 = math.rsqrt %21 : vector<8x1xf32>
    %23 = vector.broadcast %22 : vector<8x1xf32> to vector<8x32xf32>
    %24 = arith.mulf %19, %23 : vector<8x32xf32>
    %25 = vector.broadcast %5 : vector<1x32xf32> to vector<8x32xf32>
    %26 = arith.mulf %24, %25 : vector<8x32xf32>
    %27 = vector.broadcast %6 : vector<1x32xf32> to vector<8x32xf32>
    %28 = arith.addf %26, %27 : vector<8x32xf32>
    %29 = arith.truncf %28 : vector<8x32xf32> to vector<8x32xbf16>
    %30 = vector.shape_cast %29 : vector<8x32xbf16> to vector<1x8x32xbf16>
    %31 = vector.broadcast %30 : vector<1x8x32xbf16> to vector<4x8x32xbf16>
    %c0_9 = arith.constant 0 : index
    %c0_10 = arith.constant 0 : index
    %c0_11 = arith.constant 0 : index
    %32 = vector.load %arg5[%c0_9, %c0_10, %c0_11] : memref<4x32x8xbf16, #tpu.memory_space<vmem>>, vector<4x32x8xbf16>
    "tpu.trace_start"() <{level = 10 : i32, message = "htd,hde->hte"}> : () -> ()
    %cst_12 = arith.constant dense<0.000000e+00> : vector<4x8x8xf32>
    %33 = tpu.matmul %31, %32, %cst_12 {dimension_numbers = #tpu.dot_dimension_numbers<[2], [1], [1], [2], [0, 0, 0, 1, 1, 2], [0], [0]>} : vector<4x8x32xbf16>, vector<4x32x8xbf16>, vector<4x8x8xf32> -> vector<4x8x8xf32>
    "tpu.trace_stop"() : () -> ()
    %c0_13 = arith.constant 0 : index
    %c0_14 = arith.constant 0 : index
    %c0_15 = arith.constant 0 : index
    %34 = vector.load %arg8[%c0_13, %c0_14, %c0_15] : memref<4x1x8xf32, #tpu.memory_space<vmem>>, vector<4x1x8xf32>
    %35 = vector.broadcast %34 : vector<4x1x8xf32> to vector<4x8x8xf32>
    %36 = arith.addf %33, %35 : vector<4x8x8xf32>
    %37 = arith.truncf %36 : vector<4x8x8xf32> to vector<4x8x8xbf16>
    %c0_16 = arith.constant 0 : index
    %c0_17 = arith.constant 0 : index
    %c0_18 = arith.constant 0 : index
    %38 = vector.load %arg6[%c0_16, %c0_17, %c0_18] : memref<4x32x8xbf16, #tpu.memory_space<vmem>>, vector<4x32x8xbf16>
    "tpu.trace_start"() <{level = 10 : i32, message = "htd,hde->hte"}> : () -> ()
    %cst_19 = arith.constant dense<0.000000e+00> : vector<4x8x8xf32>
    %39 = tpu.matmul %31, %38, %cst_19 {dimension_numbers = #tpu.dot_dimension_numbers<[2], [1], [1], [2], [0, 0, 0, 1, 1, 2], [0], [0]>} : vector<4x8x32xbf16>, vector<4x32x8xbf16>, vector<4x8x8xf32> -> vector<4x8x8xf32>
    "tpu.trace_stop"() : () -> ()
    %c0_20 = arith.constant 0 : index
    %c0_21 = arith.constant 0 : index
    %c0_22 = arith.constant 0 : index
    %40 = vector.load %arg9[%c0_20, %c0_21, %c0_22] : memref<4x1x8xf32, #tpu.memory_space<vmem>>, vector<4x1x8xf32>
    %41 = vector.broadcast %40 : vector<4x1x8xf32> to vector<4x8x8xf32>
    %42 = arith.addf %39, %41 : vector<4x8x8xf32>
    %43 = arith.truncf %42 : vector<4x8x8xf32> to vector<4x8x8xbf16>
    %44 = arith.index_cast %arg1 : i32 to index
    %c0_23 = arith.constant 0 : index
    %c0_24 = arith.constant 0 : index
    %c0_25 = arith.constant 0 : index
    %45 = vector.load %arg23[%44, %c0_23, %c0_24, %c0_25] : memref<1x4x8x8xbf16, #tpu.memory_space<vmem>>, vector<1x4x8x8xbf16>
    %46 = vector.shape_cast %45 : vector<1x4x8x8xbf16> to vector<4x8x8xbf16>
    %47 = vector.shape_cast %43 : vector<4x8x8xbf16> to vector<1x4x8x8xbf16>
    tpu.vector_store %arg23[%44, %c0_23, %c0_24, %c0_25], %47 {strides = array<i32>} : memref<1x4x8x8xbf16, #tpu.memory_space<vmem>>, vector<1x4x8x8xbf16>,
    %c0_26 = arith.constant 0 : index
    %c0_27 = arith.constant 0 : index
    %c0_28 = arith.constant 0 : index
    %48 = vector.load %arg7[%c0_26, %c0_27, %c0_28] : memref<4x32x8xbf16, #tpu.memory_space<vmem>>, vector<4x32x8xbf16>
    "tpu.trace_start"() <{level = 10 : i32, message = "htd,hde->hte"}> : () -> ()
    %cst_29 = arith.constant dense<0.000000e+00> : vector<4x8x8xf32>
    %49 = tpu.matmul %31, %48, %cst_29 {dimension_numbers = #tpu.dot_dimension_numbers<[2], [1], [1], [2], [0, 0, 0, 1, 1, 2], [0], [0]>} : vector<4x8x32xbf16>, vector<4x32x8xbf16>, vector<4x8x8xf32> -> vector<4x8x8xf32>
    "tpu.trace_stop"() : () -> ()
    %c0_30 = arith.constant 0 : index
    %c0_31 = arith.constant 0 : index
    %c0_32 = arith.constant 0 : index
    %50 = vector.load %arg10[%c0_30, %c0_31, %c0_32] : memref<4x1x8xf32, #tpu.memory_space<vmem>>, vector<4x1x8xf32>
    %51 = vector.broadcast %50 : vector<4x1x8xf32> to vector<4x8x8xf32>
    %52 = arith.addf %49, %51 : vector<4x8x8xf32>
    %53 = arith.truncf %52 : vector<4x8x8xf32> to vector<4x8x8xbf16>
    %54 = arith.index_cast %arg1 : i32 to index
    %c0_33 = arith.constant 0 : index
    %c0_34 = arith.constant 0 : index
    %c0_35 = arith.constant 0 : index
    %55 = vector.load %arg24[%54, %c0_33, %c0_34, %c0_35] : memref<1x4x8x8xbf16, #tpu.memory_space<vmem>>, vector<1x4x8x8xbf16>
    %56 = vector.shape_cast %55 : vector<1x4x8x8xbf16> to vector<4x8x8xbf16>
    %57 = vector.shape_cast %53 : vector<4x8x8xbf16> to vector<1x4x8x8xbf16>
    tpu.vector_store %arg24[%54, %c0_33, %c0_34, %c0_35], %57 {strides = array<i32>} : memref<1x4x8x8xbf16, #tpu.memory_space<vmem>>, vector<1x4x8x8xbf16>,
    %cst_36 = arith.constant 0.000000e+00 : bf16
    %58 = vector.broadcast %cst_36 : bf16 to vector<1x4x8x8xbf16>
    %c0_37 = arith.constant 0 : index
    %c0_38 = arith.constant 0 : index
    %c0_39 = arith.constant 0 : index
    %c0_40 = arith.constant 0 : index
    %59 = vector.load %arg22[%c0_37, %c0_38, %c0_39, %c0_40] : memref<1x4x8x8xbf16, #tpu.memory_space<vmem>>, vector<1x4x8x8xbf16>
    tpu.vector_store %arg22[%c0_37, %c0_38, %c0_39, %c0_40], %58 {strides = array<i32>} : memref<1x4x8x8xbf16, #tpu.memory_space<vmem>>, vector<1x4x8x8xbf16>,
    %cst_41 = arith.constant 0xFF800000 : f32
    %60 = vector.broadcast %cst_41 : f32 to vector<4x8x1xf32>
    %c0_42 = arith.constant 0 : index
    %c0_43 = arith.constant 0 : index
    %c0_44 = arith.constant 0 : index
    %61 = vector.load %arg25[%c0_42, %c0_43, %c0_44] : memref<4x8x1xf32, #tpu.memory_space<vmem>>, vector<4x8x1xf32>
    tpu.vector_store %arg25[%c0_42, %c0_43, %c0_44], %60 {strides = array<i32>} : memref<4x8x1xf32, #tpu.memory_space<vmem>>, vector<4x8x1xf32>,
    %cst_45 = arith.constant 0.000000e+00 : f32
    %62 = vector.broadcast %cst_45 : f32 to vector<4x8x1xf32>
    %c0_46 = arith.constant 0 : index
    %c0_47 = arith.constant 0 : index
    %c0_48 = arith.constant 0 : index
    %63 = vector.load %arg26[%c0_46, %c0_47, %c0_48] : memref<4x8x1xf32, #tpu.memory_space<vmem>>, vector<4x8x1xf32>
    tpu.vector_store %arg26[%c0_46, %c0_47, %c0_48], %62 {strides = array<i32>} : memref<4x8x1xf32, #tpu.memory_space<vmem>>, vector<4x8x1xf32>,
    %cst_49 = arith.constant 0.000000e+00 : f32
    %64 = vector.broadcast %cst_49 : f32 to vector<4x8x8xf32>
    %c0_50 = arith.constant 0 : index
    %c0_51 = arith.constant 0 : index
    %c0_52 = arith.constant 0 : index
    %65 = vector.load %arg27[%c0_50, %c0_51, %c0_52] : memref<4x8x8xf32, #tpu.memory_space<vmem>>, vector<4x8x8xf32>
    tpu.vector_store %arg27[%c0_50, %c0_51, %c0_52], %64 {strides = array<i32>} : memref<4x8x8xf32, #tpu.memory_space<vmem>>, vector<4x8x8xf32>,
    %66 = tpu.iota {dimensions = array<i32: 1>} : vector<1x8x8xi32>
    %67 = vector.broadcast %1 : i32 to vector<1x8x8xi32>
    %68 = arith.addi %67, %66 : vector<1x8x8xi32>
    %c0_i32 = arith.constant 0 : i32
    %69 = arith.cmpi sge, %arg1, %c0_i32 : i32
    %70 = arith.extui %69 : i1 to i32
    %c0_i32_53 = arith.constant 0 : i32
    %71 = arith.cmpi ne, %70, %c0_i32_53 : i32
    scf.if %71 {
      %c0_107 = arith.constant 0 : index
      %c0_108 = arith.constant 0 : index
      %c0_109 = arith.constant 0 : index
      %169 = vector.load %arg25[%c0_107, %c0_108, %c0_109] : memref<4x8x1xf32, #tpu.memory_space<vmem>>, vector<4x8x1xf32>
      %c0_110 = arith.constant 0 : index
      %c0_111 = arith.constant 0 : index
      %c0_112 = arith.constant 0 : index
      %c0_113 = arith.constant 0 : index
      %170 = vector.load %arg23[%c0_110, %c0_111, %c0_112, %c0_113] : memref<1x4x8x8xbf16, #tpu.memory_space<vmem>>, vector<1x4x8x8xbf16>
      %171 = vector.shape_cast %170 : vector<1x4x8x8xbf16> to vector<4x8x8xbf16>
      "tpu.trace_start"() <{level = 10 : i32, message = "hqd,hkd->hqk"}> : () -> ()
      %cst_114 = arith.constant dense<0.000000e+00> : vector<4x8x8xf32>
      %172 = tpu.matmul %37, %171, %cst_114 {dimension_numbers = #tpu.dot_dimension_numbers<[2], [2], [1], [1], [0, 0, 0, 1, 1, 1], [0], [0]>} : vector<4x8x8xbf16>, vector<4x8x8xbf16>, vector<4x8x8xf32> -> vector<4x8x8xf32>
      "tpu.trace_stop"() : () -> ()
      %cst_115 = arith.constant 0.353553385 : f32
      %173 = vector.broadcast %cst_115 : f32 to vector<4x8x8xf32>
      %174 = arith.mulf %172, %173 : vector<4x8x8xf32>
      %175 = tpu.iota {dimensions = array<i32: 2>} : vector<1x8x8xi32>
      %c0_i32_116 = arith.constant 0 : i32
      %176 = vector.broadcast %c0_i32_116 : i32 to vector<1x8x8xi32>
      %177 = arith.addi %176, %175 : vector<1x8x8xi32>
      %178 = arith.cmpi sge, %68, %177 : vector<1x8x8xi32>
      %cst_117 = arith.constant -1.000000e+30 : f32
      %179 = vector.shape_cast %178 : vector<1x8x8xi1> to vector<1x8x8xi1>
      %180 = vector.broadcast %179 : vector<1x8x8xi1> to vector<4x8x8xi1>
      %181 = vector.broadcast %cst_117 : f32 to vector<4x8x8xf32>
      %182 = arith.select %180, %174, %181 : vector<4x8x8xi1>, vector<4x8x8xf32>
      %cst_118 = arith.constant dense<0xFF800000> : vector<4x8xf32>
      %183 = vector.multi_reduction <maximumf>, %182, %cst_118 [2] : vector<4x8x8xf32> to vector<4x8xf32>
      %184 = vector.shape_cast %183 : vector<4x8xf32> to vector<4x8x1xf32>
      %185 = arith.maximumf %169, %184 : vector<4x8x1xf32>
      %c0_119 = arith.constant 0 : index
      %c0_120 = arith.constant 0 : index
      %c0_121 = arith.constant 0 : index
      %186 = vector.load %arg25[%c0_119, %c0_120, %c0_121] : memref<4x8x1xf32, #tpu.memory_space<vmem>>, vector<4x8x1xf32>
      tpu.vector_store %arg25[%c0_119, %c0_120, %c0_121], %185 {strides = array<i32>} : memref<4x8x1xf32, #tpu.memory_space<vmem>>, vector<4x8x1xf32>,
    } else {
    }
    %c0_i32_54 = arith.constant 0 : i32
    %72 = arith.cmpi sge, %arg1, %c0_i32_54 : i32
    %73 = arith.extui %72 : i1 to i32
    %c0_i32_55 = arith.constant 0 : i32
    %74 = arith.cmpi ne, %73, %c0_i32_55 : i32
    scf.if %74 {
      %c0_107 = arith.constant 0 : index
      %c0_108 = arith.constant 0 : index
      %c0_109 = arith.constant 0 : index
      %c0_110 = arith.constant 0 : index
      %169 = vector.load %arg23[%c0_107, %c0_108, %c0_109, %c0_110] : memref<1x4x8x8xbf16, #tpu.memory_space<vmem>>, vector<1x4x8x8xbf16>
      %170 = vector.shape_cast %169 : vector<1x4x8x8xbf16> to vector<4x8x8xbf16>
      "tpu.trace_start"() <{level = 10 : i32, message = "hqd,hkd->hqk"}> : () -> ()
      %cst_111 = arith.constant dense<0.000000e+00> : vector<4x8x8xf32>
      %171 = tpu.matmul %37, %170, %cst_111 {dimension_numbers = #tpu.dot_dimension_numbers<[2], [2], [1], [1], [0, 0, 0, 1, 1, 1], [0], [0]>} : vector<4x8x8xbf16>, vector<4x8x8xbf16>, vector<4x8x8xf32> -> vector<4x8x8xf32>
      "tpu.trace_stop"() : () -> ()
      %cst_112 = arith.constant 0.353553385 : f32
      %172 = vector.broadcast %cst_112 : f32 to vector<4x8x8xf32>
      %173 = arith.mulf %171, %172 : vector<4x8x8xf32>
      %174 = tpu.iota {dimensions = array<i32: 2>} : vector<1x8x8xi32>
      %c0_i32_113 = arith.constant 0 : i32
      %175 = vector.broadcast %c0_i32_113 : i32 to vector<1x8x8xi32>
      %176 = arith.addi %175, %174 : vector<1x8x8xi32>
      %177 = arith.cmpi sge, %68, %176 : vector<1x8x8xi32>
      %cst_114 = arith.constant -1.000000e+30 : f32
      %178 = vector.shape_cast %177 : vector<1x8x8xi1> to vector<1x8x8xi1>
      %179 = vector.broadcast %178 : vector<1x8x8xi1> to vector<4x8x8xi1>
      %180 = vector.broadcast %cst_114 : f32 to vector<4x8x8xf32>
      %181 = arith.select %179, %173, %180 : vector<4x8x8xi1>, vector<4x8x8xf32>
      %c0_115 = arith.constant 0 : index
      %c0_116 = arith.constant 0 : index
      %c0_117 = arith.constant 0 : index
      %182 = vector.load %arg25[%c0_115, %c0_116, %c0_117] : memref<4x8x1xf32, #tpu.memory_space<vmem>>, vector<4x8x1xf32>
      %183 = vector.broadcast %182 : vector<4x8x1xf32> to vector<4x8x8xf32>
      %184 = arith.subf %181, %183 : vector<4x8x8xf32>
      %185 = math.exp %184 : vector<4x8x8xf32>
      %c0_118 = arith.constant 0 : index
      %c0_119 = arith.constant 0 : index
      %c0_120 = arith.constant 0 : index
      %186 = vector.load %arg26[%c0_118, %c0_119, %c0_120] : memref<4x8x1xf32, #tpu.memory_space<vmem>>, vector<4x8x1xf32>
      %cst_121 = arith.constant dense<0.000000e+00> : vector<4x8xf32>
      %187 = vector.multi_reduction <add>, %185, %cst_121 [2] : vector<4x8x8xf32> to vector<4x8xf32>
      %188 = vector.shape_cast %187 : vector<4x8xf32> to vector<4x8x1xf32>
      %189 = arith.addf %186, %188 : vector<4x8x1xf32>
      %c0_122 = arith.constant 0 : index
      %c0_123 = arith.constant 0 : index
      %c0_124 = arith.constant 0 : index
      %190 = vector.load %arg26[%c0_122, %c0_123, %c0_124] : memref<4x8x1xf32, #tpu.memory_space<vmem>>, vector<4x8x1xf32>
      tpu.vector_store %arg26[%c0_122, %c0_123, %c0_124], %189 {strides = array<i32>} : memref<4x8x1xf32, #tpu.memory_space<vmem>>, vector<4x8x1xf32>,
      %c0_125 = arith.constant 0 : index
      %c0_126 = arith.constant 0 : index
      %c0_127 = arith.constant 0 : index
      %191 = vector.load %arg27[%c0_125, %c0_126, %c0_127] : memref<4x8x8xf32, #tpu.memory_space<vmem>>, vector<4x8x8xf32>
      %192 = arith.truncf %185 : vector<4x8x8xf32> to vector<4x8x8xbf16>
      %c0_128 = arith.constant 0 : index
      %c0_129 = arith.constant 0 : index
      %c0_130 = arith.constant 0 : index
      %c0_131 = arith.constant 0 : index
      %193 = vector.load %arg24[%c0_128, %c0_129, %c0_130, %c0_131] : memref<1x4x8x8xbf16, #tpu.memory_space<vmem>>, vector<1x4x8x8xbf16>
      %194 = vector.shape_cast %193 : vector<1x4x8x8xbf16> to vector<4x8x8xbf16>
      "tpu.trace_start"() <{level = 10 : i32, message = "hqk,hkd->hqd"}> : () -> ()
      %cst_132 = arith.constant dense<0.000000e+00> : vector<4x8x8xf32>
      %195 = tpu.matmul %192, %194, %cst_132 {dimension_numbers = #tpu.dot_dimension_numbers<[2], [1], [1], [2], [0, 0, 0, 1, 1, 2], [0], [0]>} : vector<4x8x8xbf16>, vector<4x8x8xbf16>, vector<4x8x8xf32> -> vector<4x8x8xf32>
      "tpu.trace_stop"() : () -> ()
      %196 = arith.addf %191, %195 : vector<4x8x8xf32>
      %c0_133 = arith.constant 0 : index
      %c0_134 = arith.constant 0 : index
      %c0_135 = arith.constant 0 : index
      %197 = vector.load %arg27[%c0_133, %c0_134, %c0_135] : memref<4x8x8xf32, #tpu.memory_space<vmem>>, vector<4x8x8xf32>
      tpu.vector_store %arg27[%c0_133, %c0_134, %c0_135], %196 {strides = array<i32>} : memref<4x8x8xf32, #tpu.memory_space<vmem>>, vector<4x8x8xf32>,
      %198 = arith.truncf %185 : vector<4x8x8xf32> to vector<4x8x8xbf16>
      %c0_136 = arith.constant 0 : index
      %c0_137 = arith.constant 0 : index
      %c0_138 = arith.constant 0 : index
      %c0_139 = arith.constant 0 : index
      %199 = vector.load %arg22[%c0_136, %c0_137, %c0_138, %c0_139] : memref<1x4x8x8xbf16, #tpu.memory_space<vmem>>, vector<1x4x8x8xbf16>
      %200 = vector.shape_cast %199 : vector<1x4x8x8xbf16> to vector<4x8x8xbf16>
      %201 = vector.shape_cast %198 : vector<4x8x8xbf16> to vector<1x4x8x8xbf16>
      tpu.vector_store %arg22[%c0_136, %c0_137, %c0_138, %c0_139], %201 {strides = array<i32>} : memref<1x4x8x8xbf16, #tpu.memory_space<vmem>>, vector<1x4x8x8xbf16>,
    } else {
    }
    %c0_56 = arith.constant 0 : index
    %c0_57 = arith.constant 0 : index
    %c0_58 = arith.constant 0 : index
    %75 = vector.load %arg26[%c0_56, %c0_57, %c0_58] : memref<4x8x1xf32, #tpu.memory_space<vmem>>, vector<4x8x1xf32>
    %cst_59 = arith.constant 1.000000e+00 : f32
    %76 = vector.broadcast %cst_59 : f32 to vector<4x8x1xf32>
    %77 = arith.divf %76, %75 : vector<4x8x1xf32>
    %c0_i32_60 = arith.constant 0 : i32
    %78 = arith.cmpi sge, %arg1, %c0_i32_60 : i32
    %79 = arith.extui %78 : i1 to i32
    %c0_i32_61 = arith.constant 0 : i32
    %80 = arith.cmpi ne, %79, %c0_i32_61 : i32
    scf.if %80 {
      %c0_107 = arith.constant 0 : index
      %c0_108 = arith.constant 0 : index
      %c0_109 = arith.constant 0 : index
      %c0_110 = arith.constant 0 : index
      %169 = vector.load %arg22[%c0_107, %c0_108, %c0_109, %c0_110] : memref<1x4x8x8xbf16, #tpu.memory_space<vmem>>, vector<1x4x8x8xbf16>
      %170 = vector.shape_cast %169 : vector<1x4x8x8xbf16> to vector<4x8x8xbf16>
      %171 = arith.extf %170 : vector<4x8x8xbf16> to vector<4x8x8xf32>
      %172 = vector.broadcast %77 : vector<4x8x1xf32> to vector<4x8x8xf32>
      %173 = arith.mulf %171, %172 : vector<4x8x8xf32>
      %174 = arith.truncf %173 : vector<4x8x8xf32> to vector<4x8x8xbf16>
      %c0_111 = arith.constant 0 : index
      %c0_112 = arith.constant 0 : index
      %c0_113 = arith.constant 0 : index
      %c0_114 = arith.constant 0 : index
      %175 = vector.load %arg22[%c0_111, %c0_112, %c0_113, %c0_114] : memref<1x4x8x8xbf16, #tpu.memory_space<vmem>>, vector<1x4x8x8xbf16>
      %176 = vector.shape_cast %175 : vector<1x4x8x8xbf16> to vector<4x8x8xbf16>
      %177 = vector.shape_cast %174 : vector<4x8x8xbf16> to vector<1x4x8x8xbf16>
      tpu.vector_store %arg22[%c0_111, %c0_112, %c0_113, %c0_114], %177 {strides = array<i32>} : memref<1x4x8x8xbf16, #tpu.memory_space<vmem>>, vector<1x4x8x8xbf16>,
    } else {
    }
    %c0_62 = arith.constant 0 : index
    %c0_63 = arith.constant 0 : index
    %c0_64 = arith.constant 0 : index
    %81 = vector.load %arg27[%c0_62, %c0_63, %c0_64] : memref<4x8x8xf32, #tpu.memory_space<vmem>>, vector<4x8x8xf32>
    %82 = vector.broadcast %77 : vector<4x8x1xf32> to vector<4x8x8xf32>
    %83 = arith.mulf %81, %82 : vector<4x8x8xf32>
    %84 = arith.truncf %83 : vector<4x8x8xf32> to vector<4x8x8xbf16>
    %c0_65 = arith.constant 0 : index
    %c0_66 = arith.constant 0 : index
    %c0_67 = arith.constant 0 : index
    %85 = vector.load %arg11[%c0_65, %c0_66, %c0_67] : memref<4x8x32xbf16, #tpu.memory_space<vmem>>, vector<4x8x32xbf16>
    "tpu.trace_start"() <{level = 10 : i32, message = "hqd,hde->hqe"}> : () -> ()
    %cst_68 = arith.constant dense<0.000000e+00> : vector<4x8x32xf32>
    %86 = tpu.matmul %84, %85, %cst_68 {dimension_numbers = #tpu.dot_dimension_numbers<[2], [1], [1], [2], [0, 0, 0, 1, 1, 2], [0], [0]>} : vector<4x8x8xbf16>, vector<4x8x32xbf16>, vector<4x8x32xf32> -> vector<4x8x32xf32>
    "tpu.trace_stop"() : () -> ()
    %cst_69 = arith.constant dense<0.000000e+00> : vector<8x32xf32>
    %87 = vector.multi_reduction <add>, %86, %cst_69 [0] : vector<4x8x32xf32> to vector<8x32xf32>
    %c0_70 = arith.constant 0 : index
    %c0_71 = arith.constant 0 : index
    %88 = vector.load %arg12[%c0_70, %c0_71] : memref<1x32xf32, #tpu.memory_space<vmem>>, vector<1x32xf32>
    %89 = vector.broadcast %88 : vector<1x32xf32> to vector<8x32xf32>
    %90 = arith.addf %87, %89 : vector<8x32xf32>
    %91 = arith.addf %4, %90 : vector<8x32xf32>
    %c0_72 = arith.constant 0 : index
    %c0_73 = arith.constant 0 : index
    %92 = vector.load %arg13[%c0_72, %c0_73] : memref<1x32xf32, #tpu.memory_space<vmem>>, vector<1x32xf32>
    %c0_74 = arith.constant 0 : index
    %c0_75 = arith.constant 0 : index
    %93 = vector.load %arg14[%c0_74, %c0_75] : memref<1x32xf32, #tpu.memory_space<vmem>>, vector<1x32xf32>
    %cst_76 = arith.constant dense<0.000000e+00> : vector<8xf32>
    %94 = vector.multi_reduction <add>, %91, %cst_76 [1] : vector<8x32xf32> to vector<8xf32>
    %95 = vector.shape_cast %94 : vector<8xf32> to vector<8x1xf32>
    %cst_77 = arith.constant 3.200000e+01 : f32
    %96 = vector.broadcast %cst_77 : f32 to vector<8x1xf32>
    %97 = arith.divf %95, %96 : vector<8x1xf32>
    %98 = vector.broadcast %97 : vector<8x1xf32> to vector<8x32xf32>
    %99 = arith.subf %91, %98 : vector<8x32xf32>
    %100 = arith.mulf %99, %99 : vector<8x32xf32>
    %cst_78 = arith.constant dense<0.000000e+00> : vector<8xf32>
    %101 = vector.multi_reduction <add>, %100, %cst_78 [1] : vector<8x32xf32> to vector<8xf32>
    %102 = vector.shape_cast %101 : vector<8xf32> to vector<8x1xf32>
    %cst_79 = arith.constant 3.200000e+01 : f32
    %103 = vector.broadcast %cst_79 : f32 to vector<8x1xf32>
    %104 = arith.divf %102, %103 : vector<8x1xf32>
    %105 = vector.broadcast %97 : vector<8x1xf32> to vector<8x32xf32>
    %106 = arith.subf %91, %105 : vector<8x32xf32>
    %cst_80 = arith.constant 9.99999974E-6 : f32
    %107 = vector.broadcast %cst_80 : f32 to vector<8x1xf32>
    %108 = arith.addf %104, %107 : vector<8x1xf32>
    %109 = math.rsqrt %108 : vector<8x1xf32>
    %110 = vector.broadcast %109 : vector<8x1xf32> to vector<8x32xf32>
    %111 = arith.mulf %106, %110 : vector<8x32xf32>
    %112 = vector.broadcast %92 : vector<1x32xf32> to vector<8x32xf32>
    %113 = arith.mulf %111, %112 : vector<8x32xf32>
    %114 = vector.broadcast %93 : vector<1x32xf32> to vector<8x32xf32>
    %115 = arith.addf %113, %114 : vector<8x32xf32>
    %116 = arith.truncf %115 : vector<8x32xf32> to vector<8x32xbf16>
    %c0_81 = arith.constant 0 : index
    %c0_82 = arith.constant 0 : index
    %117 = vector.load %arg15[%c0_81, %c0_82] : memref<32x128xbf16, #tpu.memory_space<vmem>>, vector<32x128xbf16>
    %cst_83 = arith.constant dense<0.000000e+00> : vector<8x128xf32>
    %118 = tpu.matmul %116, %117, %cst_83 {dimension_numbers = #tpu.dot_dimension_numbers<[1], [0], [0], [1], [0, 0, 1, 1], [], []>} : vector<8x32xbf16>, vector<32x128xbf16>, vector<8x128xf32> -> vector<8x128xf32>
    %c0_84 = arith.constant 0 : index
    %c0_85 = arith.constant 0 : index
    %119 = vector.load %arg16[%c0_84, %c0_85] : memref<1x128xf32, #tpu.memory_space<vmem>>, vector<1x128xf32>
    %120 = vector.broadcast %119 : vector<1x128xf32> to vector<8x128xf32>
    %121 = arith.addf %118, %120 : vector<8x128xf32>
    %cst_86 = arith.constant 5.000000e-01 : f32
    %122 = vector.broadcast %cst_86 : f32 to vector<8x128xf32>
    %123 = arith.mulf %122, %121 : vector<8x128xf32>
    %cst_87 = arith.constant 4.471500e-02 : f32
    %124 = vector.broadcast %cst_87 : f32 to vector<8x128xf32>
    %125 = arith.mulf %124, %121 : vector<8x128xf32>
    %126 = arith.mulf %125, %121 : vector<8x128xf32>
    %127 = arith.mulf %126, %121 : vector<8x128xf32>
    %128 = arith.addf %121, %127 : vector<8x128xf32>
    %cst_88 = arith.constant 0.797884583 : f32
    %129 = vector.broadcast %cst_88 : f32 to vector<8x128xf32>
    %130 = arith.mulf %129, %128 : vector<8x128xf32>
    %131 = math.tanh %130 : vector<8x128xf32>
    %cst_89 = arith.constant 1.000000e+00 : f32
    %132 = vector.broadcast %cst_89 : f32 to vector<8x128xf32>
    %133 = arith.addf %132, %131 : vector<8x128xf32>
    %134 = arith.mulf %123, %133 : vector<8x128xf32>
    %135 = arith.truncf %134 : vector<8x128xf32> to vector<8x128xbf16>
    %c0_90 = arith.constant 0 : index
    %c0_91 = arith.constant 0 : index
    %136 = vector.load %arg17[%c0_90, %c0_91] : memref<128x32xbf16, #tpu.memory_space<vmem>>, vector<128x32xbf16>
    %cst_92 = arith.constant dense<0.000000e+00> : vector<8x32xf32>
    %137 = tpu.matmul %135, %136, %cst_92 {dimension_numbers = #tpu.dot_dimension_numbers<[1], [0], [0], [1], [0, 0, 1, 1], [], []>} : vector<8x128xbf16>, vector<128x32xbf16>, vector<8x32xf32> -> vector<8x32xf32>
    %c0_93 = arith.constant 0 : index
    %c0_94 = arith.constant 0 : index
    %138 = vector.load %arg18[%c0_93, %c0_94] : memref<1x32xf32, #tpu.memory_space<vmem>>, vector<1x32xf32>
    %139 = vector.broadcast %138 : vector<1x32xf32> to vector<8x32xf32>
    %140 = arith.addf %137, %139 : vector<8x32xf32>
    %141 = arith.addf %91, %140 : vector<8x32xf32>
    %c0_95 = arith.constant 0 : index
    %c0_96 = arith.constant 0 : index
    %142 = vector.load %arg19[%c0_95, %c0_96] : memref<1x32xf32, #tpu.memory_space<vmem>>, vector<1x32xf32>
    %c0_97 = arith.constant 0 : index
    %c0_98 = arith.constant 0 : index
    %143 = vector.load %arg20[%c0_97, %c0_98] : memref<1x32xf32, #tpu.memory_space<vmem>>, vector<1x32xf32>
    %cst_99 = arith.constant dense<0.000000e+00> : vector<8xf32>
    %144 = vector.multi_reduction <add>, %141, %cst_99 [1] : vector<8x32xf32> to vector<8xf32>
    %145 = vector.shape_cast %144 : vector<8xf32> to vector<8x1xf32>
    %cst_100 = arith.constant 3.200000e+01 : f32
    %146 = vector.broadcast %cst_100 : f32 to vector<8x1xf32>
    %147 = arith.divf %145, %146 : vector<8x1xf32>
    %148 = vector.broadcast %147 : vector<8x1xf32> to vector<8x32xf32>
    %149 = arith.subf %141, %148 : vector<8x32xf32>
    %150 = arith.mulf %149, %149 : vector<8x32xf32>
    %cst_101 = arith.constant dense<0.000000e+00> : vector<8xf32>
    %151 = vector.multi_reduction <add>, %150, %cst_101 [1] : vector<8x32xf32> to vector<8xf32>
    %152 = vector.shape_cast %151 : vector<8xf32> to vector<8x1xf32>
    %cst_102 = arith.constant 3.200000e+01 : f32
    %153 = vector.broadcast %cst_102 : f32 to vector<8x1xf32>
    %154 = arith.divf %152, %153 : vector<8x1xf32>
    %155 = vector.broadcast %147 : vector<8x1xf32> to vector<8x32xf32>
    %156 = arith.subf %141, %155 : vector<8x32xf32>
    %cst_103 = arith.constant 9.99999974E-6 : f32
    %157 = vector.broadcast %cst_103 : f32 to vector<8x1xf32>
    %158 = arith.addf %154, %157 : vector<8x1xf32>
    %159 = math.rsqrt %158 : vector<8x1xf32>
    %160 = vector.broadcast %159 : vector<8x1xf32> to vector<8x32xf32>
    %161 = arith.mulf %156, %160 : vector<8x32xf32>
    %162 = vector.broadcast %142 : vector<1x32xf32> to vector<8x32xf32>
    %163 = arith.mulf %161, %162 : vector<8x32xf32>
    %164 = vector.broadcast %143 : vector<1x32xf32> to vector<8x32xf32>
    %165 = arith.addf %163, %164 : vector<8x32xf32>
    %c0_104 = arith.constant 0 : index
    %c0_105 = arith.constant 0 : index
    %c0_106 = arith.constant 0 : index
    %166 = vector.load %arg21[%c0_104, %c0_105, %c0_106] : memref<1x8x32xf32, #tpu.memory_space<vmem>>, vector<1x8x32xf32>
    %167 = vector.shape_cast %166 : vector<1x8x32xf32> to vector<8x32xf32>
    %168 = vector.shape_cast %165 : vector<8x32xf32> to vector<1x8x32xf32>
    tpu.vector_store %arg21[%c0_104, %c0_105, %c0_106], %168 {strides = array<i32>} : memref<1x8x32xf32, #tpu.memory_space<vmem>>, vector<1x8x32xf32>,
    return
  }
  func.func @transform_0(%arg0: i32, %arg1: i32) -> (i32, i32, i32) {
    %c0_i32 = arith.constant 0 : i32
    %c0_i32_0 = arith.constant 0 : i32
    %c0_i32_1 = arith.constant 0 : i32
    return %arg0, %c0_i32, %c0_i32_0 : i32, i32, i32
  }
  func.func @transform_1(%arg0: i32, %arg1: i32) -> (i32, i32) {
    %c0_i32 = arith.constant 0 : i32
    %c0_i32_0 = arith.constant 0 : i32
    %c0_i32_1 = arith.constant 0 : i32
    return %c0_i32, %c0_i32_0 : i32, i32
  }
  func.func @transform_2(%arg0: i32, %arg1: i32) -> (i32, i32) {
    %c0_i32 = arith.constant 0 : i32
    %c0_i32_0 = arith.constant 0 : i32
    %c0_i32_1 = arith.constant 0 : i32
    return %c0_i32, %c0_i32_0 : i32, i32
  }
  func.func @transform_3(%arg0: i32, %arg1: i32) -> (i32, i32, i32) {
    %c0_i32 = arith.constant 0 : i32
    %c0_i32_0 = arith.constant 0 : i32
    %c0_i32_1 = arith.constant 0 : i32
    %c0_i32_2 = arith.constant 0 : i32
    return %c0_i32, %c0_i32_0, %c0_i32_1 : i32, i32, i32
  }
  func.func @transform_4(%arg0: i32, %arg1: i32) -> (i32, i32, i32) {
    %c0_i32 = arith.constant 0 : i32
    %c0_i32_0 = arith.constant 0 : i32
    %c0_i32_1 = arith.constant 0 : i32
    %c0_i32_2 = arith.constant 0 : i32
    return %c0_i32, %c0_i32_0, %c0_i32_1 : i32, i32, i32
  }
  func.func @transform_5(%arg0: i32, %arg1: i32) -> (i32, i32, i32) {
    %c0_i32 = arith.constant 0 : i32
    %c0_i32_0 = arith.constant 0 : i32
    %c0_i32_1 = arith.constant 0 : i32
    %c0_i32_2 = arith.constant 0 : i32
    return %c0_i32, %c0_i32_0, %c0_i32_1 : i32, i32, i32
  }
  func.func @transform_6(%arg0: i32, %arg1: i32) -> (i32, i32, i32) {
    %c0_i32 = arith.constant 0 : i32
    %c0_i32_0 = arith.constant 0 : i32
    %c0_i32_1 = arith.constant 0 : i32
    %c0_i32_2 = arith.constant 0 : i32
    return %c0_i32, %c0_i32_0, %c0_i32_1 : i32, i32, i32
  }
  func.func @transform_7(%arg0: i32, %arg1: i32) -> (i32, i32, i32) {
    %c0_i32 = arith.constant 0 : i32
    %c0_i32_0 = arith.constant 0 : i32
    %c0_i32_1 = arith.constant 0 : i32
    %c0_i32_2 = arith.constant 0 : i32
    return %c0_i32, %c0_i32_0, %c0_i32_1 : i32, i32, i32
  }
  func.func @transform_8(%arg0: i32, %arg1: i32) -> (i32, i32, i32) {
    %c0_i32 = arith.constant 0 : i32
    %c0_i32_0 = arith.constant 0 : i32
    %c0_i32_1 = arith.constant 0 : i32
    %c0_i32_2 = arith.constant 0 : i32
    return %c0_i32, %c0_i32_0, %c0_i32_1 : i32, i32, i32
  }
  func.func @transform_9(%arg0: i32, %arg1: i32) -> (i32, i32, i32) {
    %c0_i32 = arith.constant 0 : i32
    %c0_i32_0 = arith.constant 0 : i32
    %c0_i32_1 = arith.constant 0 : i32
    %c0_i32_2 = arith.constant 0 : i32
    return %c0_i32, %c0_i32_0, %c0_i32_1 : i32, i32, i32
  }
  func.func @transform_10(%arg0: i32, %arg1: i32) -> (i32, i32) {
    %c0_i32 = arith.constant 0 : i32
    %c0_i32_0 = arith.constant 0 : i32
    %c0_i32_1 = arith.constant 0 : i32
    return %c0_i32, %c0_i32_0 : i32, i32
  }
  func.func @transform_11(%arg0: i32, %arg1: i32) -> (i32, i32) {
    %c0_i32 = arith.constant 0 : i32
    %c0_i32_0 = arith.constant 0 : i32
    %c0_i32_1 = arith.constant 0 : i32
    return %c0_i32, %c0_i32_0 : i32, i32
  }
  func.func @transform_12(%arg0: i32, %arg1: i32) -> (i32, i32) {
    %c0_i32 = arith.constant 0 : i32
    %c0_i32_0 = arith.constant 0 : i32
    %c0_i32_1 = arith.constant 0 : i32
    return %c0_i32, %c0_i32_0 : i32, i32
  }
  func.func @transform_13(%arg0: i32, %arg1: i32) -> (i32, i32) {
    %c0_i32 = arith.constant 0 : i32
    %c0_i32_0 = arith.constant 0 : i32
    %c0_i32_1 = arith.constant 0 : i32
    return %c0_i32, %c0_i32_0 : i32, i32
  }
  func.func @transform_14(%arg0: i32, %arg1: i32) -> (i32, i32) {
    %c0_i32 = arith.constant 0 : i32
    %c0_i32_0 = arith.constant 0 : i32
    %c0_i32_1 = arith.constant 0 : i32
    return %c0_i32, %c0_i32_0 : i32, i32
  }
  func.func @transform_15(%arg0: i32, %arg1: i32) -> (i32, i32) {
    %c0_i32 = arith.constant 0 : i32
    %c0_i32_0 = arith.constant 0 : i32
    %c0_i32_1 = arith.constant 0 : i32
    return %c0_i32, %c0_i32_0 : i32, i32
  }
  func.func @transform_16(%arg0: i32, %arg1: i32) -> (i32, i32) {
    %c0_i32 = arith.constant 0 : i32
    %c0_i32_0 = arith.constant 0 : i32
    %c0_i32_1 = arith.constant 0 : i32
    return %c0_i32, %c0_i32_0 : i32, i32
  }
  func.func @transform_17(%arg0: i32, %arg1: i32) -> (i32, i32) {
    %c0_i32 = arith.constant 0 : i32
    %c0_i32_0 = arith.constant 0 : i32
    %c0_i32_1 = arith.constant 0 : i32
    return %c0_i32, %c0_i32_0 : i32, i32
  }
  func.func @transform_18(%arg0: i32, %arg1: i32) -> (i32, i32) {
    %c0_i32 = arith.constant 0 : i32
    %c0_i32_0 = arith.constant 0 : i32
    %c0_i32_1 = arith.constant 0 : i32
    return %c0_i32, %c0_i32_0 : i32, i32
  }
  func.func @transform_19(%arg0: i32, %arg1: i32) -> (i32, i32, i32) {
    %c0_i32 = arith.constant 0 : i32
    %c0_i32_0 = arith.constant 0 : i32
    return %arg0, %arg1, %c0_i32 : i32, i32, i32
  }
  func.func @transform_20(%arg0: i32, %arg1: i32) -> (i32, i32, i32, i32) {
    %c0_i32 = arith.constant 0 : i32
    %c0_i32_0 = arith.constant 0 : i32
    %c0_i32_1 = arith.constant 0 : i32
    return %arg0, %c0_i32, %arg1, %c0_i32_0 : i32, i32, i32, i32
  }
}

</mosaic_0001>

<bundles_post_ra>
// kernel: transformer_forward.2
= control target key start
LH: loop header
LB: loop body
LE: loop exit
PB: predicated region body
PF: predicated region fallthrough
CT: control target
= control target key end

     0   :  { %s3451_s22 = smov 0   ;;  %s3453_s23 = smov 0   ;;  %s3986_s0 = inlined_call_operand.vmem [shape: f32[2,8,32], index: 0, kind: input, shape index: {}]   ;;  %s3987_s1 = inlined_call_operand.vmem [shape: f32[1,32], index: 1, kind: input, shape index: {}]   ;;  %s3988_s2 = inlined_call_operand.vmem [shape: f32[1,32], index: 2, kind: input, shape index: {}]   ;;  %s3989_s3 = inlined_call_operand.vmem [shape: bf16[4,32,8], index: 3, kind: input, shape index: {}]   ;;  %s3990_s4 = inlined_call_operand.vmem [shape: bf16[4,32,8], index: 4, kind: input, shape index: {}]   ;;  %s3991_s5 = inlined_call_operand.vmem [shape: bf16[4,32,8], index: 5, kind: input, shape index: {}]   ;;  %s3992_s6 = inlined_call_operand.vmem [shape: f32[4,1,8], index: 6, kind: input, shape index: {}]   ;;  %s3993_s7 = inlined_call_operand.vmem [shape: f32[4,1,8], index: 7, kind: input, shape index: {}]   ;;  %s3994_s8 = inlined_call_operand.vmem [shape: f32[4,1,8], index: 8, kind: input, shape index: {}]   ;;  %s3995_s9 = inlined_call_operand.vmem [shape: bf16[4,8,32], index: 9, kind: input, shape index: {}]   ;;  %s3996_s10 = inlined_call_operand.vmem [shape: f32[1,32], index: 10, kind: input, shape index: {}]   ;;  %s3997_s11 = inlined_call_operand.vmem [shape: f32[1,32], index: 11, kind: input, shape index: {}]   ;;  %s3998_s12 = inlined_call_operand.vmem [shape: f32[1,32], index: 12, kind: input, shape index: {}]   ;;  %s3999_s13 = inlined_call_operand.vmem [shape: bf16[32,128], index: 13, kind: input, shape index: {}]   ;;  %s4000_s14 = inlined_call_operand.vmem [shape: f32[1,128], index: 14, kind: input, shape index: {}]   ;;  %s4001_s15 = inlined_call_operand.vmem [shape: bf16[128,32], index: 15, kind: input, shape index: {}]   ;;  %s4002_s16 = inlined_call_operand.vmem [shape: f32[1,32], index: 16, kind: input, shape index: {}]   ;;  %s4003_s17 = inlined_call_operand.vmem [shape: f32[1,32], index: 17, kind: input, shape index: {}]   ;;  %s4004_s18 = inlined_call_operand.vmem [shape: f32[1,32], index: 18, kind: input, shape index: {}]   ;;  %s4005_s19 = inlined_call_operand.vmem [shape: f32[2,8,32], index: 19, kind: output, shape index: {0}]   ;;  %s4006_s20 = inlined_call_operand.vmem [shape: bf16[2,4,8,8], index: 20, kind: output, shape index: {1}]  }
   0x1   :  { %4010 = sst [smem:[#allocation7_spill]] %s3986_s0 }
   0x2   :  { %4011 = sst [smem:[#allocation8_spill]] %s3987_s1  ;;  %s3449_s1 = smov 0  }
   0x3   :  { %4012 = sst [smem:[#allocation9_spill]] %s3988_s2 }
   0x4   :  { %4013 = sst [smem:[#allocation10_spill]] %s3989_s3 }
   0x5   :  { %4014 = sst [smem:[#allocation11_spill]] %s3990_s4 }
   0x6 LB: > { %s43_s17 = sadd.s32 1, %s3334_s22  ;;  %p2830_p0 = scmp.ge.s32.totalorder %s3338_s23, 1  ;;  %s3338_s23 = sphi %s3453_s23, %s31_s23   ;;  %s3334_s22 = sphi %s3451_s22, %s4024_s22   ;;  %s3330_s1 = sphi %s3449_s1, %s4023_s1  }
   0x7   : > { %p45_p1 = scmp.ge.s32.totalorder %s43_s17, 2  ;;  %p580_p2 = scmp.lt.s32.totalorder %s3338_s23, 3 }
   0x9   : > { %s4026_s17 = smov (%p45_p1, %s43_s17), 0  ;;  %p581_p3 = pnand %p2830_p0, %p580_p2 }
   0xa   : > { %p647_p4 = scmp.lt.s32.totalorder (!%p581_p3), %s3330_s1, 1  ;;  %s4015_s25 = sld [smem:[#allocation7_spill]] (!%p581_p3) }
   0xb   : > { %584 = sbr.rel (%p581_p3) target bundleno = 2291 (0x8f3), region = 96  ;;  %s4016_s28 = sld [smem:[#allocation10_spill]] (!%p581_p3) }
   0xc   : > { %s4017_s26 = sld [smem:[#allocation8_spill]] (!%p581_p3) }
   0xd   : > { %s4018_s29 = sld [smem:[#allocation9_spill]] (!%p581_p3) }
  0x10   : > { %s4028_s1 = smov (!%p647_p4, %s3330_s1), 1  ;;  %vm672_vm0 = vcmask 261120   ;;  %v3340_v9 = vmov 0.0   ;;  %vm3341_vm1 = vmmov 0   ;;  %v3272_v31 = vld [vmem:[%s3991_s5 + $0x18] sm:$0xff]   ;;  %v3274_v33 = vld [vmem:[%s3991_s5 + $0x10] sm:$0xff]  }
  0x11   : > { %s4009_s18 = sshll.u32 %s4028_s1, 3  ;;  %v3259_v7 = vld [vmem:[%s4016_s28 + $0x8] sm:$0xff]   ;;  %v3260_v8 = vld [vmem:[%s4016_s28 + $0x38] sm:$0xff]   ;;  %3009 = vmatprep.subr.bf16.mxu0 %v3340_v9  ;;  %3033 = vmatprep.subr.bf16.mxu1 %v3340_v9  ;;  %v3261_v10 = vld [vmem:[%s4016_s28] sm:$0xff]   ;;  %vm1500_vm2 = vcmask 64512   ;;  %vm1220_vm3 = vcmask 60416  }
  0x12   : > { %s3475_s3 = scalar_lea.vmem %s4015_s25, %s4009_s18  ;;  %3010 = vmatpush3.bf16.msra.mxu0 %v3259_v7  ;;  %3034 = vmatpush3.bf16.msra.mxu1 %v3260_v8  ;;  %v3262_v11 = vld [vmem:[%s4016_s28 + $0x30] sm:$0xff]   ;;  %v2835_v16 = vld [vmem:[%s4017_s26] ss:$0 sm:$0xff]  ;;  %v3263_v21 = vld [vmem:[%s4016_s28 + $0x18] sm:$0xff]   ;;  %s4019_s18 = sld [smem:[#allocation11_spill]]  ;;  %1501 = vst.msk [vmem:[#allocation6] sm:$0xff] %vm1500_vm2, %v3340_v9 }
  0x13   : > { %v669_v0 = vld [vmem:[%s3475_s3] sm:$0xff]  ;;  %3011 = vmatprep.subr.bf16.mxu0 %v3340_v9  ;;  %3035 = vmatprep.subr.bf16.mxu1 %v3340_v9  ;;  %v3265_v24 = vld [vmem:[%s4016_s28 + $0x10] sm:$0xff]   ;;  %v3267_v26 = vld [vmem:[%s4016_s28 + $0x28] sm:$0xff]   ;;  %1502 = vst.msk [vmem:[#allocation6 + $0x8] sm:$0xff] %vm1500_vm2, %v3340_v9  ;;  %vm1997_vm4 = vcmask 1043456   ;;  %vm1491_vm5 = vcmask 7168  }
  0x14   : > { %v673_v1 = vsel %vm672_vm0, %v669_v0, 0.0  ;;  %3013 = vmatprep.mubr.msk.bf16.mxu0 %vm3341_vm1, %v3340_v9  ;;  %3037 = vmatprep.mubr.msk.bf16.mxu1 %vm3341_vm1, %v3340_v9  ;;  %v2836_v18 = vld [vmem:[%s4018_s29] ss:$0 sm:$0xff]  ;;  %v3276_v35 = vld [vmem:[%s3991_s5 + $0x38] sm:$0xff]   ;;  %v3278_v37 = vld [vmem:[%s3991_s5 + $0x30] sm:$0xff]   ;;  %1503 = vst.msk [vmem:[#allocation6 + $0x10] sm:$0xff] %vm1500_vm2, %v3340_v9 }
  0x15   : > { %674 = vadd.xlane.f32.xlu0 %v673_v1  ;;  %v3269_v28 = vld [vmem:[%s4016_s28 + $0x20] sm:$0xff]   ;;  %v3279_v38 = vld [vmem:[%s3991_s5 + $0x8] sm:$0xff]   ;;  %1504 = vst.msk [vmem:[#allocation6 + $0x18] sm:$0xff] %vm1500_vm2, %v3340_v9  ;;  %s2919_s2 = sshll.u32 %s4028_s1, 4 }
  0x16   : > { %3012 = vmatpush3.bf16.msra.mxu0 %v3261_v10  ;;  %3036 = vmatpush3.bf16.msra.mxu1 %v3262_v11  ;;  %v3280_v39 = vld [vmem:[%s3991_s5] sm:$0xff]   ;;  %v3281_v40 = vld [vmem:[%s3991_s5 + $0x28] sm:$0xff]   ;;  %1496 = vst.msk [vmem:[#allocation5] sm:$0xff] %vm1491_vm5, %v3340_v9  ;;  %1497 = vst.msk [vmem:[#allocation5 + $0x8] sm:$0xff] %vm1491_vm5, %v3340_v9  ;;  %s3787_s27 = scalar_lea.vmem %s4006_s20, %s2919_s2  ;;  %s4022_s2 = sshll.u32 %s4028_s1, 3 }
  0x17   : > { %3017 = vmatprep.subr.bf16.mxu0 %v3340_v9  ;;  %3049 = vmatprep.subr.bf16.mxu1 %v3340_v9  ;;  %v3282_v41 = vld [vmem:[%s3991_s5 + $0x20] sm:$0xff]   ;;  %1498 = vst.msk [vmem:[#allocation5 + $0x10] sm:$0xff] %vm1491_vm5, %v3340_v9  ;;  %1499 = vst.msk [vmem:[#allocation5 + $0x18] sm:$0xff] %vm1491_vm5, %v3340_v9  ;;  %s657_s4 = scalar_lea.vmem %s4005_s19, %s4022_s2 }
  0x18   : > { %v3264_v22 = vld [vmem:[%s4019_s18 + $0x18] sm:$0xff]   ;;  %v3266_v25 = vld [vmem:[%s4019_s18 + $0x10] sm:$0xff]   ;;  %v3271_v30 = vld [vmem:[%s4019_s18 + $0x8] sm:$0xff]  }
  0x19   : > { %v3268_v27 = vld [vmem:[%s4019_s18 + $0x38] sm:$0xff]   ;;  %v3270_v29 = vld [vmem:[%s4019_s18 + $0x30] sm:$0xff]   ;;  %v3273_v32 = vld [vmem:[%s4019_s18] sm:$0xff]  }
  0x1a   : > { %v3275_v34 = vld [vmem:[%s4019_s18 + $0x28] sm:$0xff]   ;;  %v3277_v36 = vld [vmem:[%s4019_s18 + $0x20] sm:$0xff]  }
  0x1b   : > { %v2854_v50 = vld [vmem:[%s3993_s7 + $0x1] ss:$0 sm:$0xff]  ;;  %v2856_v61 = vld [vmem:[%s3993_s7 + $0x3] ss:$0 sm:$0xff] }
  0x9e   : > { %v675_v2 = vpop.xlane.xlu0 %674 }
  0x9f   : > { %v677_v3 = vmul.f32 0.03125, %v675_v2 }
  0xa1   : > { %v678_v4 = vsub.f32 %v669_v0, %v677_v3 }
  0xa3   : > { %v679_v5 = vmul.f32 %v678_v4, %v678_v4 }
  0xa5   : > { %v680_v6 = vsel %vm672_vm0, %v679_v5, 0.0 }
  0xa6   : > { %681 = vadd.xlane.f32.xlu0 %v680_v6 }
 0x12f   : > { %v682_v12 = vpop.xlane.xlu0 %681 }
 0x130   : > { %v683_v13 = vmul.f32 0.03125, %v682_v12  ;;  %v2853_v12 = vld [vmem:[%s3993_s7] ss:$0 sm:$0xff] }
 0x132   : > { %v684_v14 = vadd.f32 1e-05, %v683_v13  ;;  %v2870_v13 = vld [vmem:[%s3994_s8 + $0x1] ss:$0 sm:$0xff] }
 0x134   : > { %3293 = vrsqrt.f32 %v684_v14 }
 0x141   : > { %v3294_v15 = vpop.eup %3293 }
 0x142   : > { %v686_v17 = vmul.f32 %v3294_v15, %v678_v4  ;;  %v2838_v4 = vld [vmem:[%s3992_s6 + $0x1] ss:$0 sm:$0xff] }
 0x144   : > { %v693_v19 = vmul.f32 %v2835_v16, %v686_v17 }
 0x146   : > { %v700_v20 = vadd.f32 %v2836_v18, %v693_v19 }
 0x148   : > { %v3514_v23 = vpack.c.bf16 %v700_v20, %v700_v20 }
 0x14a   : > { %3014 = vmatmul.mubr.msk.bf16.vlgmr.msra.gmra.mxu0 %vm672_vm0, %v3514_v23  ;;  %3038 = vmatmul.mubr.msk.bf16.vlgmr.msra.gmra.mxu1 %vm672_vm0, %v3514_v23 }
 0x14b   : > { %3018 = vmatpush3.bf16.msra.mxu0 %v3263_v21  ;;  %3050 = vmatpush3.bf16.msra.mxu1 %v3264_v22 }
 0x14c   : > { %3019 = vmatprep.subr.bf16.mxu0 %v3340_v9  ;;  %3051 = vmatprep.subr.bf16.mxu1 %v3340_v9 }
 0x14d   : > { %3021 = vmatprep.mubr.msk.bf16.mxu0 %vm3341_vm1, %v3340_v9  ;;  %3053 = vmatprep.mubr.msk.bf16.mxu1 %vm3341_vm1, %v3340_v9 }
 0x14f   : > { %3020 = vmatpush3.bf16.msra.mxu0 %v3265_v24  ;;  %3052 = vmatpush3.bf16.msra.mxu1 %v3266_v25  ;;  %v2840_v24 = vld [vmem:[%s3992_s6 + $0x3] ss:$0 sm:$0xff] }
 0x150   : > { %3025 = vmatprep.subr.bf16.mxu0 %v3340_v9  ;;  %3065 = vmatprep.subr.bf16.mxu1 %v3340_v9 }
 0x152   : > { %3022 = vmatmul.mubr.msk.bf16.vlgmr.msra.gmra.mxu0 %vm672_vm0, %v3514_v23  ;;  %3054 = vmatmul.mubr.msk.bf16.vlgmr.msra.gmra.mxu1 %vm672_vm0, %v3514_v23 }
 0x153   : > { %3026 = vmatpush3.bf16.msra.mxu0 %v3267_v26  ;;  %3066 = vmatpush3.bf16.msra.mxu1 %v3268_v27 }
 0x154   : > { %3027 = vmatprep.subr.bf16.mxu0 %v3340_v9  ;;  %3067 = vmatprep.subr.bf16.mxu1 %v3340_v9 }
 0x155   : > { %3029 = vmatprep.mubr.msk.bf16.mxu0 %vm3341_vm1, %v3340_v9  ;;  %3069 = vmatprep.mubr.msk.bf16.mxu1 %vm3341_vm1, %v3340_v9 }
 0x157   : > { %3028 = vmatpush3.bf16.msra.mxu0 %v3269_v28  ;;  %3068 = vmatpush3.bf16.msra.mxu1 %v3270_v29 }
 0x158   : > { %3041 = vmatprep.subr.bf16.mxu0 %v3340_v9  ;;  %3081 = vmatprep.subr.bf16.mxu1 %v3340_v9 }
 0x15a   : > { %3030 = vmatmul.mubr.msk.bf16.vlgmr.msra.gmra.mxu0 %vm672_vm0, %v3514_v23  ;;  %3070 = vmatmul.mubr.msk.bf16.vlgmr.msra.gmra.mxu1 %vm672_vm0, %v3514_v23 }
 0x15b   : > { %3042 = vmatpush3.bf16.msra.mxu0 %v3271_v30  ;;  %3082 = vmatpush3.bf16.msra.mxu1 %v3272_v31  ;;  %v2855_v31 = vld [vmem:[%s3993_s7 + $0x2] ss:$0 sm:$0xff] }
 0x15c   : > { %3043 = vmatprep.subr.bf16.mxu0 %v3340_v9  ;;  %3083 = vmatprep.subr.bf16.mxu1 %v3340_v9 }
 0x15d   : > { %3045 = vmatprep.mubr.msk.bf16.mxu0 %vm3341_vm1, %v3340_v9  ;;  %3085 = vmatprep.mubr.msk.bf16.mxu1 %vm3341_vm1, %v3340_v9 }
 0x15f   : > { %3044 = vmatpush3.bf16.msra.mxu0 %v3273_v32  ;;  %3084 = vmatpush3.bf16.msra.mxu1 %v3274_v33  ;;  %v2872_v32 = vld [vmem:[%s3994_s8 + $0x3] ss:$0 sm:$0xff] }
 0x160   : > { %3057 = vmatprep.subr.bf16.mxu0 %v3340_v9  ;;  %3097 = vmatprep.subr.bf16.mxu1 %v3340_v9 }
 0x162   : > { %3046 = vmatmul.mubr.msk.bf16.vlgmr.msra.gmra.mxu0 %vm672_vm0, %v3514_v23  ;;  %3086 = vmatmul.mubr.msk.bf16.vlgmr.msra.gmra.mxu1 %vm672_vm0, %v3514_v23 }
 0x163   : > { %3058 = vmatpush3.bf16.msra.mxu0 %v3275_v34  ;;  %3098 = vmatpush3.bf16.msra.mxu1 %v3276_v35 }
 0x164   : > { %3059 = vmatprep.subr.bf16.mxu0 %v3340_v9  ;;  %3099 = vmatprep.subr.bf16.mxu1 %v3340_v9 }
 0x165   : > { %3061 = vmatprep.mubr.msk.bf16.mxu0 %vm3341_vm1, %v3340_v9  ;;  %3101 = vmatprep.mubr.msk.bf16.mxu1 %vm3341_vm1, %v3340_v9 }
 0x167   : > { %3060 = vmatpush3.bf16.msra.mxu0 %v3277_v36  ;;  %3100 = vmatpush3.bf16.msra.mxu1 %v3278_v37 }
 0x168   : > { %3073 = vmatprep.subr.bf16.mxu0 %v3340_v9  ;;  %3111 = vmatprep.subr.bf16.mxu1 %v3340_v9 }
 0x16a   : > { %3062 = vmatmul.mubr.msk.bf16.vlgmr.msra.gmra.mxu0 %vm672_vm0, %v3514_v23  ;;  %3102 = vmatmul.mubr.msk.bf16.vlgmr.msra.gmra.mxu1 %vm672_vm0, %v3514_v23 }
 0x16b   : > { %3074 = vmatpush3.bf16.msra.mxu0 %v3279_v38  ;;  %3077 = vmatprep.mubr.msk.bf16.mxu0 %vm3341_vm1, %v3340_v9 }
 0x16c   : > { %3075 = vmatprep.subr.bf16.mxu0 %v3340_v9  ;;  %3113 = vmatprep.mubr.msk.bf16.mxu1 %vm3341_vm1, %v3340_v9 }
 0x16f   : > { %3076 = vmatpush3.bf16.msra.mxu0 %v3280_v39 }
 0x170   : > { %3089 = vmatprep.subr.bf16.mxu0 %v3340_v9 }
 0x172   : > { %3078 = vmatmul.mubr.msk.bf16.vlgmr.msra.gmra.mxu0 %vm672_vm0, %v3514_v23 }
 0x173   : > { %3090 = vmatpush3.bf16.msra.mxu0 %v3281_v40  ;;  %3093 = vmatprep.mubr.msk.bf16.mxu0 %vm3341_vm1, %v3340_v9 }
 0x174   : > { %3091 = vmatprep.subr.bf16.mxu0 %v3340_v9 }
 0x177   : > { %3092 = vmatpush3.bf16.msra.mxu0 %v3282_v41 }
 0x178   : > { %3105 = vmatprep.subr.bf16.mxu0 %v3340_v9 }
 0x17a   : > { %3094 = vmatmul.mubr.msk.bf16.vlgmr.msra.gmra.mxu0 %vm672_vm0, %v3514_v23 }
 0x17b   : > { %3107 = vmatprep.mubr.msk.bf16.mxu0 %vm3341_vm1, %v3340_v9 }
 0x20a   : > { %v3646_v42 = vpop.f32.mrf.mxu0  ;;  %v3648_v43 = vpop.f32.mrf.mxu1 }
 0x20b   : > { %v952_v33 = vadd.f32 %v2840_v24, %v3648_v43 }
 0x20c   : > { %v3015_v44 = vpop.f32.mrf.mxu0  ;;  %v3039_v45 = vpop.f32.mrf.mxu1 }
 0x20d   : > { %v960_v41 = vpack.c.bf16 %v952_v33, %v952_v33 }
 0x20e   : > { %v798_v46 = vpop.f32.mrf.mxu0  ;;  %v954_v47 = vpop.f32.mrf.mxu1 }
 0x20f   : > { %v2837_v46 = vld [vmem:[%s3992_s6] ss:$0 sm:$0xff] }
 0x210   : > { %v3016_v48 = vpop.f32.mrf.mxu0  ;;  %v3040_v49 = vpop.f32.mrf.mxu1 }
 0x212   : > { %v847_v51 = vpop.f32.mrf.mxu0  ;;  %v1103_v52 = vpop.f32.mrf.mxu1 }
 0x213   : > { %v1104_v53 = vadd.f32 %v2854_v50, %v1103_v52  ;;  %v848_v14 = vadd.f32 %v2838_v4, %v847_v51 }
 0x214   : > { %v3023_v54 = vpop.f32.mrf.mxu0  ;;  %v3055_v55 = vpop.f32.mrf.mxu1 }
 0x215   : > { %v1214_v56 = vpack.c.bf16 %v1104_v53, %v1104_v53  ;;  %v958_v21 = vpack.c.bf16 %v848_v14, %v848_v14  ;;  %v2869_v53 = vld [vmem:[%s3994_s8] ss:$0 sm:$0xff]  ;;  %v796_v54 = vadd.f32 %v2837_v46, %v3646_v42 }
 0x216   : > { %v850_v57 = vpop.f32.mrf.mxu0  ;;  %v1106_v58 = vpop.f32.mrf.mxu1 }
 0x217   : > { %1222 = vst.msk [vmem:[#allocation2 + $0x4] sm:$0xf] %vm1220_vm3, %v1214_v56 }
 0x218   : > { %v3024_v59 = vpop.f32.mrf.mxu0  ;;  %v3056_v60 = vpop.f32.mrf.mxu1 }
 0x219   : > { %v957_v59 = vpack.c.bf16 %v796_v54, %v796_v54 }
 0x21a   : > { %v3657_v62 = vpop.f32.mrf.mxu0  ;;  %v1207_v63 = vpop.f32.mrf.mxu1 }
 0x21b   : > { %v1208_v0 = vadd.f32 %v2856_v61, %v1207_v63  ;;  %v2839_v61 = vld [vmem:[%s3992_s6 + $0x2] ss:$0 sm:$0xff] }
 0x21c   : > { %v3031_v1 = vpop.f32.mrf.mxu0  ;;  %v3071_v2 = vpop.f32.mrf.mxu1  ;;  %v900_v4 = vadd.f32 %v2839_v61, %v3657_v62 }
 0x21d   : > { %v1216_v3 = vpack.c.bf16 %v1208_v0, %v1208_v0 }
 0x21e   : > { %v902_v5 = vpop.f32.mrf.mxu0  ;;  %v1210_v6 = vpop.f32.mrf.mxu1  ;;  %v1518_v7 = vld [vmem:[#allocation2 + $0x4] sm:$0xf] }
 0x21f   : > { %1224 = vst.msk [vmem:[#allocation2 + $0xc] sm:$0xf] %vm1220_vm3, %v1216_v3  ;;  %v1571_v8 = vsel %vm1500_vm2, %v1518_v7, 0  ;;  %v1739_v40 = vld [vmem:[#allocation2 + $0x4] sm:$0xf] }
 0x220   : > { %v3032_v10 = vpop.f32.mrf.mxu0  ;;  %v3072_v11 = vpop.f32.mrf.mxu1  ;;  %3112 = vmatpush3.bf16.xpose.msra.mxu1 %v1571_v8  ;;  %v1786_v50 = vsel %vm1500_vm2, %v1739_v40, 0  ;;  %v2871_v3 = vld [vmem:[%s3994_s8 + $0x2] ss:$0 sm:$0xff] }
 0x221   : > { %3123 = vmatprep.subr.bf16.mxu1 %v3340_v9  ;;  %v959_v11 = vpack.c.bf16 %v900_v4, %v900_v4 }
 0x222   : > { %v1051_v15 = vpop.f32.mrf.mxu0  ;;  %v1367_v16 = vpop.f32.mrf.mxu1 }
 0x223   : > { %v1052_v17 = vadd.f32 %v2853_v12, %v1051_v15  ;;  %v1368_v18 = vadd.f32 %v2870_v13, %v1367_v16 }
 0x224   : > { %v3047_v19 = vpop.f32.mrf.mxu0  ;;  %v3087_v20 = vpop.f32.mrf.mxu1 }
 0x225   : > { %v1213_v22 = vpack.c.bf16 %v1052_v17, %v1052_v17  ;;  %v1478_v23 = vpack.c.bf16 %v1368_v18, %v1368_v18  ;;  %v3342_v20 = vmov -inf  }
 0x226   : > { %v1054_v25 = vpop.f32.mrf.mxu0  ;;  %v1370_v26 = vpop.f32.mrf.mxu1  ;;  %v1520_v27 = vld [vmem:[#allocation2 + $0xc] sm:$0xf]  ;;  %1492 = vst.msk [vmem:[#allocation4] sm:$0xff] %vm1491_vm5, %v3342_v20  ;;  %1493 = vst.msk [vmem:[#allocation4 + $0x8] sm:$0xff] %vm1491_vm5, %v3342_v20 }
 0x227   : > { %1221 = vst.msk [vmem:[#allocation2] sm:$0xf] %vm1220_vm3, %v1213_v22  ;;  %1484 = vst.msk [vmem:[#allocation3 + $0x4] sm:$0xf] %vm1220_vm3, %v1478_v23  ;;  %3114 = vmatmul.mubr.msk.bf16.vlgmr.msra.gmra.mxu1 %vm1500_vm2, %v958_v21  ;;  %v1663_v28 = vsel %vm1500_vm2, %v1520_v27, 0  ;;  %v1505_v27 = vlaneseq }
 0x228   : > { %v3048_v29 = vpop.f32.mrf.mxu0  ;;  %v3088_v30 = vpop.f32.mrf.mxu1  ;;  %3124 = vmatpush3.bf16.xpose.msra.mxu1 %v1663_v28  ;;  %3125 = vmatprep.mubr.msk.bf16.mxu1 %vm3341_vm1, %v3340_v9  ;;  %v1741_v58 = vld [vmem:[#allocation2 + $0xc] sm:$0xf]  ;;  %1494 = vst.msk [vmem:[#allocation4 + $0x10] sm:$0xff] %vm1491_vm5, %v3342_v20  ;;  %1495 = vst.msk [vmem:[#allocation4 + $0x18] sm:$0xff] %vm1491_vm5, %v3342_v20 }
 0x229   : > { %3135 = vmatprep.subr.bf16.mxu1 %v3340_v9  ;;  %v1872_v1 = vsel %vm1500_vm2, %v1741_v58, 0  ;;  %v1506_v30 = vshrl.u32 %v1505_v27, 7 }
 0x22a   : > { %v1155_v34 = vpop.f32.mrf.mxu0  ;;  %v1471_v35 = vpop.f32.mrf.mxu1 }
 0x22b   : > { %v1156_v36 = vadd.f32 %v2855_v31, %v1155_v34  ;;  %v1472_v37 = vadd.f32 %v2872_v32, %v1471_v35  ;;  %v1710_v31 = vand.u32 127, %v1505_v27 }
 0x22c   : > { %v3063_v38 = vpop.f32.mrf.mxu0  ;;  %v3103_v39 = vpop.f32.mrf.mxu1 }
 0x22d   : > { %v1215_v44 = vpack.c.bf16 %v1156_v36, %v1156_v36  ;;  %v1480_v45 = vpack.c.bf16 %v1472_v37, %v1472_v37  ;;  %vm3757_vm6 = vcmp.ge.s32.totalorder %v1506_v30, %v1710_v31 }
 0x22e   : > { %v1158_v47 = vpop.f32.mrf.mxu0  ;;  %v1474_v48 = vpop.f32.mrf.mxu1  ;;  %v1517_v49 = vld [vmem:[#allocation2] sm:$0xf]  ;;  %v1991_v10 = vld [vmem:[#allocation3 + $0x4] sm:$0xf] }
 0x22f   : > { %1223 = vst.msk [vmem:[#allocation2 + $0x8] sm:$0xf] %vm1220_vm3, %v1215_v44  ;;  %1486 = vst.msk [vmem:[#allocation3 + $0xc] sm:$0xf] %vm1220_vm3, %v1480_v45  ;;  %3126 = vmatmul.mubr.msk.bf16.vlgmr.msra.gmra.mxu1 %vm1500_vm2, %v960_v41  ;;  %v1525_v43 = vsel %vm1500_vm2, %v1517_v49, 0  ;;  %v2045_v14 = vsel %vm1997_vm4, %v1991_v10, 0 }
 0x230   : > { %v3064_v51 = vpop.f32.mrf.mxu0  ;;  %v3104_v52 = vpop.f32.mrf.mxu1  ;;  %3106 = vmatpush3.bf16.xpose.msra.mxu0 %v1525_v43  ;;  %3136 = vmatpush3.bf16.xpose.msra.mxu1 %v1786_v50  ;;  %v1738_v8 = vld [vmem:[#allocation2] sm:$0xf]  ;;  %v3343_v10 = vmov 0  }
 0x231   : > { %3137 = vmatprep.mubr.msk.bf16.mxu1 %vm3341_vm1, %v3340_v9  ;;  %3117 = vmatprep.subr.bf16.mxu0 %v3340_v9  ;;  %v1743_v62 = vsel %vm1500_vm2, %v1738_v8, 0  ;;  %1487 = vst.msk [vmem:[%s3787_s27] sm:$0xf] %vm1220_vm3, %v3343_v10  ;;  %1488 = vst.msk [vmem:[%s3787_s27 + $0x4] sm:$0xf] %vm1220_vm3, %v3343_v10 }
 0x232   : > { %v1315_v55 = vpop.f32.mrf.mxu0  ;;  %3147 = vmatprep.subr.bf16.mxu1 %v3340_v9  ;;  %3257 = vset.pattern.permute.xlu0 %v3343_v10  ;;  %1489 = vst.msk [vmem:[%s3787_s27 + $0x8] sm:$0xf] %vm1220_vm3, %v3343_v10  ;;  %1490 = vst.msk [vmem:[%s3787_s27 + $0xc] sm:$0xf] %vm1220_vm3, %v3343_v10 }
 0x233   : > { %v1316_v56 = vadd.f32 %v2869_v53, %v1315_v55  ;;  %3258 = vset.pattern.permute.xlu1 %v3343_v10 }
 0x234   : > { %v3079_v57 = vpop.f32.mrf.mxu0 }
 0x235   : > { %v1477_v60 = vpack.c.bf16 %v1316_v56, %v1316_v56 }
 0x236   : > { %v1318_v63 = vpop.f32.mrf.mxu0  ;;  %v1519_v0 = vld [vmem:[#allocation2 + $0x8] sm:$0xf]  ;;  %v1993_v39 = vld [vmem:[#allocation3 + $0xc] sm:$0xf] }
 0x237   : > { %1483 = vst.msk [vmem:[#allocation3] sm:$0xf] %vm1220_vm3, %v1477_v60  ;;  %3108 = vmatmul.mubr.msk.bf16.vlgmr.msra.gmra.mxu0 %vm1500_vm2, %v957_v59  ;;  %3138 = vmatmul.mubr.msk.bf16.vlgmr.msra.gmra.mxu1 %vm1500_vm2, %v958_v21  ;;  %v1617_v42 = vsel %vm1500_vm2, %v1519_v0, 0  ;;  %v1740_v16 = vld [vmem:[#allocation2 + $0x8] sm:$0xf] }
 0x238   : > { %v3080_v2 = vpop.f32.mrf.mxu0  ;;  %3118 = vmatpush3.bf16.xpose.msra.mxu0 %v1617_v42  ;;  %3148 = vmatpush3.bf16.xpose.msra.mxu1 %v1872_v1  ;;  %v1829_v17 = vsel %vm1500_vm2, %v1740_v16, 0 }
 0x239   : > { %3119 = vmatprep.mubr.msk.bf16.mxu0 %vm3341_vm1, %v3340_v9  ;;  %3149 = vmatprep.mubr.msk.bf16.mxu1 %vm3341_vm1, %v3340_v9 }
 0x23a   : > { %v1419_v5 = vpop.f32.mrf.mxu0  ;;  %3129 = vmatprep.subr.bf16.mxu0 %v3340_v9  ;;  %3159 = vmatprep.subr.bf16.mxu1 %v3340_v9 }
 0x23b   : > { %v1420_v6 = vadd.f32 %v2871_v3, %v1419_v5 }
 0x23c   : > { %v3095_v7 = vpop.f32.mrf.mxu0 }
 0x23d   : > { %v1479_v12 = vpack.c.bf16 %v1420_v6, %v1420_v6 }
 0x23e   : > { %v1422_v13 = vpop.f32.mrf.mxu0  ;;  %v1990_v18 = vld [vmem:[#allocation3] sm:$0xf] }
 0x23f   : > { %1485 = vst.msk [vmem:[#allocation3 + $0x8] sm:$0xf] %vm1220_vm3, %v1479_v12  ;;  %3120 = vmatmul.mubr.msk.bf16.vlgmr.msra.gmra.mxu0 %vm1500_vm2, %v959_v11  ;;  %3150 = vmatmul.mubr.msk.bf16.vlgmr.msra.gmra.mxu1 %vm1500_vm2, %v960_v41  ;;  %v1999_v19 = vsel %vm1997_vm4, %v1990_v18, 0  ;;  %v1514_v18 = vld [vmem:[#allocation4 + $0x8] sm:$0xff] }
 0x240   : > { %v3096_v15 = vpop.f32.mrf.mxu0  ;;  %3130 = vmatpush3.bf16.xpose.msra.mxu0 %v1743_v62  ;;  %3160 = vmatpush3.bf16.msra.mxu1 %v2045_v14 }
 0x241   : > { %3131 = vmatprep.mubr.msk.bf16.mxu0 %vm3341_vm1, %v3340_v9  ;;  %3141 = vmatprep.subr.bf16.mxu0 %v3340_v9  ;;  %v1513_v15 = vld [vmem:[#allocation4] sm:$0xff] }
 0x242   : > { %3161 = vmatprep.mubr.msk.bf16.mxu1 %vm3341_vm1, %v3340_v9  ;;  %3171 = vmatprep.subr.bf16.mxu1 %v3340_v9 }
 0x247   : > { %3132 = vmatmul.mubr.msk.bf16.vlgmr.msra.gmra.mxu0 %vm1500_vm2, %v957_v59 }
 0x248   : > { %3142 = vmatpush3.bf16.xpose.msra.mxu0 %v1829_v17  ;;  %3143 = vmatprep.mubr.msk.bf16.mxu0 %vm3341_vm1, %v3340_v9 }
 0x249   : > { %3153 = vmatprep.subr.bf16.mxu0 %v3340_v9 }
 0x24f   : > { %3144 = vmatmul.mubr.msk.bf16.vlgmr.msra.gmra.mxu0 %vm1500_vm2, %v959_v11 }
 0x250   : > { %3154 = vmatpush3.bf16.msra.mxu0 %v1999_v19  ;;  %3155 = vmatprep.mubr.msk.bf16.mxu0 %vm3341_vm1, %v3340_v9 }
 0x251   : > { %3165 = vmatprep.subr.bf16.mxu0 %v3340_v9 }
 0x2e7   : > { %v1607_v21 = vpop.f32.mrf.mxu1 }
 0x2e8   : > { %v1706_v34 = vmul.f32 0.35355338, %v1607_v21  ;;  %v1516_v21 = vld [vmem:[#allocation4 + $0x18] sm:$0xff] }
 0x2e9   : > { %v3115_v22 = vpop.f32.mrf.mxu1 }
 0x2ea   : > { %v1715_v48 = vsel %vm3757_vm6, %v1706_v34, -1e+30  ;;  %v1515_v22 = vld [vmem:[#allocation4 + $0x10] sm:$0xff] }
 0x2eb   : > { %v1610_v23 = vpop.f32.mrf.mxu1  ;;  %v1721_v52 = vsel %vm1500_vm2, %v1715_v48, -inf }
 0x2ed   : > { %v3116_v24 = vpop.f32.mrf.mxu1 }
 0x2ef   : > { %v1699_v25 = vpop.f32.mrf.mxu1 }
 0x2f0   : > { %v1708_v47 = vmul.f32 0.35355338, %v1699_v25 }
 0x2f1   : > { %v3127_v26 = vpop.f32.mrf.mxu1 }
 0x2f2   : > { %v1717_v55 = vsel %vm3757_vm6, %v1708_v47, -1e+30 }
 0x2f3   : > { %v1702_v28 = vpop.f32.mrf.mxu1  ;;  %v1727_v63 = vsel %vm1500_vm2, %v1717_v55, -inf }
 0x2f5   : > { %v3128_v29 = vpop.f32.mrf.mxu1 }
 0x2f7   : > { %v1561_v32 = vpop.f32.mrf.mxu0  ;;  %v1822_v33 = vpop.f32.mrf.mxu1 }
 0x2f8   : > { %v1705_v35 = vmul.f32 0.35355338, %v1561_v32  ;;  %v3755_v36 = vmul.f32 0.35355338, %v1822_v33 }
 0x2f9   : > { %v3109_v37 = vpop.f32.mrf.mxu0  ;;  %v3139_v38 = vpop.f32.mrf.mxu1 }
 0x2fa   : > { %v1714_v40 = vsel %vm3757_vm6, %v1705_v35, -1e+30  ;;  %v1919_v41 = vsel %vm3757_vm6, %v3755_v36, -1e+30 }
 0x2fb   : > { %v1564_v44 = vpop.f32.mrf.mxu0  ;;  %v1825_v45 = vpop.f32.mrf.mxu1  ;;  %v1718_v46 = vsel %vm1500_vm2, %v1714_v40, -inf }
 0x2fc   : > { %1719 = vmax.xlane.f32.xlu1 %v1718_v46 }
 0x2fd   : > { %v3110_v49 = vpop.f32.mrf.mxu0  ;;  %v3140_v43 = vpop.f32.mrf.mxu1 }
 0x2fe   : > { %v1992_v49 = vld [vmem:[#allocation3 + $0x8] sm:$0xf] }
 0x2ff   : > { %v1653_v50 = vpop.f32.mrf.mxu0  ;;  %v1908_v51 = vpop.f32.mrf.mxu1  ;;  %v2091_v43 = vsel %vm1997_vm4, %v1992_v49, 0 }
 0x300   : > { %v1707_v53 = vmul.f32 0.35355338, %v1653_v50  ;;  %v3770_v54 = vmul.f32 0.35355338, %v1908_v51  ;;  %1722 = vmax.xlane.f32.xlu1 %v1721_v52 }
 0x301   : > { %v3121_v56 = vpop.f32.mrf.mxu0  ;;  %v3151_v57 = vpop.f32.mrf.mxu1 }
 0x302   : > { %v1716_v58 = vsel %vm3757_vm6, %v1707_v53, -1e+30  ;;  %v1921_v59 = vsel %vm3757_vm6, %v3770_v54, -1e+30  ;;  %v2137_v53 = vsel %vm1997_vm4, %v1993_v39, 0 }
 0x303   : > { %v1656_v60 = vpop.f32.mrf.mxu0  ;;  %v1911_v61 = vpop.f32.mrf.mxu1  ;;  %v1724_v0 = vsel %vm1500_vm2, %v1716_v58, -inf }
 0x304   : > { %1728 = vmax.xlane.f32.xlu1 %v1727_v63  ;;  %1725 = vmax.xlane.f32.xlu0 %v1724_v0  ;;  %v2278_v60 = vld [vmem:[%s3995_s9] sm:$0xf] }
 0x305   : > { %v3122_v42 = vpop.f32.mrf.mxu0  ;;  %v3152_v1 = vpop.f32.mrf.mxu1  ;;  %v2287_v61 = vsel %vm1997_vm4, %v2278_v60, 0  ;;  %v1958_v63 = vld [vmem:[#allocation5] sm:$0xff] }
 0x306   : > { %v1959_v1 = vld [vmem:[#allocation5 + $0x8] sm:$0xff] }
 0x307   : > { %v1779_v2 = vpop.f32.mrf.mxu0 }
 0x308   : > { %v1914_v3 = vmul.f32 0.35355338, %v1779_v2 }
 0x309   : > { %v3133_v4 = vpop.f32.mrf.mxu0 }
 0x30a   : > { %v1918_v5 = vsel %vm3757_vm6, %v1914_v3, -1e+30  ;;  %v1960_v4 = vld [vmem:[#allocation5 + $0x10] sm:$0xff] }
 0x30b   : > { %v1782_v6 = vpop.f32.mrf.mxu0 }
 0x30d   : > { %v3134_v7 = vpop.f32.mrf.mxu0 }
 0x30e   : > { %v1961_v7 = vld [vmem:[#allocation5 + $0x18] sm:$0xff] }
 0x30f   : > { %v1865_v8 = vpop.f32.mrf.mxu0 }
 0x310   : > { %v1916_v11 = vmul.f32 0.35355338, %v1865_v8 }
 0x311   : > { %v3145_v12 = vpop.f32.mrf.mxu0 }
 0x312   : > { %v1920_v13 = vsel %vm3757_vm6, %v1916_v11, -1e+30 }
 0x313   : > { %v1868_v62 = vpop.f32.mrf.mxu0 }
 0x315   : > { %v3146_v14 = vpop.f32.mrf.mxu0 }
 0x316   : > { %v2279_v14 = vld [vmem:[%s3995_s9 + $0x4] sm:$0xf] }
 0x385   : > { %v1720_v16 = vpop.xlane.xlu1 %1719 }
 0x386   : > { %v1730_v17 = vmax.f32 %v1513_v15, %v1720_v16  ;;  %v2333_v16 = vsel %vm1997_vm4, %v2279_v14, 0 }
 0x388   : > { %1734 = vst.msk [vmem:[#allocation4] sm:$0xff] %vm1491_vm5, %v1730_v17 }
 0x389   : > { %v1723_v19 = vpop.xlane.xlu1 %1722 }
 0x38a   : > { %v1731_v20 = vmax.f32 %v1514_v18, %v1723_v19 }
 0x38c   : > { %1735 = vst.msk [vmem:[#allocation4 + $0x8] sm:$0xff] %vm1491_vm5, %v1731_v20  ;;  %v1982_v20 = vld [vmem:[#allocation6] sm:$0xff] }
 0x38d   : > { %v1729_v23 = vpop.xlane.xlu1 %1728  ;;  %v1726_v24 = vpop.xlane.xlu0 %1725 }
 0x38e   : > { %v1733_v25 = vmax.f32 %v1516_v21, %v1729_v23  ;;  %v1732_v26 = vmax.f32 %v1515_v22, %v1726_v24  ;;  %v1983_v24 = vld [vmem:[#allocation6 + $0x8] sm:$0xff] }
 0x38f   : > { %v1922_v27 = vld [vmem:[#allocation4] sm:$0xff] }
 0x390   : > { %1737 = vst.msk [vmem:[#allocation4 + $0x18] sm:$0xff] %vm1491_vm5, %v1733_v25  ;;  %1736 = vst.msk [vmem:[#allocation4 + $0x10] sm:$0xff] %vm1491_vm5, %v1732_v26  ;;  %1928 = vperm.xlu0 %3257, %v1922_v27  }
 0x393   : > { %v1923_v28 = vld [vmem:[#allocation4 + $0x8] sm:$0xff] }
 0x394   : > { %1933 = vperm.xlu1 %3258, %v1923_v28  }
 0x397   : > { %v1924_v29 = vld [vmem:[#allocation4 + $0x10] sm:$0xff]  ;;  %v1925_v30 = vld [vmem:[#allocation4 + $0x18] sm:$0xff] }
 0x398   : > { %1938 = vperm.xlu1 %3258, %v1924_v29  }
 0x39c   : > { %1943 = vperm.xlu1 %3258, %v1925_v30   ;;  %v1984_v30 = vld [vmem:[#allocation6 + $0x10] sm:$0xff] }
 0x40b   : > { %v1929_v31 = vpop.permute.xlu0 %1928 }
 0x40c   : > { %v1946_v32 = vsub.f32 %v1918_v5, %v1929_v31 }
 0x40e   : > { %v1950_v33 = vmul.f32 1.442695, %v1946_v32 }
 0x40f   : > { %v1934_v34 = vpop.permute.xlu1 %1933 }
 0x410   : > { %3295 = vpow2.f32 %v1950_v33  ;;  %v1947_v35 = vsub.f32 %v1919_v41, %v1934_v34 }
 0x412   : > { %v1952_v37 = vmul.f32 1.442695, %v1947_v35 }
 0x413   : > { %v1939_v38 = vpop.permute.xlu1 %1938 }
 0x414   : > { %3297 = vpow2.f32 %v1952_v37  ;;  %v1948_v40 = vsub.f32 %v1920_v13, %v1939_v38  ;;  %v1985_v37 = vld [vmem:[#allocation6 + $0x18] sm:$0xff] }
 0x416   : > { %v1954_v44 = vmul.f32 1.442695, %v1948_v40 }
 0x417   : > { %v1944_v45 = vpop.permute.xlu1 %1943 }
 0x418   : > { %3299 = vpow2.f32 %v1954_v44  ;;  %v1949_v46 = vsub.f32 %v1921_v59, %v1944_v45 }
 0x41a   : > { %v1956_v47 = vmul.f32 1.442695, %v1949_v46 }
 0x41c   : > { %3301 = vpow2.f32 %v1956_v47 }
 0x41d   : > { %v3296_v48 = vpop.eup %3295 }
 0x41e   : > { %v1962_v36 = vsel %vm1500_vm2, %v3296_v48, 0.0  ;;  %v1986_v41 = vpack.c.bf16 %v3296_v48, %v3296_v48 }
 0x41f   : > { %1963 = vadd.xlane.f32.xlu1 %v1962_v36 }
 0x420   : > { %3156 = vmatmul.mubr.msk.bf16.vlgmr.msra.gmra.mxu0 %vm1500_vm2, %v1986_v41  ;;  %2187 = vst.msk [vmem:[%s3787_s27] sm:$0xf] %vm1220_vm3, %v1986_v41  ;;  %v2280_v41 = vld [vmem:[%s3995_s9 + $0x8] sm:$0xf] }
 0x421   : > { %v3298_v50 = vpop.eup %3297  ;;  %3166 = vmatpush3.bf16.msra.mxu0 %v2091_v43  ;;  %3167 = vmatprep.mubr.msk.bf16.mxu0 %vm3341_vm1, %v3340_v9  ;;  %v2379_v39 = vsel %vm1997_vm4, %v2280_v41, 0  ;;  %v3283_v41 = vld [vmem:[%s3999_s13 + $0x8] sm:$0xff]  }
 0x422   : > { %v1965_v51 = vsel %vm1500_vm2, %v3298_v50, 0.0  ;;  %v1987_v52 = vpack.c.bf16 %v3298_v50, %v3298_v50  ;;  %3177 = vmatprep.subr.bf16.mxu0 %v3340_v9 }
 0x423   : > { %1966 = vadd.xlane.f32.xlu0 %v1965_v51 }
 0x424   : > { %3162 = vmatmul.mubr.msk.bf16.vlgmr.msra.gmra.mxu1 %vm1500_vm2, %v1987_v52  ;;  %2188 = vst.msk [vmem:[%s3787_s27 + $0x4] sm:$0xf] %vm1220_vm3, %v1987_v52 }
 0x425   : > { %v3300_v54 = vpop.eup %3299  ;;  %3172 = vmatpush3.bf16.msra.mxu1 %v2137_v53  ;;  %3173 = vmatprep.mubr.msk.bf16.mxu1 %vm3341_vm1, %v3340_v9  ;;  %v2281_v53 = vld [vmem:[%s3995_s9 + $0xc] sm:$0xf] }
 0x426   : > { %v1968_v55 = vsel %vm1500_vm2, %v3300_v54, 0.0  ;;  %v1988_v56 = vpack.c.bf16 %v3300_v54, %v3300_v54  ;;  %3183 = vmatprep.subr.bf16.mxu1 %v3340_v9 }
 0x427   : > { %1969 = vadd.xlane.f32.xlu1 %v1968_v55 }
 0x428   : > { %3168 = vmatmul.mubr.msk.bf16.vlgmr.msra.gmra.mxu0 %vm1500_vm2, %v1988_v56  ;;  %2189 = vst.msk [vmem:[%s3787_s27 + $0x8] sm:$0xf] %vm1220_vm3, %v1988_v56  ;;  %v2425_v56 = vsel %vm1997_vm4, %v2281_v53, 0 }
 0x429   : > { %v3302_v57 = vpop.eup %3301  ;;  %3179 = vmatprep.mubr.msk.bf16.mxu0 %vm3341_vm1, %v3340_v9  ;;  %3178 = vmatpush3.bf16.msra.mxu0 %v2287_v61 }
 0x42a   : > { %v1971_v58 = vsel %vm1500_vm2, %v3302_v57, 0.0  ;;  %v1989_v59 = vpack.c.bf16 %v3302_v57, %v3302_v57  ;;  %3189 = vmatprep.subr.bf16.mxu0 %v3340_v9 }
 0x42b   : > { %1972 = vadd.xlane.f32.xlu1 %v1971_v58 }
 0x42c   : > { %3174 = vmatmul.mubr.msk.bf16.vlgmr.msra.gmra.mxu1 %vm1500_vm2, %v1989_v59  ;;  %2190 = vst.msk [vmem:[%s3787_s27 + $0xc] sm:$0xf] %vm1220_vm3, %v1989_v59 }
 0x42d   : > { %3185 = vmatprep.mubr.msk.bf16.mxu1 %vm3341_vm1, %v3340_v9  ;;  %3184 = vmatpush3.bf16.msra.mxu1 %v2333_v16 }
 0x42e   : > { %3195 = vmatprep.subr.bf16.mxu1 %v3340_v9 }
 0x4a8   : > { %v1964_v0 = vpop.xlane.xlu1 %1963 }
 0x4a9   : > { %v1974_v42 = vadd.f32 %v1964_v0, %v1958_v63 }
 0x4ab   : > { %1978 = vst.msk [vmem:[#allocation5] sm:$0xff] %vm1491_vm5, %v1974_v42 }
 0x4ac   : > { %v1967_v2 = vpop.xlane.xlu0 %1966 }
 0x4ad   : > { %v1975_v3 = vadd.f32 %v1967_v2, %v1959_v1 }
 0x4af   : > { %1979 = vst.msk [vmem:[#allocation5 + $0x8] sm:$0xff] %vm1491_vm5, %v1975_v3 }
 0x4b0   : > { %v1970_v5 = vpop.xlane.xlu1 %1969 }
 0x4b1   : > { %v1976_v6 = vadd.f32 %v1970_v5, %v1960_v4 }
 0x4b2   : > { %v2191_v8 = vld [vmem:[#allocation5] sm:$0xff] }
 0x4b3   : > { %1980 = vst.msk [vmem:[#allocation5 + $0x10] sm:$0xff] %vm1491_vm5, %v1976_v6  ;;  %3303 = vrcp.f32 %v2191_v8 }
 0x4b4   : > { %v1973_v10 = vpop.xlane.xlu1 %1972 }
 0x4b5   : > { %v1977_v11 = vadd.f32 %v1973_v10, %v1961_v7 }
 0x4b6   : > { %v2192_v12 = vld [vmem:[#allocation5 + $0x8] sm:$0xff] }
 0x4b7   : > { %1981 = vst.msk [vmem:[#allocation5 + $0x18] sm:$0xff] %vm1491_vm5, %v1977_v11  ;;  %3305 = vrcp.f32 %v2192_v12 }
 0x4ba   : > { %v2193_v13 = vld [vmem:[#allocation5 + $0x10] sm:$0xff] }
 0x4bb   : > { %3307 = vrcp.f32 %v2193_v13 }
 0x4be   : > { %v2194_v62 = vld [vmem:[#allocation5 + $0x18] sm:$0xff] }
 0x4bf   : > { %3309 = vrcp.f32 %v2194_v62 }
 0x4c0   : > { %v3851_v15 = vpop.eup %3303 }
 0x4c1   : > { %2252 = vperm.xlu1 %3258, %v3851_v15  }
 0x4c4   : > { %v3856_v17 = vpop.eup %3305 }
 0x4c5   : > { %2257 = vperm.xlu0 %3257, %v3856_v17  }
 0x4c8   : > { %v3859_v18 = vpop.eup %3307 }
 0x4c9   : > { %2262 = vperm.xlu1 %3258, %v3859_v18  }
 0x4cc   : > { %v3862_v19 = vpop.eup %3309 }
 0x4cd   : > { %2267 = vperm.xlu1 %3258, %v3862_v19  }
 0x4e0   : > { %v2035_v21 = vpop.f32.mrf.mxu0 }
 0x4e1   : > { %v2179_v22 = vadd.f32 %v2035_v21, %v1982_v20 }
 0x4e2   : > { %v3157_v23 = vpop.f32.mrf.mxu0 }
 0x4e3   : > { %2183 = vst.msk [vmem:[#allocation6] sm:$0xff] %vm1500_vm2, %v2179_v22  ;;  %v2901_v23 = vld [vmem:[%s3996_s10] ss:$0 sm:$0xff] }
 0x4e4   : > { %v2038_v25 = vpop.f32.mrf.mxu0  ;;  %v2081_v26 = vpop.f32.mrf.mxu1 }
 0x4e5   : > { %v2180_v27 = vadd.f32 %v2081_v26, %v1983_v24 }
 0x4e6   : > { %v3158_v28 = vpop.f32.mrf.mxu0  ;;  %v3163_v29 = vpop.f32.mrf.mxu1 }
 0x4e7   : > { %2184 = vst.msk [vmem:[#allocation6 + $0x8] sm:$0xff] %vm1500_vm2, %v2180_v27 }
 0x4e8   : > { %v2084_v31 = vpop.f32.mrf.mxu1  ;;  %v2127_v32 = vpop.f32.mrf.mxu0 }
 0x4e9   : > { %v2181_v33 = vadd.f32 %v2127_v32, %v1984_v30  ;;  %v3315_v30 = vld [vmem:[%s3475_s3] sm:$0xff] }
 0x4ea   : > { %v3164_v34 = vpop.f32.mrf.mxu1  ;;  %v3169_v35 = vpop.f32.mrf.mxu0  ;;  %v2246_v36 = vld [vmem:[#allocation6] sm:$0xff] }
 0x4eb   : > { %2185 = vst.msk [vmem:[#allocation6 + $0x10] sm:$0xff] %vm1500_vm2, %v2181_v33  ;;  %v2921_v34 = vld [vmem:[%s3787_s27] sm:$0xff]  }
 0x4ec   : > { %v2130_v38 = vpop.f32.mrf.mxu0  ;;  %v2173_v40 = vpop.f32.mrf.mxu1 }
 0x4ed   : > { %v2182_v44 = vadd.f32 %v2173_v40, %v1985_v37  ;;  %v2923_v38 = vunpack.c.h.bf16 %v2921_v34 }
 0x4ee   : > { %v3170_v45 = vpop.f32.mrf.mxu0  ;;  %v3175_v46 = vpop.f32.mrf.mxu1  ;;  %v2247_v51 = vld [vmem:[#allocation6 + $0x8] sm:$0xff] }
 0x4ef   : > { %2186 = vst.msk [vmem:[#allocation6 + $0x18] sm:$0xff] %vm1500_vm2, %v2182_v44  ;;  %v2928_v44 = vld [vmem:[%s3787_s27 + $0x8] sm:$0xff]  }
 0x4f0   : > { %v2176_v47 = vpop.f32.mrf.mxu1 }
 0x4f2   : > { %v3176_v48 = vpop.f32.mrf.mxu1  ;;  %v2248_v58 = vld [vmem:[#allocation6 + $0x10] sm:$0xff] }
 0x4f6   : > { %v2249_v61 = vld [vmem:[#allocation6 + $0x18] sm:$0xff] }
 0x53c   : > { %v2253_v49 = vpop.permute.xlu1 %2252 }
 0x53d   : > { %v2270_v43 = vmul.f32 %v2253_v49, %v2246_v36  ;;  %v2926_v49 = vunpack.c.l.bf16 %v2928_v44 }
 0x53f   : > { %v2274_v50 = vpack.c.bf16 %v2270_v43, %v2270_v43  ;;  %v3284_v43 = vld [vmem:[%s3999_s13] sm:$0xff]  }
 0x540   : > { %v2258_v52 = vpop.permute.xlu0 %2257 }
 0x541   : > { %v2271_v54 = vmul.f32 %v2258_v52, %v2247_v51  ;;  %3180 = vmatmul.mubr.msk.bf16.vlgmr.msra.gmra.mxu0 %vm1500_vm2, %v2274_v50 }
 0x542   : > { %3190 = vmatpush3.bf16.msra.mxu0 %v2379_v39  ;;  %3191 = vmatprep.mubr.msk.bf16.mxu0 %vm3341_vm1, %v3340_v9 }
 0x543   : > { %v2275_v55 = vpack.c.bf16 %v2271_v54, %v2271_v54  ;;  %3201 = vmatprep.subr.bf16.mxu0 %v3340_v9  ;;  %v2927_v54 = vunpack.c.h.bf16 %v2928_v44 }
 0x544   : > { %v2263_v57 = vpop.permute.xlu1 %2262 }
 0x545   : > { %v2272_v59 = vmul.f32 %v2263_v57, %v2248_v58  ;;  %3186 = vmatmul.mubr.msk.bf16.vlgmr.msra.gmra.mxu1 %vm1500_vm2, %v2275_v55 }
 0x546   : > { %3196 = vmatpush3.bf16.msra.mxu1 %v2425_v56  ;;  %3197 = vmatprep.mubr.msk.bf16.mxu1 %vm3341_vm1, %v3340_v9 }
 0x547   : > { %v2276_v60 = vpack.c.bf16 %v2272_v59, %v2272_v59  ;;  %3209 = vmatprep.subr.bf16.mxu1 %v3340_v9  ;;  %v2902_v59 = vld [vmem:[%s3997_s11] ss:$0 sm:$0xff] }
 0x548   : > { %v2268_v63 = vpop.permute.xlu1 %2267 }
 0x549   : > { %v2273_v0 = vmul.f32 %v2268_v63, %v2249_v61  ;;  %3192 = vmatmul.mubr.msk.bf16.vlgmr.msra.gmra.mxu0 %vm1500_vm2, %v2276_v60  ;;  %v2903_v61 = vld [vmem:[%s3998_s12] ss:$0 sm:$0xff] }
 0x54a   : > { %3205 = vmatprep.mubr.msk.bf16.mxu0 %vm3341_vm1, %v3340_v9  ;;  %3202 = vmatpush3.bf16.msra.mxu0 %v3283_v41 }
 0x54b   : > { %v2277_v42 = vpack.c.bf16 %v2273_v0, %v2273_v0  ;;  %3203 = vmatprep.subr.bf16.mxu0 %v3340_v9 }
 0x54d   : > { %3198 = vmatmul.mubr.msk.bf16.vlgmr.msra.gmra.mxu1 %vm1500_vm2, %v2277_v42 }
 0x54e   : > { %3225 = vmatprep.mubr.msk.bf16.mxu1 %vm3341_vm1, %v3340_v9  ;;  %3204 = vmatpush3.bf16.msra.mxu0 %v3284_v43 }
 0x601   : > { %v2323_v1 = vpop.f32.mrf.mxu0 }
 0x602   : > { %v2467_v11 = vsel %vm672_vm0, %v2323_v1, 0.0  ;;  %v3285_v1 = vld [vmem:[%s4001_s15 + $0x38] sm:$0xff]  }
 0x603   : > { %v3181_v2 = vpop.f32.mrf.mxu0  ;;  %3210 = vmatpush3.bf16.msra.mxu1 %v3285_v1 }
 0x604   : > { %3211 = vmatprep.subr.bf16.mxu1 %v3340_v9  ;;  %v3286_v2 = vld [vmem:[%s4001_s15 + $0x30] sm:$0xff]  }
 0x605   : > { %v2326_v3 = vpop.f32.mrf.mxu0  ;;  %v2369_v4 = vpop.f32.mrf.mxu1 }
 0x606   : > { %v2468_v7 = vsel %vm672_vm0, %v2369_v4, 0.0  ;;  %v3287_v3 = vld [vmem:[%s4001_s15 + $0x28] sm:$0xff]   ;;  %v3288_v4 = vld [vmem:[%s4001_s15 + $0x20] sm:$0xff]  }
 0x607   : > { %v3182_v5 = vpop.f32.mrf.mxu0  ;;  %v3187_v6 = vpop.f32.mrf.mxu1  ;;  %v2469_v13 = vadd.f32 %v2468_v7, %v2467_v11  ;;  %3212 = vmatpush3.bf16.msra.mxu1 %v3286_v2  ;;  %v3291_v7 = vld [vmem:[%s4001_s15 + $0x8] sm:$0xff]  }
 0x608   : > { %3213 = vmatprep.subr.bf16.mxu1 %v3340_v9  ;;  %v3289_v5 = vld [vmem:[%s4001_s15 + $0x18] sm:$0xff]   ;;  %v3290_v6 = vld [vmem:[%s4001_s15 + $0x10] sm:$0xff]  }
 0x609   : > { %v2372_v8 = vpop.f32.mrf.mxu1  ;;  %v2415_v10 = vpop.f32.mrf.mxu0 }
 0x60a   : > { %v2470_v12 = vsel %vm672_vm0, %v2415_v10, 0.0  ;;  %v3292_v8 = vld [vmem:[%s4001_s15] sm:$0xff]  }
 0x60b   : > { %v3188_v62 = vpop.f32.mrf.mxu1  ;;  %v3193_v14 = vpop.f32.mrf.mxu0  ;;  %v2471_v16 = vadd.f32 %v2470_v12, %v2469_v13  ;;  %3214 = vmatpush3.bf16.msra.mxu1 %v3287_v3  ;;  %v2904_v10 = vld [vmem:[%s4000_s14] ss:$0 sm:$0xff] }
 0x60c   : > { %3215 = vmatprep.subr.bf16.mxu1 %v3340_v9 }
 0x60d   : > { %v2418_v20 = vpop.f32.mrf.mxu0  ;;  %v2461_v21 = vpop.f32.mrf.mxu1 }
 0x60e   : > { %v2472_v22 = vsel %vm672_vm0, %v2461_v21, 0.0 }
 0x60f   : > { %v2473_v24 = vadd.f32 %v2472_v22, %v2471_v16  ;;  %v3194_v25 = vpop.f32.mrf.mxu0  ;;  %v3199_v26 = vpop.f32.mrf.mxu1  ;;  %3216 = vmatpush3.bf16.msra.mxu1 %v3288_v4 }
 0x610   : > { %3217 = vmatprep.subr.bf16.mxu1 %v3340_v9 }
 0x611   : > { %v2481_v27 = vadd.f32 %v2901_v23, %v2473_v24  ;;  %v2464_v28 = vpop.f32.mrf.mxu1 }
 0x612   : > { %v2908_v28 = vld [vmem:[%s4002_s16] ss:$0 sm:$0xff] }
 0x613   : > { %v3200_v29 = vpop.f32.mrf.mxu1  ;;  %v3899_v31 = vadd.f32 %v3315_v30, %v2481_v27  ;;  %3218 = vmatpush3.bf16.msra.mxu1 %v3289_v5 }
 0x614   : > { %3219 = vmatprep.subr.bf16.mxu1 %v3340_v9 }
 0x615   : > { %v2485_v32 = vsel %vm672_vm0, %v3899_v31, 0.0 }
 0x616   : > { %2486 = vadd.xlane.f32.xlu1 %v2485_v32 }
 0x617   : > { %3220 = vmatpush3.bf16.msra.mxu1 %v3290_v6 }
 0x618   : > { %3221 = vmatprep.subr.bf16.mxu1 %v3340_v9 }
 0x61b   : > { %3222 = vmatpush3.bf16.msra.mxu1 %v3291_v7 }
 0x61c   : > { %3223 = vmatprep.subr.bf16.mxu1 %v3340_v9 }
 0x61f   : > { %3224 = vmatpush3.bf16.msra.mxu1 %v3292_v8 }
 0x627   : > { %2221 = vperm.xlu1 %3258, %v3856_v17  }
 0x62b   : > { %2226 = vperm.xlu1 %3258, %v3859_v18  }
 0x69f   : > { %v2487_v33 = vpop.xlane.xlu1 %2486 }
 0x6a0   : > { %v2488_v35 = vmul.f32 0.03125, %v2487_v33 }
 0x6a2   : > { %v2489_v37 = vsub.f32 %v3899_v31, %v2488_v35 }
 0x6a3   : > { %v2222_v40 = vpop.permute.xlu1 %2221 }
 0x6a4   : > { %v2235_v45 = vmul.f32 %v2923_v38, %v2222_v40  ;;  %v2490_v46 = vmul.f32 %v2489_v37, %v2489_v37 }
 0x6a6   : > { %v2239_v47 = vpack.c.bf16 %v2235_v45, %v2235_v45  ;;  %v2491_v48 = vsel %vm672_vm0, %v2490_v46, 0.0 }
 0x6a7   : > { %2492 = vadd.xlane.f32.xlu0 %v2491_v48  ;;  %v2227_v17 = vpop.permute.xlu1 %2226 }
 0x6a8   : > { %2243 = vst.msk [vmem:[%s3787_s27 + $0x4] sm:$0xf] %vm1220_vm3, %v2239_v47  ;;  %v2236_v18 = vmul.f32 %v2926_v49, %v2227_v17 }
 0x6aa   : > { %v2240_v36 = vpack.c.bf16 %v2236_v18, %v2236_v18 }
 0x6ac   : > { %2244 = vst.msk [vmem:[%s3787_s27 + $0x8] sm:$0xf] %vm1220_vm3, %v2240_v36 }
 0x6bd   : > { %2216 = vperm.xlu0 %3257, %v3851_v15   ;;  %v2922_v15 = vunpack.c.l.bf16 %v2921_v34 }
 0x6c1   : > { %2231 = vperm.xlu0 %3257, %v3862_v19  }
 0x730   : > { %v2493_v50 = vpop.xlane.xlu0 %2492 }
 0x731   : > { %v2494_v39 = vmul.f32 0.03125, %v2493_v50 }
 0x733   : > { %v2495_v51 = vadd.f32 1e-05, %v2494_v39 }
 0x735   : > { %3311 = vrsqrt.f32 %v2495_v51 }
 0x738   : > { %v2217_v19 = vpop.permute.xlu0 %2216 }
 0x739   : > { %v2234_v52 = vmul.f32 %v2922_v15, %v2217_v19 }
 0x73b   : > { %v2238_v53 = vpack.c.bf16 %v2234_v52, %v2234_v52 }
 0x73c   : > { %v2232_v55 = vpop.permute.xlu0 %2231 }
 0x73d   : > { %2242 = vst.msk [vmem:[%s3787_s27] sm:$0xf] %vm1220_vm3, %v2238_v53  ;;  %v2237_v56 = vmul.f32 %v2927_v54, %v2232_v55 }
 0x73f   : > { %v2241_v57 = vpack.c.bf16 %v2237_v56, %v2237_v56 }
 0x741   : > { %2245 = vst.msk [vmem:[%s3787_s27 + $0xc] sm:$0xf] %vm1220_vm3, %v2241_v57 }
 0x742   : > { %v3312_v58 = vpop.eup %3311 }
 0x743   : > { %v2497_v60 = vmul.f32 %v3312_v58, %v2489_v37 }
 0x745   : > { %v2504_v63 = vmul.f32 %v2902_v59, %v2497_v60 }
 0x747   : > { %v2511_v0 = vadd.f32 %v2903_v61, %v2504_v63 }
 0x749   : > { %v2512_v42 = vpack.c.bf16 %v2511_v0, %v2511_v0 }
 0x74b   : > { %3206 = vmatmul.mubr.msk.bf16.vlgmr.msra.gmra.mxu0 %vm672_vm0, %v2512_v42 }
 0x80b   : > { %v2573_v11 = vpop.f32.mrf.mxu0 }
 0x80c   : > { %v2574_v12 = vadd.f32 %v2904_v10, %v2573_v11 }
 0x80d   : > { %v3207_v13 = vpop.f32.mrf.mxu0 }
 0x80e   : > { %v2580_v62 = vmul.f32 0.044715, %v2574_v12  ;;  %v2579_v25 = vmul.f32 0.5, %v2574_v12 }
 0x80f   : > { %v2576_v14 = vpop.f32.mrf.mxu0 }
 0x810   : > { %v2581_v16 = vmul.f32 %v2580_v62, %v2574_v12 }
 0x811   : > { %v3208_v20 = vpop.f32.mrf.mxu0 }
 0x812   : > { %v2582_v21 = vmul.f32 %v2581_v16, %v2574_v12 }
 0x814   : > { %v2583_v22 = vadd.f32 %v2582_v21, %v2574_v12 }
 0x816   : > { %v2584_v23 = vmul.f32 0.7978846, %v2583_v22 }
 0x818   : > { %3313 = vtanh.f32 %v2584_v23 }
 0x825   : > { %v3314_v24 = vpop.eup %3313 }
 0x826   : > { %v2586_v9 = vadd.f32 1.0, %v3314_v24 }
 0x828   : > { %v2587_v26 = vmul.f32 %v2586_v9, %v2579_v25 }
 0x82a   : > { %v2588_v27 = vpack.c.bf16 %v2587_v26, %v2587_v26 }
 0x82c   : > { %3226 = vmatmul.mubr.bf16.vlgmr.msra.gmra.mxu1 %v2588_v27 }
 0x8ec   : > { %v2694_v29 = vpop.f32.mrf.mxu1 }
 0x8ed   : > { %v2695_v30 = vadd.f32 %v2908_v28, %v2694_v29 }
 0x8ee   : > { %v3227_v32 = vpop.f32.mrf.mxu1 }
 0x8ef   : > { %v2700_v33 = vadd.f32 %v2695_v30, %v3899_v31 }
 0x8f0   : > { %v2697_v34 = vpop.f32.mrf.mxu1 }
 0x8f1   : > { %2701 = vst.msk [vmem:[%s657_s4] sm:$0xff] %vm672_vm0, %v2700_v33 }
 0x8f2   : > { %v3228_v35 = vpop.f32.mrf.mxu1 }
 0x8f3 PF: > { %s31_s23 = sadd.s32 1, %s3338_s23   ;;  %s4023_s1 = smov %s3334_s22 }
 0x8f4   : > { %p28_p5 = scmp.ge.s32.totalorder %s31_s23, 4   ;;  %s4024_s22 = smov %s4026_s17 }
 0x8f6   :  { %30 = sbr.rel (!%p28_p5) target bundleno = 6 (0x6), region = 149 }

// kernel: transformer_forward.3
= control target key start
LH: loop header
LB: loop body
LE: loop exit
PB: predicated region body
PF: predicated region fallthrough
CT: control target
= control target key end

     0   :  { %s4187_s0 = inlined_call_operand.vmem [shape: f32[2,8,32], index: 0, kind: input, shape index: {}]   ;;  %s4188_s1 = inlined_call_operand.vmem [shape: f32[1,32], index: 1, kind: input, shape index: {}]   ;;  %s4189_s2 = inlined_call_operand.vmem [shape: f32[1,32], index: 2, kind: input, shape index: {}]   ;;  %s4190_s3 = inlined_call_operand.vmem [shape: bf16[4,32,8], index: 3, kind: input, shape index: {}]   ;;  %s4191_s4 = inlined_call_operand.vmem [shape: bf16[4,32,8], index: 4, kind: input, shape index: {}]   ;;  %s4192_s5 = inlined_call_operand.vmem [shape: bf16[4,32,8], index: 5, kind: input, shape index: {}]   ;;  %s4193_s6 = inlined_call_operand.vmem [shape: f32[4,1,8], index: 6, kind: input, shape index: {}]   ;;  %s4194_s7 = inlined_call_operand.vmem [shape: f32[4,1,8], index: 7, kind: input, shape index: {}]   ;;  %s4195_s8 = inlined_call_operand.vmem [shape: f32[4,1,8], index: 8, kind: input, shape index: {}]   ;;  %s4196_s9 = inlined_call_operand.vmem [shape: bf16[4,8,32], index: 9, kind: input, shape index: {}]   ;;  %s4197_s10 = inlined_call_operand.vmem [shape: f32[1,32], index: 10, kind: input, shape index: {}]   ;;  %s4198_s11 = inlined_call_operand.vmem [shape: f32[1,32], index: 11, kind: input, shape index: {}]   ;;  %s4199_s12 = inlined_call_operand.vmem [shape: f32[1,32], index: 12, kind: input, shape index: {}]   ;;  %s4200_s13 = inlined_call_operand.vmem [shape: bf16[32,128], index: 13, kind: input, shape index: {}]   ;;  %s4201_s14 = inlined_call_operand.vmem [shape: f32[1,128], index: 14, kind: input, shape index: {}]   ;;  %s4202_s15 = inlined_call_operand.vmem [shape: bf16[128,32], index: 15, kind: input, shape index: {}]   ;;  %s4203_s16 = inlined_call_operand.vmem [shape: f32[1,32], index: 16, kind: input, shape index: {}]   ;;  %s4204_s17 = inlined_call_operand.vmem [shape: f32[1,32], index: 17, kind: input, shape index: {}]   ;;  %s4205_s18 = inlined_call_operand.vmem [shape: f32[1,32], index: 18, kind: input, shape index: {}]   ;;  %s4206_s19 = inlined_call_operand.hbm [shape: f32[2,8,32], index: 19, kind: output, shape index: {0}]   ;;  %s4207_s20 = inlined_call_operand.vmem [shape: bf16[2,4,8,8], index: 20, kind: output, shape index: {1}]  }
   0x1   :  { %4218 = sst [smem:[#allocation17_spill]] %s4187_s0 }
   0x2   :  { %4219 = sst [smem:[#allocation18_spill]] %s4188_s1 }
   0x3   :  { %4220 = sst [smem:[#allocation19_spill]] %s4189_s2 }
   0x4   :  { %4221 = sst [smem:[#allocation20_spill]] %s4190_s3 }
   0x5   :  { %4222 = sst [smem:[#allocation21_spill]] %s4191_s4 }
   0x6   :  { %4223 = sst [smem:[#allocation22_spill]] %s4192_s5 }
   0x7   :  { %4224 = sst [smem:[#allocation23_spill]] %s4193_s6 }
   0x8   :  { %4225 = sst [smem:[#allocation24_spill]] %s4194_s7 }
   0x9   :  { %4226 = sst [smem:[#allocation25_spill]] %s4205_s18 }
   0xa   :  { %4227 = sst [smem:[#allocation26_spill]] %s4206_s19 }
   0xb   :  { %26 = vsyncpa [#allocation8], 0 }
   0xc   :  { %28 = vsyncpa [#allocation8 + $0x1], 0  ;;  %s3576_s1 = smov 0   ;;  %s3578_s22 = smov 0  }
   0xd   :  { %s3580_s23 = smov 0   ;;  %s3582_s24 = smov 0  }
   0xe   :  { %s3584_s2 = smov 0   ;;  %s3586_s25 = smov 0  }
   0xf LB: > { %4228 = sst [smem:[#allocation10_spill]] %s3444_s1  ;;  %s2861_s3 = sadd.s32 4294967295, %s3464_s25   ;;  %s3464_s25 = sphi %s3586_s25, %s34_s25   ;;  %s3460_s2 = sphi %s3584_s2, %s4256_s2   ;;  %s3456_s24 = sphi %s3582_s24, %s4259_s24   ;;  %s3452_s23 = sphi %s3580_s23, %s4254_s23   ;;  %s3448_s22 = sphi %s3578_s22, %s4258_s22   ;;  %s3444_s1 = sphi %s3576_s1, %s4257_s1  }
  0x10   : > { %4229 = sst [smem:[#allocation11_spill]] %s3452_s23  ;;  %s2862_s26 = sadd.s32 4294967294, %s3464_s25  }
  0x11   : > { %4230 = sst [smem:[#allocation12_spill]] %s3460_s2  ;;  %s46_s27 = sadd.s32 1, %s3460_s2 }
  0x12   : > { %4231 = sst [smem:[#allocation13_spill]] %s3464_s25  ;;  %s459_s28 = sadd.s32 1, %s3452_s23 }
  0x13   : > { %p48_p0 = scmp.ge.s32.totalorder %s46_s27, 2  ;;  %p469_p1 = scmp.ne.s32.totalorder %s3452_s23, %s3448_s22 }
  0x14   : > { %p470_p2 = scmp.eq.s32.totalorder %s2861_s3, 1  ;;  %p475_p3 = scmp.ne.s32.totalorder %s3448_s22, %s3444_s1 }
  0x15   : > { %s4261_s27 = smov (%p48_p0, %s46_s27), 0  ;;  %p476_p5 = scmp.eq.s32.totalorder %s2862_s26, 1 }
  0x16   : > { %4232 = sst [smem:[#allocation14_spill]] %s4261_s27  ;;  %p3616_p4 = por %p470_p2, %p469_p1 }
  0x17   : > { %s454_s29 = ssub.s32 %s3460_s2, %s4261_s27  ;;  %p2865_p6 = scmp.ge.s32.totalorder %s3464_s25, 1 }
  0x18   : > { %p457_p7 = scmp.eq.s32.totalorder %s454_s29, 0  ;;  %p3623_p8 = por %p476_p5, %p475_p3 }
  0x19   : > { %p583_p9 = scmp.lt.s32.totalorder %s3464_s25, 3 }
  0x1a   : > { %s4234_s30 = scalar_select %p3623_p8, 1, 0 }
  0x1b   : > { %s3629_s0 = scalar_select %p457_p7, %s3452_s23, %s459_s28  }
  0x1c   : > { %4235 = sst [smem:[#allocation15_spill]] %s4234_s30  ;;  %p584_p10 = pnand %p2865_p6, %p583_p9 }
  0x1d   : > { %4236 = sst [smem:[#allocation16_spill]] %s3629_s0  ;;  %p648_p11 = scmp.lt.s32.totalorder (!%p584_p10), %s3456_s24, 1 }
  0x1e   : > { %587 = sbr.rel (%p584_p10) target bundleno = 2630 (0xa46), region = 96  ;;  %s4237_s29 = sld [smem:[#allocation17_spill]] (!%p584_p10) }
  0x1f   : > { %s4238_s23 = sld [smem:[#allocation20_spill]] (!%p584_p10)  ;;  %s2955_s19 = sshll.u32 (!%p584_p10), %s3456_s24, 7 }
  0x20   : > { %s4240_s28 = sld [smem:[#allocation18_spill]] (!%p584_p10) }
  0x21   : > { %s4241_s26 = sld [smem:[#allocation19_spill]] (!%p584_p10) }
  0x22   : > { %s4242_s18 = sld [smem:[#allocation21_spill]] (!%p584_p10) }
  0x23   : > { %s3633_s21 = scalar_select %p648_p11, %s3456_s24, 1  ;;  %vm666_vm0 = vcmask 261120   ;;  %v3466_v9 = vmov 0.0   ;;  %vm3467_vm1 = vmmov 0   ;;  %vm1494_vm2 = vcmask 64512  }
  0x24   : > { %3048 = vmatprep.subr.bf16.mxu0 %v3466_v9  ;;  %3072 = vmatprep.subr.bf16.mxu1 %v3466_v9  ;;  %s4243_s5 = sld [smem:[#allocation22_spill]]  ;;  %1495 = vst.msk [vmem:[#allocation6] sm:$0xff] %vm1494_vm2, %v3466_v9  ;;  %1496 = vst.msk [vmem:[#allocation6 + $0x8] sm:$0xff] %vm1494_vm2, %v3466_v9  ;;  %vm1214_vm3 = vcmask 60416   ;;  %vm1991_vm4 = vcmask 1043456   ;;  %vm1485_vm5 = vcmask 7168  }
  0x25   : > { %s2867_s3 = sshll.u32 %s3633_s21, 3  ;;  %s4239_s30 = smov %s4238_s23  ;;  %v3329_v7 = vld [vmem:[%s4238_s23 + $0x8] sm:$0xff]   ;;  %3052 = vmatprep.mubr.msk.bf16.mxu0 %vm3467_vm1, %v3466_v9  ;;  %3076 = vmatprep.mubr.msk.bf16.mxu1 %vm3467_vm1, %v3466_v9  ;;  %1497 = vst.msk [vmem:[#allocation6 + $0x10] sm:$0xff] %vm1494_vm2, %v3466_v9  ;;  %1498 = vst.msk [vmem:[#allocation6 + $0x18] sm:$0xff] %vm1494_vm2, %v3466_v9 }
  0x26   : > { %s3639_s2 = scalar_lea.vmem %s4237_s29, %s2867_s3  ;;  %v3330_v8 = vld [vmem:[%s4239_s30 + $0x38] sm:$0xff]   ;;  %3049 = vmatpush3.bf16.msra.mxu0 %v3329_v7  ;;  %v3331_v10 = vld [vmem:[%s4239_s30] sm:$0xff]   ;;  %v3332_v11 = vld [vmem:[%s4239_s30 + $0x30] sm:$0xff]   ;;  %s4244_s7 = sld [smem:[#allocation24_spill]]  ;;  %1490 = vst.msk [vmem:[#allocation5] sm:$0xff] %vm1485_vm5, %v3466_v9 }
  0x27   : > { %v663_v0 = vld [vmem:[%s3639_s2] sm:$0xff]  ;;  %3073 = vmatpush3.bf16.msra.mxu1 %v3330_v8  ;;  %3050 = vmatprep.subr.bf16.mxu0 %v3466_v9  ;;  %v3333_v21 = vld [vmem:[%s4239_s30 + $0x18] sm:$0xff]   ;;  %v3335_v24 = vld [vmem:[%s4239_s30 + $0x10] sm:$0xff]   ;;  %s4245_s6 = sld [smem:[#allocation23_spill]]  ;;  %1491 = vst.msk [vmem:[#allocation5 + $0x8] sm:$0xff] %vm1485_vm5, %v3466_v9  ;;  %s2958_s1 = sshll.u32 %s3633_s21, 4 }
  0x28   : > { %v667_v1 = vsel %vm666_vm0, %v663_v0, 0.0  ;;  %3074 = vmatprep.subr.bf16.mxu1 %v3466_v9  ;;  %v2870_v16 = vld [vmem:[%s4240_s28] ss:$0 sm:$0xff]  ;;  %v3334_v22 = vld [vmem:[%s4242_s18 + $0x18] sm:$0xff]   ;;  %v3336_v25 = vld [vmem:[%s4242_s18 + $0x10] sm:$0xff]   ;;  %1492 = vst.msk [vmem:[#allocation5 + $0x10] sm:$0xff] %vm1485_vm5, %v3466_v9  ;;  %s3951_s27 = scalar_lea.vmem %s4207_s20, %s2958_s1 }
  0x29   : > { %668 = vadd.xlane.f32.xlu0 %v667_v1  ;;  %v2871_v18 = vld [vmem:[%s4241_s26] ss:$0 sm:$0xff]  ;;  %v3337_v26 = vld [vmem:[%s4239_s30 + $0x28] sm:$0xff]   ;;  %v3338_v27 = vld [vmem:[%s4242_s18 + $0x38] sm:$0xff]   ;;  %1493 = vst.msk [vmem:[#allocation5 + $0x18] sm:$0xff] %vm1485_vm5, %v3466_v9  ;;  %s635_s23 = sand.u32 1, %s3448_s22  }
  0x2a   : > { %3051 = vmatpush3.bf16.msra.mxu0 %v3331_v10  ;;  %v3339_v28 = vld [vmem:[%s4239_s30 + $0x20] sm:$0xff]   ;;  %v3340_v29 = vld [vmem:[%s4242_s18 + $0x30] sm:$0xff]   ;;  %v3341_v30 = vld [vmem:[%s4242_s18 + $0x8] sm:$0xff]   ;;  %s2866_s0 = sshll.u32 %s635_s23, 3  ;;  %s4248_s21 = sld [smem:[#allocation25_spill]] }
  0x2b   : > { %3075 = vmatpush3.bf16.msra.mxu1 %v3332_v11  ;;  %3056 = vmatprep.subr.bf16.mxu0 %v3466_v9  ;;  %v3342_v31 = vld [vmem:[%s4243_s5 + $0x18] sm:$0xff]   ;;  %v3343_v32 = vld [vmem:[%s4242_s18] sm:$0xff]   ;;  %v3344_v33 = vld [vmem:[%s4243_s5 + $0x10] sm:$0xff]   ;;  %s637_s25 = scalar_lea.vmem [#allocation7], %s2866_s0  ;;  %s3470_s29 = smov [#allocation7]  }
  0x2c   : > { %3088 = vmatprep.subr.bf16.mxu1 %v3466_v9  ;;  %v3345_v34 = vld [vmem:[%s4242_s18 + $0x28] sm:$0xff]   ;;  %v3346_v35 = vld [vmem:[%s4243_s5 + $0x38] sm:$0xff]   ;;  %v3347_v36 = vld [vmem:[%s4242_s18 + $0x20] sm:$0xff]   ;;  %s2748_s3 = sshll.u32 %s637_s25, 4  ;;  %s3392_s28 = sshll.u32 %s3470_s29, 4  ;;  %s2749_s3 = int_to_ptr.vmem [resolvable:$true] %s2748_s3  ;;  %s3393_s28 = int_to_ptr.vmem [resolvable:$false] %s3392_s28 }
  0x2d   : > { %v3348_v37 = vld [vmem:[%s4243_s5 + $0x30] sm:$0xff]   ;;  %v3349_v38 = vld [vmem:[%s4243_s5 + $0x8] sm:$0xff]   ;;  %v3350_v39 = vld [vmem:[%s4243_s5] sm:$0xff]   ;;  %s3388_s1 = scalar_lea.vmem %s2749_s3, 128  ;;  %s3394_s24 = scalar_lea.vmem %s3393_s28, 256 }
  0x2e   : > { %v3351_v40 = vld [vmem:[%s4243_s5 + $0x28] sm:$0xff]   ;;  %v3352_v41 = vld [vmem:[%s4243_s5 + $0x20] sm:$0xff]   ;;  %s4249_s5 = sld [smem:[#allocation26_spill]]  ;;  %p3389_p12 = scmp.ne.s32.totalorder %s2749_s3, %s3388_s1 }
  0x2f   : > { %v2889_v50 = vld [vmem:[%s4244_s7 + $0x1] ss:$0 sm:$0xff]  ;;  %v2891_v61 = vld [vmem:[%s4244_s7 + $0x3] ss:$0 sm:$0xff]  ;;  %p3395_p1 = scmp.lt.s32.totalorder %s2749_s3, %s3393_s28  ;;  %p3396_p2 = scmp.lt.s32.totalorder %s3394_s24, %s3388_s1 }
  0x30   : > { %p3390_p13 = pnand %p3389_p12, %p3616_p4 }
  0x31   : > { %p3397_p3 = por %p3396_p2, %p3395_p1 }
  0x32   : > { %p3391_p0 = pneg %p3390_p13 }
  0x34   : > { %p3398_p5 = pnand %p3397_p3, %p3391_p0 }
  0xb2   : > { %v669_v2 = vpop.xlane.xlu0 %668 }
  0xb3   : > { %v671_v3 = vmul.f32 0.03125, %v669_v2 }
  0xb5   : > { %v672_v4 = vsub.f32 %v663_v0, %v671_v3 }
  0xb7   : > { %v673_v5 = vmul.f32 %v672_v4, %v672_v4 }
  0xb9   : > { %v674_v6 = vsel %vm666_vm0, %v673_v5, 0.0 }
  0xba   : > { %675 = vadd.xlane.f32.xlu0 %v674_v6 }
 0x143   : > { %v676_v12 = vpop.xlane.xlu0 %675 }
 0x144   : > { %v677_v13 = vmul.f32 0.03125, %v676_v12  ;;  %v2888_v12 = vld [vmem:[%s4244_s7] ss:$0 sm:$0xff] }
 0x146   : > { %v678_v14 = vadd.f32 1e-05, %v677_v13  ;;  %v2905_v13 = vld [vmem:[%s4195_s8 + $0x1] ss:$0 sm:$0xff] }
 0x148   : > { %3363 = vrsqrt.f32 %v678_v14 }
 0x155   : > { %v3364_v15 = vpop.eup %3363 }
 0x156   : > { %v680_v17 = vmul.f32 %v3364_v15, %v672_v4  ;;  %v2873_v4 = vld [vmem:[%s4245_s6 + $0x1] ss:$0 sm:$0xff] }
 0x158   : > { %v687_v19 = vmul.f32 %v2870_v16, %v680_v17 }
 0x15a   : > { %v694_v20 = vadd.f32 %v2871_v18, %v687_v19 }
 0x15c   : > { %v3678_v23 = vpack.c.bf16 %v694_v20, %v694_v20 }
 0x15e   : > { %3053 = vmatmul.mubr.msk.bf16.vlgmr.msra.gmra.mxu0 %vm666_vm0, %v3678_v23  ;;  %3077 = vmatmul.mubr.msk.bf16.vlgmr.msra.gmra.mxu1 %vm666_vm0, %v3678_v23 }
 0x15f   : > { %3057 = vmatpush3.bf16.msra.mxu0 %v3333_v21  ;;  %3089 = vmatpush3.bf16.msra.mxu1 %v3334_v22 }
 0x160   : > { %3058 = vmatprep.subr.bf16.mxu0 %v3466_v9  ;;  %3090 = vmatprep.subr.bf16.mxu1 %v3466_v9 }
 0x161   : > { %3060 = vmatprep.mubr.msk.bf16.mxu0 %vm3467_vm1, %v3466_v9  ;;  %3092 = vmatprep.mubr.msk.bf16.mxu1 %vm3467_vm1, %v3466_v9 }
 0x163   : > { %3059 = vmatpush3.bf16.msra.mxu0 %v3335_v24  ;;  %3091 = vmatpush3.bf16.msra.mxu1 %v3336_v25  ;;  %v2875_v24 = vld [vmem:[%s4245_s6 + $0x3] ss:$0 sm:$0xff] }
 0x164   : > { %3064 = vmatprep.subr.bf16.mxu0 %v3466_v9  ;;  %3104 = vmatprep.subr.bf16.mxu1 %v3466_v9 }
 0x166   : > { %3061 = vmatmul.mubr.msk.bf16.vlgmr.msra.gmra.mxu0 %vm666_vm0, %v3678_v23  ;;  %3093 = vmatmul.mubr.msk.bf16.vlgmr.msra.gmra.mxu1 %vm666_vm0, %v3678_v23 }
 0x167   : > { %3065 = vmatpush3.bf16.msra.mxu0 %v3337_v26  ;;  %3105 = vmatpush3.bf16.msra.mxu1 %v3338_v27 }
 0x168   : > { %3066 = vmatprep.subr.bf16.mxu0 %v3466_v9  ;;  %3106 = vmatprep.subr.bf16.mxu1 %v3466_v9 }
 0x169   : > { %3068 = vmatprep.mubr.msk.bf16.mxu0 %vm3467_vm1, %v3466_v9  ;;  %3108 = vmatprep.mubr.msk.bf16.mxu1 %vm3467_vm1, %v3466_v9 }
 0x16b   : > { %3067 = vmatpush3.bf16.msra.mxu0 %v3339_v28  ;;  %3107 = vmatpush3.bf16.msra.mxu1 %v3340_v29 }
 0x16c   : > { %3080 = vmatprep.subr.bf16.mxu0 %v3466_v9  ;;  %3120 = vmatprep.subr.bf16.mxu1 %v3466_v9 }
 0x16e   : > { %3069 = vmatmul.mubr.msk.bf16.vlgmr.msra.gmra.mxu0 %vm666_vm0, %v3678_v23  ;;  %3109 = vmatmul.mubr.msk.bf16.vlgmr.msra.gmra.mxu1 %vm666_vm0, %v3678_v23 }
 0x16f   : > { %3081 = vmatpush3.bf16.msra.mxu0 %v3341_v30  ;;  %3121 = vmatpush3.bf16.msra.mxu1 %v3342_v31  ;;  %v2890_v31 = vld [vmem:[%s4244_s7 + $0x2] ss:$0 sm:$0xff]  ;;  %s2726_s7 = scalar_lea.sflag [#allocation8], %s635_s23 }
 0x170   : > { %3082 = vmatprep.subr.bf16.mxu0 %v3466_v9  ;;  %3122 = vmatprep.subr.bf16.mxu1 %v3466_v9 }
 0x171   : > { %3084 = vmatprep.mubr.msk.bf16.mxu0 %vm3467_vm1, %v3466_v9  ;;  %3124 = vmatprep.mubr.msk.bf16.mxu1 %vm3467_vm1, %v3466_v9 }
 0x173   : > { %3083 = vmatpush3.bf16.msra.mxu0 %v3343_v32  ;;  %3123 = vmatpush3.bf16.msra.mxu1 %v3344_v33  ;;  %v2907_v32 = vld [vmem:[%s4195_s8 + $0x3] ss:$0 sm:$0xff] }
 0x174   : > { %3096 = vmatprep.subr.bf16.mxu0 %v3466_v9  ;;  %3136 = vmatprep.subr.bf16.mxu1 %v3466_v9 }
 0x176   : > { %3085 = vmatmul.mubr.msk.bf16.vlgmr.msra.gmra.mxu0 %vm666_vm0, %v3678_v23  ;;  %3125 = vmatmul.mubr.msk.bf16.vlgmr.msra.gmra.mxu1 %vm666_vm0, %v3678_v23 }
 0x177   : > { %3097 = vmatpush3.bf16.msra.mxu0 %v3345_v34  ;;  %3137 = vmatpush3.bf16.msra.mxu1 %v3346_v35 }
 0x178   : > { %3098 = vmatprep.subr.bf16.mxu0 %v3466_v9  ;;  %3138 = vmatprep.subr.bf16.mxu1 %v3466_v9 }
 0x179   : > { %3100 = vmatprep.mubr.msk.bf16.mxu0 %vm3467_vm1, %v3466_v9  ;;  %3140 = vmatprep.mubr.msk.bf16.mxu1 %vm3467_vm1, %v3466_v9 }
 0x17b   : > { %3099 = vmatpush3.bf16.msra.mxu0 %v3347_v36  ;;  %3139 = vmatpush3.bf16.msra.mxu1 %v3348_v37 }
 0x17c   : > { %3112 = vmatprep.subr.bf16.mxu0 %v3466_v9  ;;  %3150 = vmatprep.subr.bf16.mxu1 %v3466_v9 }
 0x17e   : > { %3101 = vmatmul.mubr.msk.bf16.vlgmr.msra.gmra.mxu0 %vm666_vm0, %v3678_v23  ;;  %3141 = vmatmul.mubr.msk.bf16.vlgmr.msra.gmra.mxu1 %vm666_vm0, %v3678_v23 }
 0x17f   : > { %3113 = vmatpush3.bf16.msra.mxu0 %v3349_v38  ;;  %3116 = vmatprep.mubr.msk.bf16.mxu0 %vm3467_vm1, %v3466_v9 }
 0x180   : > { %3114 = vmatprep.subr.bf16.mxu0 %v3466_v9  ;;  %3152 = vmatprep.mubr.msk.bf16.mxu1 %vm3467_vm1, %v3466_v9 }
 0x183   : > { %3115 = vmatpush3.bf16.msra.mxu0 %v3350_v39 }
 0x184   : > { %3128 = vmatprep.subr.bf16.mxu0 %v3466_v9 }
 0x186   : > { %3117 = vmatmul.mubr.msk.bf16.vlgmr.msra.gmra.mxu0 %vm666_vm0, %v3678_v23 }
 0x187   : > { %3129 = vmatpush3.bf16.msra.mxu0 %v3351_v40  ;;  %3132 = vmatprep.mubr.msk.bf16.mxu0 %vm3467_vm1, %v3466_v9 }
 0x188   : > { %3130 = vmatprep.subr.bf16.mxu0 %v3466_v9 }
 0x18b   : > { %3131 = vmatpush3.bf16.msra.mxu0 %v3352_v41 }
 0x18c   : > { %3144 = vmatprep.subr.bf16.mxu0 %v3466_v9 }
 0x18e   : > { %3133 = vmatmul.mubr.msk.bf16.vlgmr.msra.gmra.mxu0 %vm666_vm0, %v3678_v23 }
 0x18f   : > { %3146 = vmatprep.mubr.msk.bf16.mxu0 %vm3467_vm1, %v3466_v9 }
 0x21e   : > { %v3810_v42 = vpop.f32.mrf.mxu0  ;;  %v3812_v43 = vpop.f32.mrf.mxu1 }
 0x21f   : > { %v946_v33 = vadd.f32 %v2875_v24, %v3812_v43 }
 0x220   : > { %v3054_v44 = vpop.f32.mrf.mxu0  ;;  %v3078_v45 = vpop.f32.mrf.mxu1 }
 0x221   : > { %v954_v41 = vpack.c.bf16 %v946_v33, %v946_v33 }
 0x222   : > { %v792_v46 = vpop.f32.mrf.mxu0  ;;  %v948_v47 = vpop.f32.mrf.mxu1 }
 0x223   : > { %v2872_v46 = vld [vmem:[%s4245_s6] ss:$0 sm:$0xff] }
 0x224   : > { %v3055_v48 = vpop.f32.mrf.mxu0  ;;  %v3079_v49 = vpop.f32.mrf.mxu1 }
 0x226   : > { %v841_v51 = vpop.f32.mrf.mxu0  ;;  %v1097_v52 = vpop.f32.mrf.mxu1 }
 0x227   : > { %v1098_v53 = vadd.f32 %v2889_v50, %v1097_v52  ;;  %v842_v14 = vadd.f32 %v2873_v4, %v841_v51 }
 0x228   : > { %v3062_v54 = vpop.f32.mrf.mxu0  ;;  %v3094_v55 = vpop.f32.mrf.mxu1 }
 0x229   : > { %v1208_v56 = vpack.c.bf16 %v1098_v53, %v1098_v53  ;;  %v952_v21 = vpack.c.bf16 %v842_v14, %v842_v14  ;;  %v2904_v53 = vld [vmem:[%s4195_s8] ss:$0 sm:$0xff]  ;;  %v790_v54 = vadd.f32 %v2872_v46, %v3810_v42 }
 0x22a   : > { %v844_v57 = vpop.f32.mrf.mxu0  ;;  %v1100_v58 = vpop.f32.mrf.mxu1 }
 0x22b   : > { %1216 = vst.msk [vmem:[#allocation2 + $0x4] sm:$0xf] %vm1214_vm3, %v1208_v56 }
 0x22c   : > { %v3063_v59 = vpop.f32.mrf.mxu0  ;;  %v3095_v60 = vpop.f32.mrf.mxu1 }
 0x22d   : > { %v951_v59 = vpack.c.bf16 %v790_v54, %v790_v54 }
 0x22e   : > { %v3821_v62 = vpop.f32.mrf.mxu0  ;;  %v1201_v63 = vpop.f32.mrf.mxu1 }
 0x22f   : > { %v1202_v0 = vadd.f32 %v2891_v61, %v1201_v63  ;;  %v2874_v61 = vld [vmem:[%s4245_s6 + $0x2] ss:$0 sm:$0xff]  ;;  %s2746_s6 = scalar_lea.hbm %s4249_s5, %s2955_s19 }
 0x230   : > { %v3070_v1 = vpop.f32.mrf.mxu0  ;;  %v3110_v2 = vpop.f32.mrf.mxu1  ;;  %v894_v4 = vadd.f32 %v2874_v61, %v3821_v62 }
 0x231   : > { %v1210_v3 = vpack.c.bf16 %v1202_v0, %v1202_v0 }
 0x232   : > { %v896_v5 = vpop.f32.mrf.mxu0  ;;  %v1204_v6 = vpop.f32.mrf.mxu1  ;;  %v1512_v7 = vld [vmem:[#allocation2 + $0x4] sm:$0xf] }
 0x233   : > { %1218 = vst.msk [vmem:[#allocation2 + $0xc] sm:$0xf] %vm1214_vm3, %v1210_v3  ;;  %v1565_v8 = vsel %vm1494_vm2, %v1512_v7, 0  ;;  %v1733_v40 = vld [vmem:[#allocation2 + $0x4] sm:$0xf] }
 0x234   : > { %v3071_v10 = vpop.f32.mrf.mxu0  ;;  %v3111_v11 = vpop.f32.mrf.mxu1  ;;  %3151 = vmatpush3.bf16.xpose.msra.mxu1 %v1565_v8  ;;  %v1780_v50 = vsel %vm1494_vm2, %v1733_v40, 0  ;;  %v2906_v3 = vld [vmem:[%s4195_s8 + $0x2] ss:$0 sm:$0xff] }
 0x235   : > { %3162 = vmatprep.subr.bf16.mxu1 %v3466_v9  ;;  %v953_v11 = vpack.c.bf16 %v894_v4, %v894_v4 }
 0x236   : > { %v1045_v15 = vpop.f32.mrf.mxu0  ;;  %v1361_v16 = vpop.f32.mrf.mxu1 }
 0x237   : > { %v1046_v17 = vadd.f32 %v2888_v12, %v1045_v15  ;;  %v1362_v18 = vadd.f32 %v2905_v13, %v1361_v16 }
 0x238   : > { %v3086_v19 = vpop.f32.mrf.mxu0  ;;  %v3126_v20 = vpop.f32.mrf.mxu1 }
 0x239   : > { %v1207_v22 = vpack.c.bf16 %v1046_v17, %v1046_v17  ;;  %v1472_v23 = vpack.c.bf16 %v1362_v18, %v1362_v18  ;;  %v3468_v20 = vmov -inf  }
 0x23a   : > { %v1048_v25 = vpop.f32.mrf.mxu0  ;;  %v1364_v26 = vpop.f32.mrf.mxu1  ;;  %v1514_v27 = vld [vmem:[#allocation2 + $0xc] sm:$0xf]  ;;  %1486 = vst.msk [vmem:[#allocation4] sm:$0xff] %vm1485_vm5, %v3468_v20  ;;  %1487 = vst.msk [vmem:[#allocation4 + $0x8] sm:$0xff] %vm1485_vm5, %v3468_v20 }
 0x23b   : > { %1215 = vst.msk [vmem:[#allocation2] sm:$0xf] %vm1214_vm3, %v1207_v22  ;;  %1478 = vst.msk [vmem:[#allocation3 + $0x4] sm:$0xf] %vm1214_vm3, %v1472_v23  ;;  %3153 = vmatmul.mubr.msk.bf16.vlgmr.msra.gmra.mxu1 %vm1494_vm2, %v952_v21  ;;  %v1657_v28 = vsel %vm1494_vm2, %v1514_v27, 0  ;;  %v1499_v27 = vlaneseq }
 0x23c   : > { %v3087_v29 = vpop.f32.mrf.mxu0  ;;  %v3127_v30 = vpop.f32.mrf.mxu1  ;;  %3163 = vmatpush3.bf16.xpose.msra.mxu1 %v1657_v28  ;;  %3164 = vmatprep.mubr.msk.bf16.mxu1 %vm3467_vm1, %v3466_v9  ;;  %v1735_v58 = vld [vmem:[#allocation2 + $0xc] sm:$0xf]  ;;  %1488 = vst.msk [vmem:[#allocation4 + $0x10] sm:$0xff] %vm1485_vm5, %v3468_v20  ;;  %1489 = vst.msk [vmem:[#allocation4 + $0x18] sm:$0xff] %vm1485_vm5, %v3468_v20 }
 0x23d   : > { %3174 = vmatprep.subr.bf16.mxu1 %v3466_v9  ;;  %v1866_v1 = vsel %vm1494_vm2, %v1735_v58, 0  ;;  %v1500_v30 = vshrl.u32 %v1499_v27, 7 }
 0x23e   : > { %v1149_v34 = vpop.f32.mrf.mxu0  ;;  %v1465_v35 = vpop.f32.mrf.mxu1 }
 0x23f   : > { %v1150_v36 = vadd.f32 %v2890_v31, %v1149_v34  ;;  %v1466_v37 = vadd.f32 %v2907_v32, %v1465_v35  ;;  %v1704_v31 = vand.u32 127, %v1499_v27 }
 0x240   : > { %v3102_v38 = vpop.f32.mrf.mxu0  ;;  %v3142_v39 = vpop.f32.mrf.mxu1 }
 0x241   : > { %v1209_v44 = vpack.c.bf16 %v1150_v36, %v1150_v36  ;;  %v1474_v45 = vpack.c.bf16 %v1466_v37, %v1466_v37  ;;  %vm3921_vm6 = vcmp.ge.s32.totalorder %v1500_v30, %v1704_v31 }
 0x242   : > { %v1152_v47 = vpop.f32.mrf.mxu0  ;;  %v1468_v48 = vpop.f32.mrf.mxu1  ;;  %v1511_v49 = vld [vmem:[#allocation2] sm:$0xf]  ;;  %v1985_v10 = vld [vmem:[#allocation3 + $0x4] sm:$0xf] }
 0x243   : > { %1217 = vst.msk [vmem:[#allocation2 + $0x8] sm:$0xf] %vm1214_vm3, %v1209_v44  ;;  %1480 = vst.msk [vmem:[#allocation3 + $0xc] sm:$0xf] %vm1214_vm3, %v1474_v45  ;;  %3165 = vmatmul.mubr.msk.bf16.vlgmr.msra.gmra.mxu1 %vm1494_vm2, %v954_v41  ;;  %v1519_v43 = vsel %vm1494_vm2, %v1511_v49, 0  ;;  %v2039_v14 = vsel %vm1991_vm4, %v1985_v10, 0 }
 0x244   : > { %v3103_v51 = vpop.f32.mrf.mxu0  ;;  %v3143_v52 = vpop.f32.mrf.mxu1  ;;  %3145 = vmatpush3.bf16.xpose.msra.mxu0 %v1519_v43  ;;  %3175 = vmatpush3.bf16.xpose.msra.mxu1 %v1780_v50  ;;  %v1732_v8 = vld [vmem:[#allocation2] sm:$0xf]  ;;  %v3469_v10 = vmov 0  }
 0x245   : > { %3176 = vmatprep.mubr.msk.bf16.mxu1 %vm3467_vm1, %v3466_v9  ;;  %3156 = vmatprep.subr.bf16.mxu0 %v3466_v9  ;;  %v1737_v62 = vsel %vm1494_vm2, %v1732_v8, 0  ;;  %1481 = vst.msk [vmem:[%s3951_s27] sm:$0xf] %vm1214_vm3, %v3469_v10  ;;  %1482 = vst.msk [vmem:[%s3951_s27 + $0x4] sm:$0xf] %vm1214_vm3, %v3469_v10 }
 0x246   : > { %v1309_v55 = vpop.f32.mrf.mxu0  ;;  %3186 = vmatprep.subr.bf16.mxu1 %v3466_v9  ;;  %3327 = vset.pattern.permute.xlu0 %v3469_v10  ;;  %1483 = vst.msk [vmem:[%s3951_s27 + $0x8] sm:$0xf] %vm1214_vm3, %v3469_v10  ;;  %1484 = vst.msk [vmem:[%s3951_s27 + $0xc] sm:$0xf] %vm1214_vm3, %v3469_v10 }
 0x247   : > { %v1310_v56 = vadd.f32 %v2904_v53, %v1309_v55  ;;  %3328 = vset.pattern.permute.xlu1 %v3469_v10 }
 0x248   : > { %v3118_v57 = vpop.f32.mrf.mxu0 }
 0x249   : > { %v1471_v60 = vpack.c.bf16 %v1310_v56, %v1310_v56 }
 0x24a   : > { %v1312_v63 = vpop.f32.mrf.mxu0  ;;  %v1513_v0 = vld [vmem:[#allocation2 + $0x8] sm:$0xf]  ;;  %v1987_v39 = vld [vmem:[#allocation3 + $0xc] sm:$0xf] }
 0x24b   : > { %1477 = vst.msk [vmem:[#allocation3] sm:$0xf] %vm1214_vm3, %v1471_v60  ;;  %3147 = vmatmul.mubr.msk.bf16.vlgmr.msra.gmra.mxu0 %vm1494_vm2, %v951_v59  ;;  %3177 = vmatmul.mubr.msk.bf16.vlgmr.msra.gmra.mxu1 %vm1494_vm2, %v952_v21  ;;  %v1611_v42 = vsel %vm1494_vm2, %v1513_v0, 0  ;;  %v1734_v16 = vld [vmem:[#allocation2 + $0x8] sm:$0xf] }
 0x24c   : > { %v3119_v2 = vpop.f32.mrf.mxu0  ;;  %3157 = vmatpush3.bf16.xpose.msra.mxu0 %v1611_v42  ;;  %3187 = vmatpush3.bf16.xpose.msra.mxu1 %v1866_v1  ;;  %v1823_v17 = vsel %vm1494_vm2, %v1734_v16, 0 }
 0x24d   : > { %3158 = vmatprep.mubr.msk.bf16.mxu0 %vm3467_vm1, %v3466_v9  ;;  %3188 = vmatprep.mubr.msk.bf16.mxu1 %vm3467_vm1, %v3466_v9 }
 0x24e   : > { %v1413_v5 = vpop.f32.mrf.mxu0  ;;  %3168 = vmatprep.subr.bf16.mxu0 %v3466_v9  ;;  %3198 = vmatprep.subr.bf16.mxu1 %v3466_v9 }
 0x24f   : > { %v1414_v6 = vadd.f32 %v2906_v3, %v1413_v5 }
 0x250   : > { %v3134_v7 = vpop.f32.mrf.mxu0 }
 0x251   : > { %v1473_v12 = vpack.c.bf16 %v1414_v6, %v1414_v6 }
 0x252   : > { %v1416_v13 = vpop.f32.mrf.mxu0  ;;  %v1984_v18 = vld [vmem:[#allocation3] sm:$0xf] }
 0x253   : > { %1479 = vst.msk [vmem:[#allocation3 + $0x8] sm:$0xf] %vm1214_vm3, %v1473_v12  ;;  %3159 = vmatmul.mubr.msk.bf16.vlgmr.msra.gmra.mxu0 %vm1494_vm2, %v953_v11  ;;  %3189 = vmatmul.mubr.msk.bf16.vlgmr.msra.gmra.mxu1 %vm1494_vm2, %v954_v41  ;;  %v1993_v19 = vsel %vm1991_vm4, %v1984_v18, 0  ;;  %v1508_v18 = vld [vmem:[#allocation4 + $0x8] sm:$0xff] }
 0x254   : > { %v3135_v15 = vpop.f32.mrf.mxu0  ;;  %3169 = vmatpush3.bf16.xpose.msra.mxu0 %v1737_v62  ;;  %3199 = vmatpush3.bf16.msra.mxu1 %v2039_v14 }
 0x255   : > { %3170 = vmatprep.mubr.msk.bf16.mxu0 %vm3467_vm1, %v3466_v9  ;;  %3180 = vmatprep.subr.bf16.mxu0 %v3466_v9  ;;  %v1507_v15 = vld [vmem:[#allocation4] sm:$0xff] }
 0x256   : > { %3200 = vmatprep.mubr.msk.bf16.mxu1 %vm3467_vm1, %v3466_v9  ;;  %3210 = vmatprep.subr.bf16.mxu1 %v3466_v9 }
 0x25b   : > { %3171 = vmatmul.mubr.msk.bf16.vlgmr.msra.gmra.mxu0 %vm1494_vm2, %v951_v59 }
 0x25c   : > { %3181 = vmatpush3.bf16.xpose.msra.mxu0 %v1823_v17  ;;  %3182 = vmatprep.mubr.msk.bf16.mxu0 %vm3467_vm1, %v3466_v9 }
 0x25d   : > { %3192 = vmatprep.subr.bf16.mxu0 %v3466_v9 }
 0x263   : > { %3183 = vmatmul.mubr.msk.bf16.vlgmr.msra.gmra.mxu0 %vm1494_vm2, %v953_v11 }
 0x264   : > { %3193 = vmatpush3.bf16.msra.mxu0 %v1993_v19  ;;  %3194 = vmatprep.mubr.msk.bf16.mxu0 %vm3467_vm1, %v3466_v9 }
 0x265   : > { %3204 = vmatprep.subr.bf16.mxu0 %v3466_v9 }
 0x2fb   : > { %v1601_v21 = vpop.f32.mrf.mxu1 }
 0x2fc   : > { %v1700_v34 = vmul.f32 0.35355338, %v1601_v21  ;;  %v1510_v21 = vld [vmem:[#allocation4 + $0x18] sm:$0xff] }
 0x2fd   : > { %v3154_v22 = vpop.f32.mrf.mxu1 }
 0x2fe   : > { %v1709_v48 = vsel %vm3921_vm6, %v1700_v34, -1e+30  ;;  %v1509_v22 = vld [vmem:[#allocation4 + $0x10] sm:$0xff] }
 0x2ff   : > { %v1604_v23 = vpop.f32.mrf.mxu1  ;;  %v1715_v52 = vsel %vm1494_vm2, %v1709_v48, -inf }
 0x301   : > { %v3155_v24 = vpop.f32.mrf.mxu1 }
 0x303   : > { %v1693_v25 = vpop.f32.mrf.mxu1 }
 0x304   : > { %v1702_v47 = vmul.f32 0.35355338, %v1693_v25 }
 0x305   : > { %v3166_v26 = vpop.f32.mrf.mxu1 }
 0x306   : > { %v1711_v55 = vsel %vm3921_vm6, %v1702_v47, -1e+30 }
 0x307   : > { %v1696_v28 = vpop.f32.mrf.mxu1  ;;  %v1721_v63 = vsel %vm1494_vm2, %v1711_v55, -inf }
 0x309   : > { %v3167_v29 = vpop.f32.mrf.mxu1 }
 0x30b   : > { %v1555_v32 = vpop.f32.mrf.mxu0  ;;  %v1816_v33 = vpop.f32.mrf.mxu1 }
 0x30c   : > { %v1699_v35 = vmul.f32 0.35355338, %v1555_v32  ;;  %v3919_v36 = vmul.f32 0.35355338, %v1816_v33 }
 0x30d   : > { %v3148_v37 = vpop.f32.mrf.mxu0  ;;  %v3178_v38 = vpop.f32.mrf.mxu1 }
 0x30e   : > { %v1708_v40 = vsel %vm3921_vm6, %v1699_v35, -1e+30  ;;  %v1913_v41 = vsel %vm3921_vm6, %v3919_v36, -1e+30 }
 0x30f   : > { %v1558_v44 = vpop.f32.mrf.mxu0  ;;  %v1819_v45 = vpop.f32.mrf.mxu1  ;;  %v1712_v46 = vsel %vm1494_vm2, %v1708_v40, -inf }
 0x310   : > { %1713 = vmax.xlane.f32.xlu1 %v1712_v46 }
 0x311   : > { %v3149_v49 = vpop.f32.mrf.mxu0  ;;  %v3179_v43 = vpop.f32.mrf.mxu1 }
 0x312   : > { %v1986_v49 = vld [vmem:[#allocation3 + $0x8] sm:$0xf] }
 0x313   : > { %v1647_v50 = vpop.f32.mrf.mxu0  ;;  %v1902_v51 = vpop.f32.mrf.mxu1  ;;  %v2085_v43 = vsel %vm1991_vm4, %v1986_v49, 0 }
 0x314   : > { %v1701_v53 = vmul.f32 0.35355338, %v1647_v50  ;;  %v3934_v54 = vmul.f32 0.35355338, %v1902_v51  ;;  %1716 = vmax.xlane.f32.xlu1 %v1715_v52 }
 0x315   : > { %v3160_v56 = vpop.f32.mrf.mxu0  ;;  %v3190_v57 = vpop.f32.mrf.mxu1 }
 0x316   : > { %v1710_v58 = vsel %vm3921_vm6, %v1701_v53, -1e+30  ;;  %v1915_v59 = vsel %vm3921_vm6, %v3934_v54, -1e+30  ;;  %v2131_v53 = vsel %vm1991_vm4, %v1987_v39, 0 }
 0x317   : > { %v1650_v60 = vpop.f32.mrf.mxu0  ;;  %v1905_v61 = vpop.f32.mrf.mxu1  ;;  %v1718_v0 = vsel %vm1494_vm2, %v1710_v58, -inf }
 0x318   : > { %1722 = vmax.xlane.f32.xlu1 %v1721_v63  ;;  %1719 = vmax.xlane.f32.xlu0 %v1718_v0  ;;  %v2272_v60 = vld [vmem:[%s4196_s9] sm:$0xf] }
 0x319   : > { %v3161_v42 = vpop.f32.mrf.mxu0  ;;  %v3191_v1 = vpop.f32.mrf.mxu1  ;;  %v2281_v61 = vsel %vm1991_vm4, %v2272_v60, 0  ;;  %v1952_v63 = vld [vmem:[#allocation5] sm:$0xff] }
 0x31a   : > { %v1953_v1 = vld [vmem:[#allocation5 + $0x8] sm:$0xff] }
 0x31b   : > { %v1773_v2 = vpop.f32.mrf.mxu0 }
 0x31c   : > { %v1908_v3 = vmul.f32 0.35355338, %v1773_v2 }
 0x31d   : > { %v3172_v4 = vpop.f32.mrf.mxu0 }
 0x31e   : > { %v1912_v5 = vsel %vm3921_vm6, %v1908_v3, -1e+30  ;;  %v1954_v4 = vld [vmem:[#allocation5 + $0x10] sm:$0xff] }
 0x31f   : > { %v1776_v6 = vpop.f32.mrf.mxu0 }
 0x321   : > { %v3173_v7 = vpop.f32.mrf.mxu0 }
 0x322   : > { %v1955_v7 = vld [vmem:[#allocation5 + $0x18] sm:$0xff] }
 0x323   : > { %v1859_v8 = vpop.f32.mrf.mxu0 }
 0x324   : > { %v1910_v11 = vmul.f32 0.35355338, %v1859_v8 }
 0x325   : > { %v3184_v12 = vpop.f32.mrf.mxu0 }
 0x326   : > { %v1914_v13 = vsel %vm3921_vm6, %v1910_v11, -1e+30 }
 0x327   : > { %v1862_v62 = vpop.f32.mrf.mxu0 }
 0x329   : > { %v3185_v14 = vpop.f32.mrf.mxu0 }
 0x32a   : > { %v2273_v14 = vld [vmem:[%s4196_s9 + $0x4] sm:$0xf] }
 0x399   : > { %v1714_v16 = vpop.xlane.xlu1 %1713 }
 0x39a   : > { %v1724_v17 = vmax.f32 %v1507_v15, %v1714_v16  ;;  %v2327_v16 = vsel %vm1991_vm4, %v2273_v14, 0 }
 0x39c   : > { %1728 = vst.msk [vmem:[#allocation4] sm:$0xff] %vm1485_vm5, %v1724_v17 }
 0x39d   : > { %v1717_v19 = vpop.xlane.xlu1 %1716 }
 0x39e   : > { %v1725_v20 = vmax.f32 %v1508_v18, %v1717_v19 }
 0x3a0   : > { %1729 = vst.msk [vmem:[#allocation4 + $0x8] sm:$0xff] %vm1485_vm5, %v1725_v20  ;;  %v1976_v20 = vld [vmem:[#allocation6] sm:$0xff] }
 0x3a1   : > { %v1723_v23 = vpop.xlane.xlu1 %1722  ;;  %v1720_v24 = vpop.xlane.xlu0 %1719 }
 0x3a2   : > { %v1727_v25 = vmax.f32 %v1510_v21, %v1723_v23  ;;  %v1726_v26 = vmax.f32 %v1509_v22, %v1720_v24  ;;  %v1977_v24 = vld [vmem:[#allocation6 + $0x8] sm:$0xff] }
 0x3a3   : > { %v1916_v27 = vld [vmem:[#allocation4] sm:$0xff] }
 0x3a4   : > { %1731 = vst.msk [vmem:[#allocation4 + $0x18] sm:$0xff] %vm1485_vm5, %v1727_v25  ;;  %1730 = vst.msk [vmem:[#allocation4 + $0x10] sm:$0xff] %vm1485_vm5, %v1726_v26  ;;  %1922 = vperm.xlu0 %3327, %v1916_v27  }
 0x3a7   : > { %v1917_v28 = vld [vmem:[#allocation4 + $0x8] sm:$0xff] }
 0x3a8   : > { %1927 = vperm.xlu1 %3328, %v1917_v28  }
 0x3ab   : > { %v1918_v29 = vld [vmem:[#allocation4 + $0x10] sm:$0xff]  ;;  %v1919_v30 = vld [vmem:[#allocation4 + $0x18] sm:$0xff] }
 0x3ac   : > { %1932 = vperm.xlu1 %3328, %v1918_v29  }
 0x3b0   : > { %1937 = vperm.xlu1 %3328, %v1919_v30   ;;  %v1978_v30 = vld [vmem:[#allocation6 + $0x10] sm:$0xff] }
 0x41f   : > { %v1923_v31 = vpop.permute.xlu0 %1922 }
 0x420   : > { %v1940_v32 = vsub.f32 %v1912_v5, %v1923_v31 }
 0x422   : > { %v1944_v33 = vmul.f32 1.442695, %v1940_v32 }
 0x423   : > { %v1928_v34 = vpop.permute.xlu1 %1927 }
 0x424   : > { %3365 = vpow2.f32 %v1944_v33  ;;  %v1941_v35 = vsub.f32 %v1913_v41, %v1928_v34 }
 0x426   : > { %v1946_v37 = vmul.f32 1.442695, %v1941_v35 }
 0x427   : > { %v1933_v38 = vpop.permute.xlu1 %1932 }
 0x428   : > { %3367 = vpow2.f32 %v1946_v37  ;;  %v1942_v40 = vsub.f32 %v1914_v13, %v1933_v38  ;;  %v1979_v37 = vld [vmem:[#allocation6 + $0x18] sm:$0xff] }
 0x42a   : > { %v1948_v44 = vmul.f32 1.442695, %v1942_v40 }
 0x42b   : > { %v1938_v45 = vpop.permute.xlu1 %1937 }
 0x42c   : > { %3369 = vpow2.f32 %v1948_v44  ;;  %v1943_v46 = vsub.f32 %v1915_v59, %v1938_v45 }
 0x42e   : > { %v1950_v47 = vmul.f32 1.442695, %v1943_v46 }
 0x430   : > { %3371 = vpow2.f32 %v1950_v47 }
 0x431   : > { %v3366_v48 = vpop.eup %3365 }
 0x432   : > { %v1956_v36 = vsel %vm1494_vm2, %v3366_v48, 0.0  ;;  %v1980_v41 = vpack.c.bf16 %v3366_v48, %v3366_v48 }
 0x433   : > { %1957 = vadd.xlane.f32.xlu1 %v1956_v36 }
 0x434   : > { %3195 = vmatmul.mubr.msk.bf16.vlgmr.msra.gmra.mxu0 %vm1494_vm2, %v1980_v41  ;;  %2181 = vst.msk [vmem:[%s3951_s27] sm:$0xf] %vm1214_vm3, %v1980_v41  ;;  %v2274_v41 = vld [vmem:[%s4196_s9 + $0x8] sm:$0xf] }
 0x435   : > { %v3368_v50 = vpop.eup %3367  ;;  %3205 = vmatpush3.bf16.msra.mxu0 %v2085_v43  ;;  %3206 = vmatprep.mubr.msk.bf16.mxu0 %vm3467_vm1, %v3466_v9  ;;  %v2373_v39 = vsel %vm1991_vm4, %v2274_v41, 0 }
 0x436   : > { %v1959_v51 = vsel %vm1494_vm2, %v3368_v50, 0.0  ;;  %v1981_v52 = vpack.c.bf16 %v3368_v50, %v3368_v50  ;;  %3216 = vmatprep.subr.bf16.mxu0 %v3466_v9 }
 0x437   : > { %1960 = vadd.xlane.f32.xlu0 %v1959_v51 }
 0x438   : > { %3201 = vmatmul.mubr.msk.bf16.vlgmr.msra.gmra.mxu1 %vm1494_vm2, %v1981_v52  ;;  %2182 = vst.msk [vmem:[%s3951_s27 + $0x4] sm:$0xf] %vm1214_vm3, %v1981_v52 }
 0x439   : > { %v3370_v54 = vpop.eup %3369  ;;  %3211 = vmatpush3.bf16.msra.mxu1 %v2131_v53  ;;  %3212 = vmatprep.mubr.msk.bf16.mxu1 %vm3467_vm1, %v3466_v9  ;;  %v2275_v53 = vld [vmem:[%s4196_s9 + $0xc] sm:$0xf] }
 0x43a   : > { %v1962_v55 = vsel %vm1494_vm2, %v3370_v54, 0.0  ;;  %v1982_v56 = vpack.c.bf16 %v3370_v54, %v3370_v54  ;;  %3222 = vmatprep.subr.bf16.mxu1 %v3466_v9 }
 0x43b   : > { %1963 = vadd.xlane.f32.xlu1 %v1962_v55 }
 0x43c   : > { %3207 = vmatmul.mubr.msk.bf16.vlgmr.msra.gmra.mxu0 %vm1494_vm2, %v1982_v56  ;;  %2183 = vst.msk [vmem:[%s3951_s27 + $0x8] sm:$0xf] %vm1214_vm3, %v1982_v56  ;;  %v2419_v56 = vsel %vm1991_vm4, %v2275_v53, 0 }
 0x43d   : > { %v3372_v57 = vpop.eup %3371  ;;  %3218 = vmatprep.mubr.msk.bf16.mxu0 %vm3467_vm1, %v3466_v9  ;;  %3217 = vmatpush3.bf16.msra.mxu0 %v2281_v61 }
 0x43e   : > { %v1965_v58 = vsel %vm1494_vm2, %v3372_v57, 0.0  ;;  %v1983_v59 = vpack.c.bf16 %v3372_v57, %v3372_v57  ;;  %3228 = vmatprep.subr.bf16.mxu0 %v3466_v9 }
 0x43f   : > { %1966 = vadd.xlane.f32.xlu1 %v1965_v58 }
 0x440   : > { %3213 = vmatmul.mubr.msk.bf16.vlgmr.msra.gmra.mxu1 %vm1494_vm2, %v1983_v59  ;;  %2184 = vst.msk [vmem:[%s3951_s27 + $0xc] sm:$0xf] %vm1214_vm3, %v1983_v59 }
 0x441   : > { %3224 = vmatprep.mubr.msk.bf16.mxu1 %vm3467_vm1, %v3466_v9  ;;  %3223 = vmatpush3.bf16.msra.mxu1 %v2327_v16 }
 0x442   : > { %3234 = vmatprep.subr.bf16.mxu1 %v3466_v9 }
 0x4bc   : > { %v1958_v0 = vpop.xlane.xlu1 %1957 }
 0x4bd   : > { %v1968_v42 = vadd.f32 %v1958_v0, %v1952_v63 }
 0x4bf   : > { %1972 = vst.msk [vmem:[#allocation5] sm:$0xff] %vm1485_vm5, %v1968_v42 }
 0x4c0   : > { %v1961_v2 = vpop.xlane.xlu0 %1960 }
 0x4c1   : > { %v1969_v3 = vadd.f32 %v1961_v2, %v1953_v1 }
 0x4c3   : > { %1973 = vst.msk [vmem:[#allocation5 + $0x8] sm:$0xff] %vm1485_vm5, %v1969_v3 }
 0x4c4   : > { %v1964_v5 = vpop.xlane.xlu1 %1963 }
 0x4c5   : > { %v1970_v6 = vadd.f32 %v1964_v5, %v1954_v4 }
 0x4c6   : > { %v2185_v8 = vld [vmem:[#allocation5] sm:$0xff] }
 0x4c7   : > { %1974 = vst.msk [vmem:[#allocation5 + $0x10] sm:$0xff] %vm1485_vm5, %v1970_v6  ;;  %3373 = vrcp.f32 %v2185_v8 }
 0x4c8   : > { %v1967_v10 = vpop.xlane.xlu1 %1966 }
 0x4c9   : > { %v1971_v11 = vadd.f32 %v1967_v10, %v1955_v7 }
 0x4ca   : > { %v2186_v12 = vld [vmem:[#allocation5 + $0x8] sm:$0xff] }
 0x4cb   : > { %1975 = vst.msk [vmem:[#allocation5 + $0x18] sm:$0xff] %vm1485_vm5, %v1971_v11  ;;  %3375 = vrcp.f32 %v2186_v12 }
 0x4ce   : > { %v2187_v13 = vld [vmem:[#allocation5 + $0x10] sm:$0xff] }
 0x4cf   : > { %3377 = vrcp.f32 %v2187_v13 }
 0x4d2   : > { %v2188_v62 = vld [vmem:[#allocation5 + $0x18] sm:$0xff] }
 0x4d3   : > { %3379 = vrcp.f32 %v2188_v62 }
 0x4d4   : > { %v4015_v15 = vpop.eup %3373 }
 0x4d5   : > { %2246 = vperm.xlu1 %3328, %v4015_v15  }
 0x4d8   : > { %v4020_v17 = vpop.eup %3375 }
 0x4d9   : > { %2251 = vperm.xlu0 %3327, %v4020_v17  }
 0x4dc   : > { %v4023_v18 = vpop.eup %3377 }
 0x4dd   : > { %2256 = vperm.xlu1 %3328, %v4023_v18  }
 0x4e0   : > { %v4026_v19 = vpop.eup %3379 }
 0x4e1   : > { %2261 = vperm.xlu1 %3328, %v4026_v19  }
 0x4f4   : > { %v2029_v21 = vpop.f32.mrf.mxu0 }
 0x4f5   : > { %v2173_v22 = vadd.f32 %v2029_v21, %v1976_v20 }
 0x4f6   : > { %v3196_v23 = vpop.f32.mrf.mxu0 }
 0x4f7   : > { %2177 = vst.msk [vmem:[#allocation6] sm:$0xff] %vm1494_vm2, %v2173_v22  ;;  %v2936_v23 = vld [vmem:[%s4197_s10] ss:$0 sm:$0xff] }
 0x4f8   : > { %v2032_v25 = vpop.f32.mrf.mxu0  ;;  %v2075_v26 = vpop.f32.mrf.mxu1 }
 0x4f9   : > { %v2174_v27 = vadd.f32 %v2075_v26, %v1977_v24 }
 0x4fa   : > { %v3197_v28 = vpop.f32.mrf.mxu0  ;;  %v3202_v29 = vpop.f32.mrf.mxu1 }
 0x4fb   : > { %2178 = vst.msk [vmem:[#allocation6 + $0x8] sm:$0xff] %vm1494_vm2, %v2174_v27 }
 0x4fc   : > { %v2078_v31 = vpop.f32.mrf.mxu1  ;;  %v2121_v32 = vpop.f32.mrf.mxu0 }
 0x4fd   : > { %v2175_v33 = vadd.f32 %v2121_v32, %v1978_v30  ;;  %v3387_v30 = vld [vmem:[%s3639_s2] sm:$0xff] }
 0x4fe   : > { %v3203_v34 = vpop.f32.mrf.mxu1  ;;  %v3208_v35 = vpop.f32.mrf.mxu0  ;;  %v2240_v36 = vld [vmem:[#allocation6] sm:$0xff] }
 0x4ff   : > { %2179 = vst.msk [vmem:[#allocation6 + $0x10] sm:$0xff] %vm1494_vm2, %v2175_v33  ;;  %v4069_v34 = vld [vmem:[%s3951_s27] sm:$0xff]  }
 0x500   : > { %v2124_v38 = vpop.f32.mrf.mxu0  ;;  %v2167_v40 = vpop.f32.mrf.mxu1 }
 0x501   : > { %v2176_v44 = vadd.f32 %v2167_v40, %v1979_v37  ;;  %v2962_v38 = vunpack.c.h.bf16 %v4069_v34 }
 0x502   : > { %v3209_v45 = vpop.f32.mrf.mxu0  ;;  %v3214_v46 = vpop.f32.mrf.mxu1  ;;  %v2241_v51 = vld [vmem:[#allocation6 + $0x8] sm:$0xff] }
 0x503   : > { %2180 = vst.msk [vmem:[#allocation6 + $0x18] sm:$0xff] %vm1494_vm2, %v2176_v44 }
 0x504   : > { %v2170_v47 = vpop.f32.mrf.mxu1 }
 0x506   : > { %v3215_v48 = vpop.f32.mrf.mxu1  ;;  %v2242_v58 = vld [vmem:[#allocation6 + $0x10] sm:$0xff] }
 0x507   : > { %v3354_v48 = vld [vmem:[%s4200_s13] sm:$0xff]  }
 0x50a   : > { %v2243_v61 = vld [vmem:[#allocation6 + $0x18] sm:$0xff] }
 0x550   : > { %v2247_v49 = vpop.permute.xlu1 %2246 }
 0x551   : > { %v2264_v43 = vmul.f32 %v2247_v49, %v2240_v36 }
 0x553   : > { %v2268_v50 = vpack.c.bf16 %v2264_v43, %v2264_v43 }
 0x554   : > { %v2252_v52 = vpop.permute.xlu0 %2251 }
 0x555   : > { %v2265_v54 = vmul.f32 %v2252_v52, %v2241_v51  ;;  %3219 = vmatmul.mubr.msk.bf16.vlgmr.msra.gmra.mxu0 %vm1494_vm2, %v2268_v50  ;;  %v2937_v50 = vld [vmem:[%s4198_s11] ss:$0 sm:$0xff] }
 0x556   : > { %3229 = vmatpush3.bf16.msra.mxu0 %v2373_v39  ;;  %3230 = vmatprep.mubr.msk.bf16.mxu0 %vm3467_vm1, %v3466_v9  ;;  %v2938_v51 = vld [vmem:[%s4199_s12] ss:$0 sm:$0xff] }
 0x557   : > { %v2269_v55 = vpack.c.bf16 %v2265_v54, %v2265_v54  ;;  %3240 = vmatprep.subr.bf16.mxu0 %v3466_v9 }
 0x558   : > { %v2257_v57 = vpop.permute.xlu1 %2256 }
 0x559   : > { %v2266_v59 = vmul.f32 %v2257_v57, %v2242_v58  ;;  %3225 = vmatmul.mubr.msk.bf16.vlgmr.msra.gmra.mxu1 %vm1494_vm2, %v2269_v55  ;;  %v3355_v55 = vld [vmem:[%s4202_s15 + $0x38] sm:$0xff]   ;;  %v3357_v57 = vld [vmem:[%s4202_s15 + $0x28] sm:$0xff]   ;;  %v3358_v58 = vld [vmem:[%s4202_s15 + $0x20] sm:$0xff]  }
 0x55a   : > { %3235 = vmatpush3.bf16.msra.mxu1 %v2419_v56  ;;  %3236 = vmatprep.mubr.msk.bf16.mxu1 %vm3467_vm1, %v3466_v9  ;;  %v3356_v56 = vld [vmem:[%s4202_s15 + $0x30] sm:$0xff]  }
 0x55b   : > { %v2270_v60 = vpack.c.bf16 %v2266_v59, %v2266_v59  ;;  %3248 = vmatprep.subr.bf16.mxu1 %v3466_v9  ;;  %v3359_v59 = vld [vmem:[%s4202_s15 + $0x18] sm:$0xff]  }
 0x55c   : > { %v2262_v63 = vpop.permute.xlu1 %2261 }
 0x55d   : > { %v2267_v0 = vmul.f32 %v2262_v63, %v2243_v61  ;;  %3231 = vmatmul.mubr.msk.bf16.vlgmr.msra.gmra.mxu0 %vm1494_vm2, %v2270_v60  ;;  %v3360_v60 = vld [vmem:[%s4202_s15 + $0x10] sm:$0xff]   ;;  %v3361_v61 = vld [vmem:[%s4202_s15 + $0x8] sm:$0xff]   ;;  %v3362_v63 = vld [vmem:[%s4202_s15] sm:$0xff]  }
 0x55e   : > { %3244 = vmatprep.mubr.msk.bf16.mxu0 %vm3467_vm1, %v3466_v9 }
 0x55f   : > { %v2271_v42 = vpack.c.bf16 %v2267_v0, %v2267_v0  ;;  %v2939_v0 = vld [vmem:[%s4201_s14] ss:$0 sm:$0xff] }
 0x561   : > { %3237 = vmatmul.mubr.msk.bf16.vlgmr.msra.gmra.mxu1 %vm1494_vm2, %v2271_v42 }
 0x562   : > { %3264 = vmatprep.mubr.msk.bf16.mxu1 %vm3467_vm1, %v3466_v9  ;;  %3249 = vmatpush3.bf16.msra.mxu1 %v3355_v55 }
 0x563   : > { %3250 = vmatprep.subr.bf16.mxu1 %v3466_v9 }
 0x566   : > { %3251 = vmatpush3.bf16.msra.mxu1 %v3356_v56 }
 0x567   : > { %3252 = vmatprep.subr.bf16.mxu1 %v3466_v9 }
 0x56a   : > { %3253 = vmatpush3.bf16.msra.mxu1 %v3357_v57 }
 0x56b   : > { %3254 = vmatprep.subr.bf16.mxu1 %v3466_v9 }
 0x56e   : > { %3255 = vmatpush3.bf16.msra.mxu1 %v3358_v58 }
 0x56f   : > { %3256 = vmatprep.subr.bf16.mxu1 %v3466_v9 }
 0x572   : > { %3257 = vmatpush3.bf16.msra.mxu1 %v3359_v59 }
 0x573   : > { %3258 = vmatprep.subr.bf16.mxu1 %v3466_v9 }
 0x576   : > { %3259 = vmatpush3.bf16.msra.mxu1 %v3360_v60 }
 0x577   : > { %3260 = vmatprep.subr.bf16.mxu1 %v3466_v9 }
 0x57a   : > { %3261 = vmatpush3.bf16.msra.mxu1 %v3361_v61 }
 0x57b   : > { %3262 = vmatprep.subr.bf16.mxu1 %v3466_v9 }
 0x57e   : > { %3263 = vmatpush3.bf16.msra.mxu1 %v3362_v63 }
 0x615   : > { %v2317_v1 = vpop.f32.mrf.mxu0 }
 0x616   : > { %v2461_v11 = vsel %vm666_vm0, %v2317_v1, 0.0 }
 0x617   : > { %v3220_v2 = vpop.f32.mrf.mxu0 }
 0x619   : > { %v2320_v3 = vpop.f32.mrf.mxu0  ;;  %v2363_v4 = vpop.f32.mrf.mxu1 }
 0x61a   : > { %v2462_v7 = vsel %vm666_vm0, %v2363_v4, 0.0 }
 0x61b   : > { %v3221_v5 = vpop.f32.mrf.mxu0  ;;  %v3226_v6 = vpop.f32.mrf.mxu1  ;;  %v2463_v13 = vadd.f32 %v2462_v7, %v2461_v11 }
 0x61d   : > { %v2366_v8 = vpop.f32.mrf.mxu1  ;;  %v2409_v10 = vpop.f32.mrf.mxu0 }
 0x61e   : > { %v2464_v12 = vsel %vm666_vm0, %v2409_v10, 0.0 }
 0x61f   : > { %v3227_v62 = vpop.f32.mrf.mxu1  ;;  %v3232_v14 = vpop.f32.mrf.mxu0  ;;  %v2465_v16 = vadd.f32 %v2464_v12, %v2463_v13 }
 0x620   : > { %v2943_v14 = vld [vmem:[%s4203_s16] ss:$0 sm:$0xff] }
 0x621   : > { %v2412_v20 = vpop.f32.mrf.mxu0  ;;  %v2455_v21 = vpop.f32.mrf.mxu1 }
 0x622   : > { %v2466_v22 = vsel %vm666_vm0, %v2455_v21, 0.0 }
 0x623   : > { %v2467_v24 = vadd.f32 %v2466_v22, %v2465_v16  ;;  %v3233_v25 = vpop.f32.mrf.mxu0  ;;  %v3238_v26 = vpop.f32.mrf.mxu1 }
 0x625   : > { %v2475_v27 = vadd.f32 %v2936_v23, %v2467_v24  ;;  %v2458_v28 = vpop.f32.mrf.mxu1 }
 0x627   : > { %v3239_v29 = vpop.f32.mrf.mxu1  ;;  %v4063_v31 = vadd.f32 %v3387_v30, %v2475_v27 }
 0x629   : > { %v2479_v32 = vsel %vm666_vm0, %v4063_v31, 0.0 }
 0x62a   : > { %2480 = vadd.xlane.f32.xlu1 %v2479_v32  ;;  %v2961_v32 = vunpack.c.l.bf16 %v4069_v34 }
 0x63b   : > { %2215 = vperm.xlu1 %3328, %v4020_v17   ;;  %v3353_v17 = vld [vmem:[%s4200_s13 + $0x8] sm:$0xff]  }
 0x63c   : > { %3241 = vmatpush3.bf16.msra.mxu0 %v3353_v17 }
 0x63d   : > { %3242 = vmatprep.subr.bf16.mxu0 %v3466_v9 }
 0x640   : > { %3243 = vmatpush3.bf16.msra.mxu0 %v3354_v48 }
 0x6b3   : > { %v2481_v33 = vpop.xlane.xlu1 %2480 }
 0x6b4   : > { %v2482_v35 = vmul.f32 0.03125, %v2481_v33  ;;  %v2967_v33 = vld [vmem:[%s3951_s27 + $0x8] sm:$0xff]  }
 0x6b6   : > { %v2483_v37 = vsub.f32 %v4063_v31, %v2482_v35 }
 0x6b7   : > { %v2216_v40 = vpop.permute.xlu1 %2215 }
 0x6b8   : > { %v2229_v44 = vmul.f32 %v2962_v38, %v2216_v40  ;;  %v2484_v45 = vmul.f32 %v2483_v37, %v2483_v37  ;;  %v2966_v38 = vunpack.c.h.bf16 %v2967_v33 }
 0x6ba   : > { %v2233_v46 = vpack.c.bf16 %v2229_v44, %v2229_v44  ;;  %v2485_v47 = vsel %vm666_vm0, %v2484_v45, 0.0 }
 0x6bb   : > { %2486 = vadd.xlane.f32.xlu0 %v2485_v47 }
 0x6bc   : > { %2237 = vst.msk [vmem:[%s3951_s27 + $0x4] sm:$0xf] %vm1214_vm3, %v2233_v46  ;;  %v2965_v46 = vunpack.c.l.bf16 %v2967_v33 }
 0x744   : > { %v2487_v49 = vpop.xlane.xlu0 %2486 }
 0x745   : > { %v2488_v36 = vmul.f32 0.03125, %v2487_v49 }
 0x747   : > { %v2489_v41 = vadd.f32 1e-05, %v2488_v36  ;;  %v2952_v36 = vld [vmem:[%s4204_s17] ss:$0 sm:$0xff] }
 0x749   : > { %3381 = vrsqrt.f32 %v2489_v41  ;;  %v2953_v41 = vld [vmem:[%s4248_s21] ss:$0 sm:$0xff] }
 0x756   : > { %v3382_v43 = vpop.eup %3381 }
 0x757   : > { %v2491_v39 = vmul.f32 %v3382_v43, %v2483_v37 }
 0x759   : > { %v2498_v52 = vmul.f32 %v2937_v50, %v2491_v39 }
 0x75b   : > { %v2505_v53 = vadd.f32 %v2938_v51, %v2498_v52 }
 0x75d   : > { %v2506_v54 = vpack.c.bf16 %v2505_v53, %v2505_v53 }
 0x75f   : > { %3245 = vmatmul.mubr.msk.bf16.vlgmr.msra.gmra.mxu0 %vm666_vm0, %v2506_v54 }
 0x81f   : > { %v2567_v42 = vpop.f32.mrf.mxu0 }
 0x820   : > { %v2568_v1 = vadd.f32 %v2939_v0, %v2567_v42 }
 0x821   : > { %v3246_v2 = vpop.f32.mrf.mxu0 }
 0x822   : > { %v2574_v3 = vmul.f32 0.044715, %v2568_v1  ;;  %v2573_v12 = vmul.f32 0.5, %v2568_v1 }
 0x823   : > { %v2570_v4 = vpop.f32.mrf.mxu0 }
 0x824   : > { %v2575_v5 = vmul.f32 %v2574_v3, %v2568_v1 }
 0x825   : > { %v3247_v6 = vpop.f32.mrf.mxu0 }
 0x826   : > { %v2576_v7 = vmul.f32 %v2575_v5, %v2568_v1 }
 0x828   : > { %v2577_v8 = vadd.f32 %v2576_v7, %v2568_v1 }
 0x82a   : > { %v2578_v10 = vmul.f32 0.7978846, %v2577_v8 }
 0x82c   : > { %3383 = vtanh.f32 %v2578_v10 }
 0x839   : > { %v3384_v11 = vpop.eup %3383 }
 0x83a   : > { %v2580_v13 = vadd.f32 1.0, %v3384_v11 }
 0x83c   : > { %v2581_v9 = vmul.f32 %v2580_v13, %v2573_v12 }
 0x83e   : > { %v2582_v62 = vpack.c.bf16 %v2581_v9, %v2581_v9 }
 0x840   : > { %3265 = vmatmul.mubr.bf16.vlgmr.msra.gmra.mxu1 %v2582_v62 }
 0x900   : > { %v2688_v16 = vpop.f32.mrf.mxu1 }
 0x901   : > { %v2689_v20 = vadd.f32 %v2943_v14, %v2688_v16 }
 0x902   : > { %v3266_v21 = vpop.f32.mrf.mxu1 }
 0x903   : > { %v2694_v22 = vadd.f32 %v2689_v20, %v4063_v31 }
 0x904   : > { %v2691_v23 = vpop.f32.mrf.mxu1 }
 0x905   : > { %v2697_v24 = vsel %vm666_vm0, %v2694_v22, 0.0 }
 0x906   : > { %2698 = vadd.xlane.f32.xlu0 %v2697_v24  ;;  %v3267_v25 = vpop.f32.mrf.mxu1 }
 0x91c   : > { %2210 = vperm.xlu0 %3327, %v4015_v15  }
 0x920   : > { %2225 = vperm.xlu0 %3327, %v4026_v19  }
 0x98f   : > { %v2699_v26 = vpop.xlane.xlu0 %2698 }
 0x990   : > { %v2700_v27 = vmul.f32 0.03125, %v2699_v26 }
 0x992   : > { %v2701_v28 = vsub.f32 %v2694_v22, %v2700_v27 }
 0x994   : > { %v2702_v29 = vmul.f32 %v2701_v28, %v2701_v28 }
 0x996   : > { %v2703_v30 = vsel %vm666_vm0, %v2702_v29, 0.0 }
 0x997   : > { %2704 = vadd.xlane.f32.xlu1 %v2703_v30  ;;  %v2211_v31 = vpop.permute.xlu0 %2210 }
 0x998   : > { %v2228_v35 = vmul.f32 %v2961_v32, %v2211_v31 }
 0x99a   : > { %v2232_v37 = vpack.c.bf16 %v2228_v35, %v2228_v35 }
 0x99b   : > { %v2226_v15 = vpop.permute.xlu0 %2225 }
 0x99c   : > { %2236 = vst.msk [vmem:[%s3951_s27] sm:$0xf] %vm1214_vm3, %v2232_v37  ;;  %v2231_v19 = vmul.f32 %v2966_v38, %v2226_v15 }
 0x99e   : > { %v2235_v40 = vpack.c.bf16 %v2231_v19, %v2231_v19 }
 0x9a0   : > { %2239 = vst.msk [vmem:[%s3951_s27 + $0xc] sm:$0xf] %vm1214_vm3, %v2235_v40 }
 0x9a8   : > { %2220 = vperm.xlu1 %3328, %v4023_v18  }
 0xa20   : > { %v2705_v44 = vpop.xlane.xlu1 %2704 }
 0xa21   : > { %v2706_v34 = vmul.f32 0.03125, %v2705_v44 }
 0xa23   : > { %v2707_v45 = vadd.f32 1e-05, %v2706_v34 }
 0xa24   : > { %v2221_v47 = vpop.permute.xlu1 %2220 }
 0xa25   : > { %3385 = vrsqrt.f32 %v2707_v45  ;;  %v2230_v17 = vmul.f32 %v2965_v46, %v2221_v47 }
 0xa27   : > { %v2234_v48 = vpack.c.bf16 %v2230_v17, %v2230_v17 }
 0xa29   : > { %2238 = vst.msk [vmem:[%s3951_s27 + $0x8] sm:$0xf] %vm1214_vm3, %v2234_v48 }
 0xa32   : > { %v3386_v49 = vpop.eup %3385 }
 0xa33   : > { %v2709_v18 = vmul.f32 %v3386_v49, %v2701_v28 }
 0xa35   : > { %v2716_v43 = vmul.f32 %v2952_v36, %v2709_v18 }
 0xa37   : > { %v2723_v50 = vadd.f32 %v2953_v41, %v2716_v43 }
 0xa39   : > { %2724 = vst.msk [vmem:[%s637_s25] sm:$0xff] %vm666_vm0, %v2723_v50 }
 0xa3a   : > { %3401 = shalt.err (!%p3398_p5)
}
 0xa3b   : > { %s3402_s0 = scalar_lea.hbm %s2746_s6, 128  ;;  %s3406_s21 = scalar_lea.hbm %s4249_s5, 256 }
 0xa3c   : > { %p3403_p6 = scmp.ne.s32.totalorder %s2746_s6, %s3402_s0  ;;  %p3407_p10 = scmp.lt.s32.totalorder %s2746_s6, %s4249_s5 }
 0xa3d   : > { %p3408_p11 = scmp.lt.s32.totalorder %s3406_s21, %s3402_s0 }
 0xa3e   : > { %p3404_p7 = pnand %p3403_p6, %p3616_p4 }
 0xa3f   : > { %p3409_p12 = por %p3408_p11, %p3407_p10 }
 0xa40   : > { %p3405_p9 = pneg %p3404_p7 }
 0xa42   : > { %p3410_p13 = pnand %p3409_p12, %p3405_p9 }
 0xa44   : > { %3413 = shalt.err (!%p3410_p13)
}
 0xa45   : > { %3268 = dma.vmem_to_hbm [thread:$0]  (%p3616_p4), %s2749_s3, 128, %s2746_s6, %s2726_s7  }
 0xa46 PF: > { %s4250_s26 = sld [smem:[#allocation13_spill]] }
 0xa47   : > { %s4251_s27 = sld [smem:[#allocation10_spill]] }
 0xa4c   : > { %p3274_p0 = scmp.ge.s32.totalorder %s4250_s26, 2 }
 0xa4d   : > { %s2763_s29 = sand.u32 1, %s4251_s27  }
 0xa4e   : > { %p3271_p1 = pnand %p3274_p0, %p3623_p8  ;;  %s2764_s28 = scalar_lea.sflag [#allocation8], %s2763_s29 }
 0xa50   : > { %p3272_p2 = pneg %p3271_p1 }
 0xa52   : > { %3439 = dma.done.wait (%p3272_p2), %s2764_s28, 128  }
 0xa53   : > { %3441 = vsyncadd (%p3272_p2), %s2764_s28, 4294967168  ;;  %s34_s25 = sadd.s32 1, %s4250_s26   ;;  %s4253_s24 = sld [smem:[#allocation11_spill]] }
 0xa54   : > { %p31_p3 = scmp.ge.s32.totalorder %s34_s25, 4   ;;  %s4254_s23 = sld [smem:[#allocation16_spill]] }
 0xa55   : > { %s4255_s4 = sld [smem:[#allocation12_spill]]  ;;  %s4257_s1 = smov %s3448_s22 }
 0xa56   : > { %s4256_s2 = sld [smem:[#allocation14_spill]] }
 0xa57   :  { %33 = sbr.rel (!%p31_p3) target bundleno = 15 (0xf), region = 154 }
 0xa59   : > { %s4258_s22 = smov %s4253_s24 }
 0xa5b   : > { %s4259_s24 = smov %s4255_s4 }
 0xa5c   :  { %2780 = vsyncpa [#allocation8], 1 }
 0xa5d   :  { %2782 = vsyncpa [#allocation8 + $0x1], 1 }

</bundles_post_ra>
